<compile_context>
chip_gen: v7x
topology: tpu7x:2x2x1
jax: 0.10.0
libtpu: 0.0.40
codegen_flags: <defaults>
</compile_context>

<pallas_src>
import jax
import jax.numpy as jnp
from jax.experimental import pallas as pl
from jax.experimental.pallas import tpu as pltpu


# ----------------------------------------------------------------------------
# Pallas kernel
# ----------------------------------------------------------------------------
def _im2col3x3(pad_ref, H, W, C):
    """(H+2, W+2, C) zero-padded slab -> (H*W, 9*C) im2col matrix.

    Only 3 sublane-shifted loads of the slab are issued; the 3 ky shifts are
    leading-dim slices of the concatenated value, so the per-conv relayout
    cost is ~3 copies instead of 9.
    """
    shifted = [pad_ref[:, kx:kx + W, :] for kx in range(3)]      # 3 x (H+2, W, C)
    xcat = jnp.concatenate(shifted, axis=-1)                     # (H+2, W, 3C)
    rows = [xcat[ky:ky + H].reshape(H * W, 3 * C) for ky in range(3)]
    return jnp.concatenate(rows, axis=-1)                        # (H*W, 9C)


def _basic_block_kernel(x_ref, w1_ref, b1_ref, w2_ref, b2_ref, out_ref,
                        xpad_ref, ypad_ref):
    """Fused BasicBlock for one image (stride=1, no downsample, eval-mode BN).

    x_ref   : (1, H, W, C)   input block, C lane-dense (padded to 128*k)
    w1_ref  : (9*C, C)       conv1 weight, taps flattened, BN1 scale folded in
    b1_ref  : (1, C)         folded BN1 bias
    w2_ref  : (9*C, C)       conv2 weight, BN2 scale folded in
    b2_ref  : (1, C)         folded BN2 bias
    out_ref : (1, H, W, C)
    xpad_ref, ypad_ref : (H+2, W+2, C) VMEM scratch slabs with zero halo
    """
    _, H, W, C = x_ref.shape
    x = x_ref[0]                                        # (H, W, C)

    # --- conv1 + bn1 + relu (intermediate stays entirely in VMEM) -----------
    xpad_ref[...] = jnp.zeros_like(xpad_ref)            # zero halo (cheap VPU)
    xpad_ref[1:H + 1, 1:W + 1, :] = x
    im1 = _im2col3x3(xpad_ref, H, W, C)                 # (H*W, 9C)
    y = jnp.dot(im1, w1_ref[...], preferred_element_type=jnp.float32)
    y = jnp.maximum(y + b1_ref[0], 0.0)                 # (H*W, C)

    # --- conv2 + bn2 + residual add + relu -----------------------------------
    ypad_ref[...] = jnp.zeros_like(ypad_ref)
    ypad_ref[1:H + 1, 1:W + 1, :] = y.reshape(H, W, C)
    im2 = _im2col3x3(ypad_ref, H, W, C)                 # (H*W, 9C)
    out = jnp.dot(im2, w2_ref[...], preferred_element_type=jnp.float32)
    out = out + b2_ref[0] + x.reshape(H * W, C)         # residual = own input
    out = jnp.maximum(out, 0.0)
    out_ref[0] = out.reshape(H, W, C)                   # lane-dense store


# ----------------------------------------------------------------------------
# Wrapper (glue: layout, BN folding, channel padding, pallas_call)
# ----------------------------------------------------------------------------
def _fold_bn(gamma, beta, mean, var, eps=1e-5):
    scale = gamma / jnp.sqrt(var + eps)
    bias = beta - mean * scale
    return scale, bias


def _prep_weight(w_oihw, scale, cp):
    """OIHW conv weight -> (9*cp, cp) tap matrix with BN scale folded in."""
    cout, cin = w_oihw.shape[0], w_oihw.shape[1]
    w = jnp.transpose(w_oihw, (2, 3, 1, 0)).astype(jnp.float32)   # (3,3,Cin,Cout)
    w = w * scale.reshape(1, 1, 1, cout).astype(jnp.float32)      # fold BN scale
    w = jnp.pad(w, ((0, 0), (0, 0), (0, cp - cin), (0, cp - cout)))
    return w.reshape(9 * cp, cp)


def _prep_bias(bias, cp):
    c = bias.shape[0]
    return jnp.pad(bias.astype(jnp.float32), (0, cp - c)).reshape(1, cp)


def basic_block_forward(x_nchw, params):
    """BasicBlock forward. Input/output in PyTorch NCHW layout."""
    x = jnp.transpose(x_nchw, (0, 2, 3, 1)).astype(jnp.float32)   # -> NHWC
    N, H, W, C = x.shape
    cp = ((C + 127) // 128) * 128                                 # lane-dense C

    s1, b1 = _fold_bn(params["bn1_gamma"], params["bn1_beta"],
                      params["bn1_mean"], params["bn1_var"])
    s2, b2 = _fold_bn(params["bn2_gamma"], params["bn2_beta"],
                      params["bn2_mean"], params["bn2_var"])
    w1 = _prep_weight(params["conv1_w"], s1, cp)
    w2 = _prep_weight(params["conv2_w"], s2, cp)
    b1p = _prep_bias(b1, cp)
    b2p = _prep_bias(b2, cp)

    # Zero-pad channels so padded output channels stay exactly zero.
    x_p = jnp.pad(x, ((0, 0), (0, 0), (0, 0), (0, cp - C)))

    out_p = pl.pallas_call(
        _basic_block_kernel,
        grid=(N,),
        in_specs=[
            pl.BlockSpec((1, H, W, cp), lambda b: (b, 0, 0, 0)),
            pl.BlockSpec((9 * cp, cp), lambda b: (0, 0)),
            pl.BlockSpec((1, cp), lambda b: (0, 0)),
            pl.BlockSpec((9 * cp, cp), lambda b: (0, 0)),
            pl.BlockSpec((1, cp), lambda b: (0, 0)),
        ],
        out_specs=pl.BlockSpec((1, H, W, cp), lambda b: (b, 0, 0, 0)),
        out_shape=jax.ShapeDtypeStruct((N, H, W, cp), jnp.float32),
        scratch_shapes=[
            pltpu.VMEM((H + 2, W + 2, cp), jnp.float32),   # padded conv1 input
            pltpu.VMEM((H + 2, W + 2, cp), jnp.float32),   # padded conv2 input
        ],
        compiler_params=pltpu.CompilerParams(
            dimension_semantics=("parallel",),
            vmem_limit_bytes=32 * 1024 * 1024),
    )(x_p, w1, b1p, w2, b2p)

    out = out_p[..., :C]                                          # drop pad lanes
    return jnp.transpose(out, (0, 3, 1, 2))                       # -> NCHW


# ----------------------------------------------------------------------------
# Pure-JAX reference (for correctness check)
# ----------------------------------------------------------------------------
def _ref_forward(x_nchw, params):
    x = jnp.transpose(x_nchw, (0, 2, 3, 1)).astype(jnp.float32)

    def conv(v, w_oihw):
        w = jnp.transpose(w_oihw, (2, 3, 1, 0))  # HWIO
        return jax.lax.conv_general_dilated(
            v, w, (1, 1), "SAME",
            dimension_numbers=("NHWC", "HWIO", "NHWC"))

    s1, b1 = _fold_bn(params["bn1_gamma"], params["bn1_beta"],
                      params["bn1_mean"], params["bn1_var"])
    s2, b2 = _fold_bn(params["bn2_gamma"], params["bn2_beta"],
                      params["bn2_mean"], params["bn2_var"])
    out = jnp.maximum(conv(x, params["conv1_w"]) * s1 + b1, 0.0)
    out = conv(out, params["conv2_w"]) * s2 + b2 + x
    out = jnp.maximum(out, 0.0)
    return jnp.transpose(out, (0, 3, 1, 2))


# ----------------------------------------------------------------------------
if __name__ == "__main__":
    key = jax.random.PRNGKey(0)
    N, C, H, W = 2, 4, 16, 16          # inplanes = planes = 4, stride = 1
    inplanes = planes = C

    keys = jax.random.split(key, 8)
    x = jax.random.normal(keys[0], (N, C, H, W), jnp.float32)

    params = {
        "conv1_w": 0.2 * jax.random.normal(keys[1], (planes, inplanes, 3, 3),
                                           jnp.float32),
        "conv2_w": 0.2 * jax.random.normal(keys[2], (planes, planes, 3, 3),
                                           jnp.float32),
        "bn1_gamma": 1.0 + 0.1 * jax.random.normal(keys[3], (planes,), jnp.float32),
        "bn1_beta": 0.1 * jax.random.normal(keys[4], (planes,), jnp.float32),
        "bn1_mean": 0.05 * jax.random.normal(keys[5], (planes,), jnp.float32),
        "bn1_var": jnp.abs(1.0 + 0.1 * jax.random.normal(keys[6], (planes,),
                                                         jnp.float32)),
        "bn2_gamma": jnp.ones((planes,), jnp.float32),
        "bn2_beta": jnp.zeros((planes,), jnp.float32),
        "bn2_mean": 0.05 * jax.random.normal(keys[7], (planes,), jnp.float32),
        "bn2_var": jnp.ones((planes,), jnp.float32),
    }

    out = basic_block_forward(x, params)
    out = jax.block_until_ready(out)

    ref = jax.block_until_ready(_ref_forward(x, params))
    assert out.shape == (N, C, H, W)
    assert jnp.allclose(out, ref, rtol=1e-4, atol=1e-4), (
        float(jnp.max(jnp.abs(out - ref))))

    print("KERNEL_OK")
</pallas_src>

<mosaic_0001>
module attributes {stable_mosaic.version = 11 : i64} {
  func.func @_basic_block_kernel(%arg0: i32, %arg1: memref<1x16x16x128xf32, #tpu.memory_space<vmem>>, %arg2: memref<1152x128xf32, #tpu.memory_space<vmem>>, %arg3: memref<1x128xf32, #tpu.memory_space<vmem>>, %arg4: memref<1152x128xf32, #tpu.memory_space<vmem>>, %arg5: memref<1x128xf32, #tpu.memory_space<vmem>>, %arg6: memref<1x16x16x128xf32, #tpu.memory_space<vmem>>, %arg7: memref<18x18x128xf32, #tpu.memory_space<vmem>>, %arg8: memref<18x18x128xf32, #tpu.memory_space<vmem>>) attributes {dimension_semantics = [#tpu.dimension_semantics<parallel>], iteration_bounds = array<i64: 2>, scalar_prefetch = 0 : i64, scratch_operands = 2 : i64, tpu.core_type = #tpu.core_type<tc>, window_params = [{transform_indices = @transform_0, window_bounds = array<i64: 1, 16, 16, 128>}, {pipeline_mode = #tpu.pipeline_mode<synchronous>, transform_indices = @transform_1, window_bounds = array<i64: 1152, 128>}, {pipeline_mode = #tpu.pipeline_mode<synchronous>, transform_indices = @transform_2, window_bounds = array<i64: 1, 128>}, {pipeline_mode = #tpu.pipeline_mode<synchronous>, transform_indices = @transform_3, window_bounds = array<i64: 1152, 128>}, {pipeline_mode = #tpu.pipeline_mode<synchronous>, transform_indices = @transform_4, window_bounds = array<i64: 1, 128>}, {transform_indices = @transform_5, window_bounds = array<i64: 1, 16, 16, 128>}]} {
    %c0 = arith.constant 0 : index
    %c0_0 = arith.constant 0 : index
    %c0_1 = arith.constant 0 : index
    %c0_2 = arith.constant 0 : index
    %0 = vector.load %arg1[%c0, %c0_0, %c0_1, %c0_2] : memref<1x16x16x128xf32, #tpu.memory_space<vmem>>, vector<1x16x16x128xf32>
    %1 = vector.shape_cast %0 : vector<1x16x16x128xf32> to vector<16x16x128xf32>
    %cst = arith.constant 0.000000e+00 : f32
    %2 = vector.broadcast %cst : f32 to vector<18x18x128xf32>
    %c0_3 = arith.constant 0 : index
    %c0_4 = arith.constant 0 : index
    %c0_5 = arith.constant 0 : index
    %3 = vector.load %arg7[%c0_3, %c0_4, %c0_5] : memref<18x18x128xf32, #tpu.memory_space<vmem>>, vector<18x18x128xf32>
    tpu.vector_store %arg7[%c0_3, %c0_4, %c0_5], %2 {strides = array<i32>} : memref<18x18x128xf32, #tpu.memory_space<vmem>>, vector<18x18x128xf32>,
    %c1 = arith.constant 1 : index
    %c1_6 = arith.constant 1 : index
    %c0_7 = arith.constant 0 : index
    %4 = vector.load %arg7[%c1, %c1_6, %c0_7] : memref<18x18x128xf32, #tpu.memory_space<vmem>>, vector<16x16x128xf32>
    tpu.vector_store %arg7[%c1, %c1_6, %c0_7], %1 {strides = array<i32>} : memref<18x18x128xf32, #tpu.memory_space<vmem>>, vector<16x16x128xf32>,
    %c0_8 = arith.constant 0 : index
    %c0_9 = arith.constant 0 : index
    %c0_10 = arith.constant 0 : index
    %5 = vector.load %arg7[%c0_8, %c0_9, %c0_10] : memref<18x18x128xf32, #tpu.memory_space<vmem>>, vector<18x16x128xf32>
    %c0_11 = arith.constant 0 : index
    %c1_12 = arith.constant 1 : index
    %c0_13 = arith.constant 0 : index
    %6 = vector.load %arg7[%c0_11, %c1_12, %c0_13] : memref<18x18x128xf32, #tpu.memory_space<vmem>>, vector<18x16x128xf32>
    %c0_14 = arith.constant 0 : index
    %c2 = arith.constant 2 : index
    %c0_15 = arith.constant 0 : index
    %7 = vector.load %arg7[%c0_14, %c2, %c0_15] : memref<18x18x128xf32, #tpu.memory_space<vmem>>, vector<18x16x128xf32>
    %8 = tpu.concatenate %5, %6, %7 in 2 : vector<18x16x128xf32>, vector<18x16x128xf32>, vector<18x16x128xf32> -> vector<18x16x384xf32>
    %9 = vector.extract_strided_slice %8 {offsets = [0, 0, 0], sizes = [16, 16, 384], strides = [1, 1, 1]} : vector<18x16x384xf32> to vector<16x16x384xf32>
    %10 = vector.shape_cast %9 : vector<16x16x384xf32> to vector<256x384xf32>
    %11 = vector.extract_strided_slice %8 {offsets = [1, 0, 0], sizes = [16, 16, 384], strides = [1, 1, 1]} : vector<18x16x384xf32> to vector<16x16x384xf32>
    %12 = vector.shape_cast %11 : vector<16x16x384xf32> to vector<256x384xf32>
    %13 = vector.extract_strided_slice %8 {offsets = [2, 0, 0], sizes = [16, 16, 384], strides = [1, 1, 1]} : vector<18x16x384xf32> to vector<16x16x384xf32>
    %14 = vector.shape_cast %13 : vector<16x16x384xf32> to vector<256x384xf32>
    %15 = tpu.concatenate %10, %12, %14 in 1 : vector<256x384xf32>, vector<256x384xf32>, vector<256x384xf32> -> vector<256x1152xf32>
    %c0_16 = arith.constant 0 : index
    %c0_17 = arith.constant 0 : index
    %16 = vector.load %arg2[%c0_16, %c0_17] : memref<1152x128xf32, #tpu.memory_space<vmem>>, vector<1152x128xf32>
    %cst_18 = arith.constant dense<0.000000e+00> : vector<256x128xf32>
    %17 = tpu.matmul %15, %16, %cst_18 {dimension_numbers = #tpu.dot_dimension_numbers<[1], [0], [0], [1], [0, 0, 1, 1], [], []>} : vector<256x1152xf32>, vector<1152x128xf32>, vector<256x128xf32> -> vector<256x128xf32>
    %c0_19 = arith.constant 0 : index
    %c0_20 = arith.constant 0 : index
    %18 = vector.load %arg3[%c0_19, %c0_20] : memref<1x128xf32, #tpu.memory_space<vmem>>, vector<1x128xf32>
    %19 = vector.shape_cast %18 : vector<1x128xf32> to vector<128xf32>
    %20 = vector.shape_cast %19 : vector<128xf32> to vector<1x128xf32>
    %21 = vector.broadcast %20 : vector<1x128xf32> to vector<256x128xf32>
    %22 = arith.addf %17, %21 : vector<256x128xf32>
    %cst_21 = arith.constant 0.000000e+00 : f32
    %23 = vector.broadcast %cst_21 : f32 to vector<256x128xf32>
    %24 = arith.maximumf %22, %23 : vector<256x128xf32>
    %cst_22 = arith.constant 0.000000e+00 : f32
    %25 = vector.broadcast %cst_22 : f32 to vector<18x18x128xf32>
    %c0_23 = arith.constant 0 : index
    %c0_24 = arith.constant 0 : index
    %c0_25 = arith.constant 0 : index
    %26 = vector.load %arg8[%c0_23, %c0_24, %c0_25] : memref<18x18x128xf32, #tpu.memory_space<vmem>>, vector<18x18x128xf32>
    tpu.vector_store %arg8[%c0_23, %c0_24, %c0_25], %25 {strides = array<i32>} : memref<18x18x128xf32, #tpu.memory_space<vmem>>, vector<18x18x128xf32>,
    %27 = vector.shape_cast %24 : vector<256x128xf32> to vector<16x16x128xf32>
    %c1_26 = arith.constant 1 : index
    %c1_27 = arith.constant 1 : index
    %c0_28 = arith.constant 0 : index
    %28 = vector.load %arg8[%c1_26, %c1_27, %c0_28] : memref<18x18x128xf32, #tpu.memory_space<vmem>>, vector<16x16x128xf32>
    tpu.vector_store %arg8[%c1_26, %c1_27, %c0_28], %27 {strides = array<i32>} : memref<18x18x128xf32, #tpu.memory_space<vmem>>, vector<16x16x128xf32>,
    %c0_29 = arith.constant 0 : index
    %c0_30 = arith.constant 0 : index
    %c0_31 = arith.constant 0 : index
    %29 = vector.load %arg8[%c0_29, %c0_30, %c0_31] : memref<18x18x128xf32, #tpu.memory_space<vmem>>, vector<18x16x128xf32>
    %c0_32 = arith.constant 0 : index
    %c1_33 = arith.constant 1 : index
    %c0_34 = arith.constant 0 : index
    %30 = vector.load %arg8[%c0_32, %c1_33, %c0_34] : memref<18x18x128xf32, #tpu.memory_space<vmem>>, vector<18x16x128xf32>
    %c0_35 = arith.constant 0 : index
    %c2_36 = arith.constant 2 : index
    %c0_37 = arith.constant 0 : index
    %31 = vector.load %arg8[%c0_35, %c2_36, %c0_37] : memref<18x18x128xf32, #tpu.memory_space<vmem>>, vector<18x16x128xf32>
    %32 = tpu.concatenate %29, %30, %31 in 2 : vector<18x16x128xf32>, vector<18x16x128xf32>, vector<18x16x128xf32> -> vector<18x16x384xf32>
    %33 = vector.extract_strided_slice %32 {offsets = [0, 0, 0], sizes = [16, 16, 384], strides = [1, 1, 1]} : vector<18x16x384xf32> to vector<16x16x384xf32>
    %34 = vector.shape_cast %33 : vector<16x16x384xf32> to vector<256x384xf32>
    %35 = vector.extract_strided_slice %32 {offsets = [1, 0, 0], sizes = [16, 16, 384], strides = [1, 1, 1]} : vector<18x16x384xf32> to vector<16x16x384xf32>
    %36 = vector.shape_cast %35 : vector<16x16x384xf32> to vector<256x384xf32>
    %37 = vector.extract_strided_slice %32 {offsets = [2, 0, 0], sizes = [16, 16, 384], strides = [1, 1, 1]} : vector<18x16x384xf32> to vector<16x16x384xf32>
    %38 = vector.shape_cast %37 : vector<16x16x384xf32> to vector<256x384xf32>
    %39 = tpu.concatenate %34, %36, %38 in 1 : vector<256x384xf32>, vector<256x384xf32>, vector<256x384xf32> -> vector<256x1152xf32>
    %c0_38 = arith.constant 0 : index
    %c0_39 = arith.constant 0 : index
    %40 = vector.load %arg4[%c0_38, %c0_39] : memref<1152x128xf32, #tpu.memory_space<vmem>>, vector<1152x128xf32>
    %cst_40 = arith.constant dense<0.000000e+00> : vector<256x128xf32>
    %41 = tpu.matmul %39, %40, %cst_40 {dimension_numbers = #tpu.dot_dimension_numbers<[1], [0], [0], [1], [0, 0, 1, 1], [], []>} : vector<256x1152xf32>, vector<1152x128xf32>, vector<256x128xf32> -> vector<256x128xf32>
    %c0_41 = arith.constant 0 : index
    %c0_42 = arith.constant 0 : index
    %42 = vector.load %arg5[%c0_41, %c0_42] : memref<1x128xf32, #tpu.memory_space<vmem>>, vector<1x128xf32>
    %43 = vector.shape_cast %42 : vector<1x128xf32> to vector<128xf32>
    %44 = vector.shape_cast %43 : vector<128xf32> to vector<1x128xf32>
    %45 = vector.broadcast %44 : vector<1x128xf32> to vector<256x128xf32>
    %46 = arith.addf %41, %45 : vector<256x128xf32>
    %47 = vector.shape_cast %1 : vector<16x16x128xf32> to vector<256x128xf32>
    %48 = arith.addf %46, %47 : vector<256x128xf32>
    %cst_43 = arith.constant 0.000000e+00 : f32
    %49 = vector.broadcast %cst_43 : f32 to vector<256x128xf32>
    %50 = arith.maximumf %48, %49 : vector<256x128xf32>
    %51 = vector.shape_cast %50 : vector<256x128xf32> to vector<16x16x128xf32>
    %c0_44 = arith.constant 0 : index
    %c0_45 = arith.constant 0 : index
    %c0_46 = arith.constant 0 : index
    %c0_47 = arith.constant 0 : index
    %52 = vector.load %arg6[%c0_44, %c0_45, %c0_46, %c0_47] : memref<1x16x16x128xf32, #tpu.memory_space<vmem>>, vector<1x16x16x128xf32>
    %53 = vector.shape_cast %52 : vector<1x16x16x128xf32> to vector<16x16x128xf32>
    %54 = vector.shape_cast %51 : vector<16x16x128xf32> to vector<1x16x16x128xf32>
    tpu.vector_store %arg6[%c0_44, %c0_45, %c0_46, %c0_47], %54 {strides = array<i32>} : memref<1x16x16x128xf32, #tpu.memory_space<vmem>>, vector<1x16x16x128xf32>,
    return
  }
  func.func @transform_0(%arg0: i32) -> (i32, i32, i32, i32) {
    %c0_i32 = arith.constant 0 : i32
    %c0_i32_0 = arith.constant 0 : i32
    %c0_i32_1 = arith.constant 0 : i32
    %c0_i32_2 = arith.constant 0 : i32
    return %arg0, %c0_i32, %c0_i32_0, %c0_i32_1 : i32, i32, i32, i32
  }
  func.func @transform_1(%arg0: i32) -> (i32, i32) {
    %c0_i32 = arith.constant 0 : i32
    %c0_i32_0 = arith.constant 0 : i32
    %c0_i32_1 = arith.constant 0 : i32
    return %c0_i32, %c0_i32_0 : i32, i32
  }
  func.func @transform_2(%arg0: i32) -> (i32, i32) {
    %c0_i32 = arith.constant 0 : i32
    %c0_i32_0 = arith.constant 0 : i32
    %c0_i32_1 = arith.constant 0 : i32
    return %c0_i32, %c0_i32_0 : i32, i32
  }
  func.func @transform_3(%arg0: i32) -> (i32, i32) {
    %c0_i32 = arith.constant 0 : i32
    %c0_i32_0 = arith.constant 0 : i32
    %c0_i32_1 = arith.constant 0 : i32
    return %c0_i32, %c0_i32_0 : i32, i32
  }
  func.func @transform_4(%arg0: i32) -> (i32, i32) {
    %c0_i32 = arith.constant 0 : i32
    %c0_i32_0 = arith.constant 0 : i32
    %c0_i32_1 = arith.constant 0 : i32
    return %c0_i32, %c0_i32_0 : i32, i32
  }
  func.func @transform_5(%arg0: i32) -> (i32, i32, i32, i32) {
    %c0_i32 = arith.constant 0 : i32
    %c0_i32_0 = arith.constant 0 : i32
    %c0_i32_1 = arith.constant 0 : i32
    %c0_i32_2 = arith.constant 0 : i32
    return %arg0, %c0_i32, %c0_i32_0, %c0_i32_1 : i32, i32, i32, i32
  }
}

</mosaic_0001>

<bundles_post_ra>
// kernel: tpu_custom_call.1
= control target key start
LH: loop header
LB: loop body
LE: loop exit
PB: predicated region body
PF: predicated region fallthrough
CT: control target
= control target key end

     0   :  { %10 = vsyncpa [#allocation5], 0  ;;  %s6901_s0 = inlined_call_operand.hbm [shape: f32[2,16,16,128], index: 0, kind: input, shape index: {}]   ;;  %s6902_s1 = inlined_call_operand.hbm [shape: f32[1152,128], index: 1, kind: input, shape index: {}]   ;;  %s6903_s2 = inlined_call_operand.vmem [shape: f32[1,128], index: 2, kind: input, shape index: {}]   ;;  %s6904_s3 = inlined_call_operand.hbm [shape: f32[1152,128], index: 3, kind: input, shape index: {}]   ;;  %s6905_s4 = inlined_call_operand.vmem [shape: f32[1,128], index: 4, kind: input, shape index: {}]   ;;  %s6906_s5 = inlined_call_operand.hbm [shape: f32[2,16,16,128], index: 5, kind: output, shape index: {}]  }
   0x1   :  { %12 = vsyncpa [#allocation5 + $0x1], 0 }
   0x2   :  { %13 = vsyncpa [#allocation8], 0 }
   0x3   :  { %14 = vsyncpa [#allocation6], 0 }
   0x4   :  { %16 = vsyncpa [#allocation6 + $0x1], 0  ;;  %s5065_s18 = smov 0   ;;  %s5067_s19 = smov 0  }
   0x5   :  { %s5069_s20 = smov 0   ;;  %s5071_s21 = smov 0  }
   0x6 LB: > { %s5086_s22 = sadd.s32 4294967295, %s5023_s21   ;;  %s3480_s23 = sadd.s32 4294967294, %s5023_s21   ;;  %s5023_s21 = sphi %s5071_s21, %s7093_s21   ;;  %s5019_s20 = sphi %s5069_s20, %s7092_s20   ;;  %s5015_s19 = sphi %s5067_s19, %s7091_s19   ;;  %s5011_s18 = sphi %s5065_s18, %s7090_s18  }
   0x7   : > { %p42_p0 = scmp.ne.s32.totalorder %s5015_s19, %s5011_s18  ;;  %p6907_p1 = scmp.eq.s32.totalorder %s5086_s22, 0 }
   0x8   : > { %p156_p3 = scmp.eq.s32.totalorder %s3480_s23, 1  ;;  %p3481_p5 = scmp.ge.s32.totalorder %s5023_s21, 1 }
   0x9   : > { %p5095_p4 = por %p6907_p1, %p42_p0  ;;  %p163_p7 = scmp.lt.s32.totalorder %s5023_s21, 3 }
   0xa   : > { %p5100_p6 = por %p156_p3, %p42_p0  ;;  %s5025_s27 = smov [#allocation7]  }
   0xb   : > { %s6978_s24 = scalar_select %p5095_p4, 1, 0 }
   0xc   : > { %s6979_s25 = scalar_select %p5100_p6, 1, 0 }
   0xd   : > { %p5105_p8 = pnand %p3481_p5, %p163_p7  ;;  %s175_s28 = sshll.u32 %s5025_s27, 4  ;;  %s5109_s28 = int_to_ptr.vmem [resolvable:$true] %s175_s28 }
   0xe   : > { %s5026_s30 = smov [#allocation9]   ;;  %s4867_s9 = scalar_lea.hbm %s6902_s1, 18432 }
   0xf   : > { %p4682_p9 = pneg %p5105_p8  ;;  %s191_s6 = sshll.u32 %s5026_s30, 4  ;;  %s5120_s6 = int_to_ptr.vmem [resolvable:$true] %s191_s6 }
  0x10   : > { %p4868_p12 = scmp.ne.s32.totalorder %s6902_s1, %s4867_s9  ;;  %p4874_p5 = scmp.lt.u32.totalorder %s4867_s9, %s6902_s1 }
  0x11   : > { %p5116_p11 = pnand %p4682_p9, %p6907_p1 }
  0x13   : > { %p4869_p13 = pneg %p5116_p11 }
  0x15   : > { %p4870_p0 = pnand %p4869_p13, %p4868_p12 }
  0x17   : > { %p4871_p3 = pneg %p4870_p0 }
  0x19   : > { %p4876_p7 = pnand %p4874_p5, %p4871_p3 }
  0x1b   : > { %4879 = shalt.err (!%p4876_p7)
}
  0x1c   : > { %s4880_s14 = scalar_lea.vmem %s5109_s28, 18432  ;;  %p4888_p2 = scmp.lt.s32.totalorder %s5109_s28, %s5109_s28 }
  0x1d   : > { %p4881_p9 = scmp.ne.s32.totalorder %s5109_s28, %s4880_s14  ;;  %p4889_p12 = scmp.lt.s32.totalorder %s4880_s14, %s4880_s14 }
  0x1f   : > { %p4883_p10 = pnand %p4881_p9, %p4869_p13  ;;  %p4890_p0 = por %p4889_p12, %p4888_p2 }
  0x21   : > { %p4884_p1 = pneg %p4883_p10 }
  0x23   : > { %p4891_p6 = pnand %p4890_p0, %p4884_p1 }
  0x25   : > { %4894 = shalt.err (!%p4891_p6)
}
  0x26   : > { %s5027_s15 = smov 128   ;;  %s5028_s16 = smov 8  }
  0x27   : > { %4685 = dma.hbm_to_vmem [thread:$0]  (!%p5116_p11), %s6902_s1, 18432, %s5109_s28, [#allocation8], %s5027_s15, %s5027_s15, %s5028_s16  }
  0x28   : > { %s4895_s7 = scalar_lea.hbm %s6904_s3, 18432 }
  0x29   : > { %p4896_p1 = scmp.ne.s32.totalorder %s6904_s3, %s4895_s7  ;;  %p4902_p10 = scmp.lt.u32.totalorder %s4895_s7, %s6904_s3 }
  0x2b   : > { %p4898_p2 = pnand %p4896_p1, %p4869_p13 }
  0x2d   : > { %p4899_p6 = pneg %p4898_p2 }
  0x2f   : > { %p4904_p3 = pnand %p4902_p10, %p4899_p6 }
  0x31   : > { %4907 = shalt.err (!%p4904_p3)
}
  0x32   : > { %s4908_s28 = scalar_lea.vmem %s5120_s6, 18432  ;;  %p4916_p12 = scmp.lt.s32.totalorder %s5120_s6, %s5120_s6 }
  0x33   : > { %p4909_p5 = scmp.ne.s32.totalorder %s5120_s6, %s4908_s28  ;;  %p4917_p0 = scmp.lt.s32.totalorder %s4908_s28, %s4908_s28 }
  0x35   : > { %p4911_p7 = pnand %p4909_p5, %p4869_p13  ;;  %p4918_p1 = por %p4917_p0, %p4916_p12 }
  0x37   : > { %p4912_p9 = pneg %p4911_p7 }
  0x39   : > { %p4919_p2 = pnand %p4918_p1, %p4912_p9 }
  0x3b   : > { %4922 = shalt.err (!%p4919_p2)
}
  0x3c   : > { %4688 = dma.hbm_to_vmem [thread:$0]  (!%p5116_p11), %s6904_s3, 18432, %s5120_s6, [#allocation8], %s5027_s15, %s5027_s15, %s5028_s16  }
  0x3d   : > { %s5181_s29 = sadd.s32 1, %s5023_s21   ;;  %s29_s14 = sadd.s32 1, %s5019_s20 }
  0x3e   : > { %s26_s17 = ssub.s32 %s5023_s21, %s5181_s29  ;;  %p36_p13 = scmp.ne.s32.totalorder %s5019_s20, %s5015_s19 }
  0x3f   : > { %p27_p6 = scmp.eq.s32.totalorder %s26_s17, 0  ;;  %p37_p10 = scmp.eq.s32.totalorder %s5023_s21, 0 }
  0x40   : > { %p6982_p3 = scmp.eq.s32.totalorder %s5086_s22, 1  ;;  %p4699_p7 = scmp.lt.s32.totalorder %s5023_s21, 2 }
  0x41   : > { %s5197_s27 = scalar_select %p27_p6, %s5019_s20, %s29_s14  }
  0x42   : > { %p5191_p5 = por %p6982_p3, %p36_p13  ;;  %p38_p9 = por %p37_p10, %p36_p13 }
  0x43   : > { %s208_s30 = sand.u32 1, %s5019_s20   ;;  %s3500_s6 = sshll.u32 %s5023_s21, 12 }
  0x44   : > { %s6983_s23 = scalar_select %p5191_p5, 1, 0 }
  0x45   : > { %s3485_s7 = sshll.u32 %s208_s30, 8  ;;  %s5204_s10 = scalar_lea.hbm %s6901_s0, %s3500_s6 }
  0x46   : > { %s212_s11 = scalar_lea.vmem [#allocation4], %s3485_s7  ;;  %p5208_p11 = pnand %p4699_p7, %p38_p9 }
  0x47   : > { %s219_s28 = sshll.u32 %s212_s11, 4  ;;  %s5212_s13 = scalar_lea.sflag [#allocation5], %s208_s30  ;;  %s5206_s28 = int_to_ptr.vmem [resolvable:$true] %s219_s28 }
  0x48   : > { %s4923_s14 = scalar_lea.hbm %s5204_s10, 4096  ;;  %p4925_p0 = pneg %p5208_p11 }
  0x49   : > { %p4924_p12 = scmp.ne.s32.totalorder %s5204_s10, %s4923_s14  ;;  %s4928_s6 = scalar_lea.hbm %s6901_s0, 8192 }
  0x4a   : > { %p4929_p13 = scmp.lt.u32.totalorder %s5204_s10, %s6901_s0  ;;  %p4930_p6 = scmp.lt.u32.totalorder %s4928_s6, %s4923_s14 }
  0x4b   : > { %p4926_p1 = pnand %p4925_p0, %p4924_p12  ;;  %p4932_p3 = scmp.lt.u32.totalorder %s4923_s14, %s5204_s10 }
  0x4c   : > { %p4931_p10 = por %p4930_p6, %p4929_p13 }
  0x4d   : > { %p4927_p2 = pneg %p4926_p1 }
  0x4e   : > { %p4933_p7 = por %p4932_p3, %p4931_p10 }
  0x50   : > { %p4934_p9 = pnand %p4933_p7, %p4927_p2 }
  0x52   : > { %4937 = shalt.err (!%p4934_p9)
}
  0x53   : > { %s4938_s30 = scalar_lea.vmem %s5206_s28, 4096  ;;  %s5029_s11 = smov [#allocation4]  }
  0x54   : > { %p4939_p12 = scmp.ne.s32.totalorder %s5206_s28, %s4938_s30  ;;  %s4943_s17 = sshll.u32 %s5029_s11, 4  ;;  %s4944_s17 = int_to_ptr.vmem [resolvable:$false] %s4943_s17 }
  0x55   : > { %s4945_s7 = scalar_lea.vmem %s4944_s17, 8192  ;;  %p4946_p4 = scmp.lt.s32.totalorder %s5206_s28, %s4944_s17 }
  0x56   : > { %p4941_p1 = pnand %p4939_p12, %p4925_p0  ;;  %p4947_p13 = scmp.lt.s32.totalorder %s4945_s7, %s4938_s30 }
  0x58   : > { %p4942_p5 = pneg %p4941_p1  ;;  %p4948_p6 = por %p4947_p13, %p4946_p4 }
  0x5a   : > { %p4949_p10 = pnand %p4948_p6, %p4942_p5 }
  0x5c   : > { %4952 = shalt.err (!%p4949_p10)
}
  0x5d   : > { %4692 = dma.hbm_to_vmem [thread:$0]  (!%p5208_p11), %s5204_s10, 4096, %s5206_s28, %s5212_s13, %s5027_s15, %s5027_s15, %s5028_s16  }
  0x5e   : > { %231 = sbr.rel (%p5105_p8) target bundleno = 1535 (0x5ff), region = 40 }
  0x65   : > { %s5246_s14 = sand.u32 1, %s5015_s19   ;;  %p6985_p4 = scmp.ne.s32.totalorder %s6978_s24, 0 }
  0x66   : > { %s3489_s6 = sshll.u32 %s5246_s14, 8  ;;  %s234_s8 = scalar_lea.sflag [#allocation5], %s5246_s14 }
  0x67   : > { %s5252_s12 = scalar_lea.vmem [#allocation4], %s3489_s6 }
  0x68   : > { %4998 = dma.done.wait (%p6985_p4), %s234_s8, 4096  }
  0x69   : > { %5000 = vsyncadd (%p6985_p4), %s234_s8, 4294963200  ;;  %p6986_p5 = scmp.eq.s32.totalorder %s5086_s22, 0 }
  0x6b   : > { %5002 = dma.done.wait (%p6986_p5), [#allocation8], 36864   ;;  %p6987_p8 = pmov %p6986_p5 }
  0x6c   : > { %v6910_v0 = vmov 0.0|0.0   ;;  %v5031_v1 = vmov 0.0   ;;  %v499_v2 = vld [vmem:[#allocation7] sm:$0xff]  ;;  %v500_v3 = vld [vmem:[#allocation7 + $0x8] sm:$0xff]  ;;  %v501_v4 = vld [vmem:[#allocation7 + $0x10] sm:$0xff]  ;;  %s6764_s10 = scalar_lea.vmem [#allocation10], %s3489_s6 }
  0x6d   : > { %5004 = vsyncadd (%p6987_p8), [#allocation8], 4294930432  ;;  %3758 = vmatprep.subr.bf16.mxu0 %v6910_v0  ;;  %304 = vst [vmem:[#allocation2] sm:$0xff] %v5031_v1  ;;  %v3759_v5 = vpack.c.bf16 %v500_v3, %v499_v2  ;;  %v502_v6 = vld [vmem:[#allocation7 + $0x18] sm:$0xff]  ;;  %v503_v8 = vld [vmem:[#allocation7 + $0x20] sm:$0xff]  ;;  %s3501_s28 = sshll.u32 %s5086_s22, 12 }
  0x6e   : > { %305 = vst [vmem:[#allocation2 + $0x8] sm:$0xff] %v5031_v1  ;;  %306 = vst [vmem:[#allocation2 + $0x10] sm:$0x3] %v5031_v1  ;;  %v3762_v7 = vpack.c.bf16 %v502_v6, %v501_v4  ;;  %v504_v9 = vld [vmem:[#allocation7 + $0x28] sm:$0xff]  ;;  %v505_v11 = vld [vmem:[#allocation7 + $0x30] sm:$0xff]  ;;  %s3388_s13 = sshll.u32 %s6764_s10, 4  ;;  %s6853_s11 = scalar_lea.hbm %s6906_s5, %s3501_s28  ;;  %s6855_s13 = int_to_ptr.vmem [resolvable:$true] %s3388_s13 }
  0x6f   : > { %307 = vst [vmem:[#allocation2 + $0x18] sm:$0xff] %v5031_v1  ;;  %308 = vst [vmem:[#allocation2 + $0x20] sm:$0xff] %v5031_v1  ;;  %3760 = vmatpush1.bf16.msra.mxu0 %v3759_v5  ;;  %v3765_v10 = vpack.c.bf16 %v504_v9, %v503_v8  ;;  %v506_v12 = vld [vmem:[#allocation7 + $0x38] sm:$0xff]  ;;  %v507_v15 = vld [vmem:[#allocation7 + $0x40] sm:$0xff]  ;;  %s3375_s22 = scalar_lea.sflag [#allocation6], %s5246_s14  ;;  %s4953_s17 = scalar_lea.vmem %s6855_s13, 4096 }
  0x70   : > { %309 = vst [vmem:[#allocation2 + $0x28] sm:$0x3] %v5031_v1  ;;  %310 = vst [vmem:[#allocation2 + $0x30] sm:$0xff] %v5031_v1  ;;  %3761 = vmatprep.subr.bf16.mxu0 %v6910_v0  ;;  %v3768_v14 = vpack.c.bf16 %v506_v12, %v505_v11  ;;  %v508_v16 = vld [vmem:[#allocation7 + $0x48] sm:$0xff]  ;;  %v5375_v17 = vld [vmem:[%s5252_s12] sm:$0xff]  ;;  %p4954_p11 = scmp.ne.s32.totalorder %s6855_s13, %s4953_s17  ;;  %p7087_p0 = scmp.ne.s32.totalorder %s6983_s23, 0 }
  0x71   : > { %311 = vst [vmem:[#allocation2 + $0x38] sm:$0xff] %v5031_v1  ;;  %312 = vst [vmem:[#allocation2 + $0x40] sm:$0x3] %v5031_v1  ;;  %v5379_v18 = vld [vmem:[%s5252_s12 + $0x8] sm:$0xff]  ;;  %v5382_v19 = vld [vmem:[%s5252_s12 + $0x10] sm:$0xff]  ;;  %v3771_v22 = vpack.c.bf16 %v508_v16, %v507_v15  ;;  %s5032_s7 = smov [#allocation10]  }
  0x72   : > { %313 = vst [vmem:[#allocation2 + $0x48] sm:$0xff] %v5031_v1  ;;  %314 = vst [vmem:[#allocation2 + $0x50] sm:$0xff] %v5031_v1  ;;  %v5387_v20 = vld [vmem:[%s5252_s12 + $0x18] sm:$0xff]  ;;  %v5390_v21 = vld [vmem:[%s5252_s12 + $0x20] sm:$0xff]  ;;  %p4955_p2 = pnand %p4954_p11, %p7087_p0  ;;  %s4957_s6 = sshll.u32 %s5032_s7, 4  ;;  %s4958_s6 = int_to_ptr.vmem [resolvable:$false] %s4957_s6 }
  0x73   : > { %315 = vst [vmem:[#allocation2 + $0x58] sm:$0x3] %v5031_v1  ;;  %316 = vst [vmem:[#allocation2 + $0x60] sm:$0xff] %v5031_v1  ;;  %3763 = vmatpush1.bf16.msra.mxu0 %v3762_v7  ;;  %v5395_v23 = vld [vmem:[%s5252_s12 + $0x28] sm:$0xff]  ;;  %v509_v24 = vld [vmem:[#allocation7 + $0x50] sm:$0xff]  ;;  %s4959_s8 = scalar_lea.vmem %s4958_s6, 8192  ;;  %p4960_p7 = scmp.lt.s32.totalorder %s6855_s13, %s4958_s6 }
  0x74   : > { %317 = vst [vmem:[#allocation2 + $0x68] sm:$0xff] %v5031_v1  ;;  %318 = vst [vmem:[#allocation2 + $0x70] sm:$0x3] %v5031_v1  ;;  %3764 = vmatprep.subr.bf16.mxu0 %v6910_v0  ;;  %v510_v25 = vld [vmem:[#allocation7 + $0x58] sm:$0xff]  ;;  %v5400_v26 = vld [vmem:[%s5252_s12 + $0x30] sm:$0xff]  ;;  %p4956_p3 = pneg %p4955_p2  ;;  %p4961_p9 = scmp.lt.s32.totalorder %s4959_s8, %s4953_s17 }
  0x75   : > { %319 = vst [vmem:[#allocation2 + $0x78] sm:$0xff] %v5031_v1  ;;  %320 = vst [vmem:[#allocation2 + $0x80] sm:$0xff] %v5031_v1  ;;  %v427_v13 = vld [vmem:[#allocation2 + $0x1] sm:$0xff]  ;;  %v5404_v27 = vld [vmem:[%s5252_s12 + $0x38] sm:$0xff]  ;;  %v3774_v31 = vpack.c.bf16 %v510_v25, %v509_v24 }
  0x76   : > { %321 = vst [vmem:[#allocation2 + $0x88] sm:$0x3] %v5031_v1  ;;  %322 = vst [vmem:[#allocation2 + $0x90] sm:$0xff] %v5031_v1  ;;  %714 = vmatprep.mubr.f32.mxu0 %v427_v13  ;;  %v5407_v28 = vld [vmem:[%s5252_s12 + $0x40] sm:$0xff]  ;;  %v5412_v29 = vld [vmem:[%s5252_s12 + $0x48] sm:$0xff]  ;;  %p4962_p12 = por %p4961_p9, %p4960_p7 }
  0x77   : > { %323 = vst [vmem:[#allocation2 + $0x98] sm:$0xff] %v5031_v1  ;;  %324 = vst [vmem:[#allocation2 + $0xa0] sm:$0x3] %v5031_v1  ;;  %3766 = vmatpush1.bf16.msra.mxu0 %v3765_v10  ;;  %v5415_v30 = vld [vmem:[%s5252_s12 + $0x50] sm:$0xff]  ;;  %v5420_v32 = vld [vmem:[%s5252_s12 + $0x58] sm:$0xff] }
  0x78   : > { %325 = vst [vmem:[#allocation2 + $0xa8] sm:$0xff] %v5031_v1  ;;  %326 = vst [vmem:[#allocation2 + $0xb0] sm:$0xff] %v5031_v1  ;;  %3767 = vmatprep.subr.bf16.mxu0 %v6910_v0  ;;  %v511_v33 = vld [vmem:[#allocation7 + $0x60] sm:$0xff]  ;;  %v512_v34 = vld [vmem:[#allocation7 + $0x68] sm:$0xff]  ;;  %p4963_p1 = pnand %p4962_p12, %p4956_p3 }
  0x79   : > { %327 = vst [vmem:[#allocation2 + $0xb8] sm:$0x3] %v5031_v1  ;;  %328 = vst [vmem:[#allocation2 + $0xc0] sm:$0xff] %v5031_v1  ;;  %v5425_v35 = vld [vmem:[%s5252_s12 + $0x60] sm:$0xff]  ;;  %v5429_v36 = vld [vmem:[%s5252_s12 + $0x68] sm:$0xff]  ;;  %v3777_v37 = vpack.c.bf16 %v512_v34, %v511_v33 }
  0x7a   : > { %329 = vst [vmem:[#allocation2 + $0xc8] sm:$0xff] %v5031_v1  ;;  %330 = vst [vmem:[#allocation2 + $0xd0] sm:$0x3] %v5031_v1  ;;  %v5433_v38 = vld [vmem:[%s5252_s12 + $0x70] sm:$0xff]  ;;  %v514_v40 = vld [vmem:[#allocation7 + $0x78] sm:$0xff] }
  0x7b   : > { %331 = vst [vmem:[#allocation2 + $0xd8] sm:$0xff] %v5031_v1  ;;  %332 = vst [vmem:[#allocation2 + $0xe0] sm:$0xff] %v5031_v1  ;;  %3769 = vmatpush1.bf16.msra.mxu0 %v3768_v14  ;;  %v513_v39 = vld [vmem:[#allocation7 + $0x70] sm:$0xff]  ;;  %v5438_v41 = vld [vmem:[%s5252_s12 + $0x78] sm:$0xff] }
  0x7c   : > { %333 = vst [vmem:[#allocation2 + $0xe8] sm:$0x3] %v5031_v1  ;;  %334 = vst [vmem:[#allocation2 + $0xf0] sm:$0xff] %v5031_v1  ;;  %3770 = vmatprep.subr.bf16.mxu0 %v6910_v0  ;;  %v5442_v42 = vld [vmem:[%s5252_s12 + $0x80] sm:$0xff]  ;;  %v3780_v43 = vpack.c.bf16 %v514_v40, %v513_v39  ;;  %v5446_v44 = vld [vmem:[%s5252_s12 + $0x88] sm:$0xff] }
  0x7d   : > { %335 = vst [vmem:[#allocation2 + $0xf8] sm:$0xff] %v5031_v1  ;;  %336 = vst [vmem:[#allocation2 + $0x100] sm:$0x3] %v5031_v1  ;;  %v515_v45 = vld [vmem:[#allocation7 + $0x80] sm:$0xff]  ;;  %v516_v46 = vld [vmem:[#allocation7 + $0x88] sm:$0xff] }
  0x7e   : > { %337 = vst [vmem:[#allocation2 + $0x108] sm:$0xff] %v5031_v1  ;;  %338 = vst [vmem:[#allocation2 + $0x110] sm:$0xff] %v5031_v1  ;;  %v5451_v47 = vld [vmem:[%s5252_s12 + $0x90] sm:$0xff]  ;;  %v5455_v48 = vld [vmem:[%s5252_s12 + $0x98] sm:$0xff]  ;;  %v3783_v50 = vpack.c.bf16 %v516_v46, %v515_v45 }
  0x7f   : > { %339 = vst [vmem:[#allocation2 + $0x118] sm:$0x3] %v5031_v1  ;;  %340 = vst [vmem:[#allocation2 + $0x120] sm:$0xff] %v5031_v1  ;;  %3772 = vmatpush1.bf16.msra.mxu0 %v3771_v22  ;;  %v5458_v49 = vld [vmem:[%s5252_s12 + $0xa0] sm:$0xff]  ;;  %v5463_v51 = vld [vmem:[%s5252_s12 + $0xa8] sm:$0xff] }
  0x80   : > { %341 = vst [vmem:[#allocation2 + $0x128] sm:$0xff] %v5031_v1  ;;  %342 = vst [vmem:[#allocation2 + $0x130] sm:$0x3] %v5031_v1  ;;  %3773 = vmatprep.subr.bf16.mxu0 %v6910_v0  ;;  %v5466_v52 = vld [vmem:[%s5252_s12 + $0xb0] sm:$0xff]  ;;  %v518_v54 = vld [vmem:[#allocation7 + $0x98] sm:$0xff] }
  0x81   : > { %343 = vst [vmem:[#allocation2 + $0x138] sm:$0xff] %v5031_v1  ;;  %344 = vst [vmem:[#allocation2 + $0x140] sm:$0xff] %v5031_v1  ;;  %v517_v53 = vld [vmem:[#allocation7 + $0x90] sm:$0xff]  ;;  %v5472_v55 = vld [vmem:[%s5252_s12 + $0xb8] sm:$0xff] }
  0x82   : > { %345 = vst [vmem:[#allocation2 + $0x148] sm:$0x3] %v5031_v1  ;;  %346 = vst [vmem:[#allocation2 + $0x150] sm:$0xff] %v5031_v1  ;;  %v5476_v56 = vld [vmem:[%s5252_s12 + $0xc0] sm:$0xff]  ;;  %v3786_v57 = vpack.c.bf16 %v518_v54, %v517_v53  ;;  %v520_v59 = vld [vmem:[#allocation7 + $0xa8] sm:$0xff] }
  0x83   : > { %347 = vst [vmem:[#allocation2 + $0x158] sm:$0xff] %v5031_v1  ;;  %348 = vst [vmem:[#allocation2 + $0x160] sm:$0x3] %v5031_v1  ;;  %3775 = vmatpush1.bf16.msra.mxu0 %v3774_v31  ;;  %v519_v58 = vld [vmem:[#allocation7 + $0xa0] sm:$0xff]  ;;  %v5481_v60 = vld [vmem:[%s5252_s12 + $0xc8] sm:$0xff] }
  0x84   : > { %349 = vst [vmem:[#allocation2 + $0x168] sm:$0xff] %v5031_v1  ;;  %350 = vst [vmem:[#allocation2 + $0x170] sm:$0xff] %v5031_v1  ;;  %3776 = vmatprep.subr.bf16.mxu0 %v6910_v0  ;;  %v3789_v61 = vpack.c.bf16 %v520_v59, %v519_v58  ;;  %v521_v62 = vld [vmem:[#allocation7 + $0xb0] sm:$0xff]  ;;  %v522_v63 = vld [vmem:[#allocation7 + $0xb8] sm:$0xff] }
  0x85   : > { %351 = vst [vmem:[#allocation2 + $0x178] sm:$0x3] %v5031_v1  ;;  %352 = vst [vmem:[#allocation2 + $0x180] sm:$0xff] %v5031_v1  ;;  %v5486_v2 = vld [vmem:[%s5252_s12 + $0xd0] sm:$0xff]  ;;  %v3792_v3 = vpack.c.bf16 %v522_v63, %v521_v62  ;;  %v523_v4 = vld [vmem:[#allocation7 + $0xc0] sm:$0xff] }
  0x86   : > { %353 = vst [vmem:[#allocation2 + $0x188] sm:$0xff] %v5031_v1  ;;  %354 = vst [vmem:[#allocation2 + $0x190] sm:$0x3] %v5031_v1  ;;  %v524_v5 = vld [vmem:[#allocation7 + $0xc8] sm:$0xff]  ;;  %v5491_v6 = vld [vmem:[%s5252_s12 + $0xd8] sm:$0xff] }
  0x87   : > { %355 = vst [vmem:[#allocation2 + $0x198] sm:$0xff] %v5031_v1  ;;  %356 = vst [vmem:[#allocation2 + $0x1a0] sm:$0xff] %v5031_v1  ;;  %3778 = vmatpush1.bf16.msra.mxu0 %v3777_v37  ;;  %v3795_v7 = vpack.c.bf16 %v524_v5, %v523_v4  ;;  %v525_v8 = vld [vmem:[#allocation7 + $0xd0] sm:$0xff]  ;;  %v526_v9 = vld [vmem:[#allocation7 + $0xd8] sm:$0xff] }
  0x88   : > { %357 = vst [vmem:[#allocation2 + $0x1a8] sm:$0x3] %v5031_v1  ;;  %1807 = vst [vmem:[#allocation3] sm:$0xff] %v5031_v1  ;;  %3779 = vmatprep.subr.bf16.mxu0 %v6910_v0  ;;  %v5496_v10 = vld [vmem:[%s5252_s12 + $0xe0] sm:$0xff]  ;;  %v3798_v11 = vpack.c.bf16 %v526_v9, %v525_v8  ;;  %v528_v13 = vld [vmem:[#allocation7 + $0xe8] sm:$0xff] }
  0x89   : > { %1808 = vst [vmem:[#allocation3 + $0x8] sm:$0xff] %v5031_v1  ;;  %1809 = vst [vmem:[#allocation3 + $0x10] sm:$0x3] %v5031_v1  ;;  %v527_v12 = vld [vmem:[#allocation7 + $0xe0] sm:$0xff]  ;;  %v5501_v14 = vld [vmem:[%s5252_s12 + $0xe8] sm:$0xff] }
  0x8a   : > { %1810 = vst [vmem:[#allocation3 + $0x18] sm:$0xff] %v5031_v1  ;;  %1811 = vst [vmem:[#allocation3 + $0x20] sm:$0xff] %v5031_v1  ;;  %v3801_v15 = vpack.c.bf16 %v528_v13, %v527_v12  ;;  %v529_v16 = vld [vmem:[#allocation7 + $0xf0] sm:$0xff]  ;;  %v530_v22 = vld [vmem:[#allocation7 + $0xf8] sm:$0xff] }
  0x8b   : > { %1812 = vst [vmem:[#allocation3 + $0x28] sm:$0x3] %v5031_v1  ;;  %1813 = vst [vmem:[#allocation3 + $0x30] sm:$0xff] %v5031_v1  ;;  %3781 = vmatpush1.bf16.msra.mxu0 %v3780_v43  ;;  %v3804_v24 = vpack.c.bf16 %v530_v22, %v529_v16  ;;  %v531_v25 = vld [vmem:[#allocation7 + $0x100] sm:$0xff]  ;;  %v532_v31 = vld [vmem:[#allocation7 + $0x108] sm:$0xff] }
  0x8c   : > { %1814 = vst [vmem:[#allocation3 + $0x38] sm:$0xff] %v5031_v1  ;;  %1815 = vst [vmem:[#allocation3 + $0x40] sm:$0x3] %v5031_v1  ;;  %3782 = vmatprep.subr.bf16.mxu0 %v6910_v0  ;;  %v3807_v33 = vpack.c.bf16 %v532_v31, %v531_v25  ;;  %v428_v34 = vld [vmem:[#allocation2 + $0x9] sm:$0xff]  ;;  %v534_v39 = vld [vmem:[#allocation7 + $0x118] sm:$0xff] }
  0x8d   : > { %1816 = vst [vmem:[#allocation3 + $0x48] sm:$0xff] %v5031_v1  ;;  %1817 = vst [vmem:[#allocation3 + $0x50] sm:$0xff] %v5031_v1  ;;  %v533_v37 = vld [vmem:[#allocation7 + $0x110] sm:$0xff]  ;;  %v535_v43 = vld [vmem:[#allocation7 + $0x120] sm:$0xff] }
  0x8e   : > { %1818 = vst [vmem:[#allocation3 + $0x58] sm:$0x3] %v5031_v1  ;;  %1819 = vst [vmem:[#allocation3 + $0x60] sm:$0xff] %v5031_v1  ;;  %v3810_v40 = vpack.c.bf16 %v534_v39, %v533_v37  ;;  %v536_v45 = vld [vmem:[#allocation7 + $0x128] sm:$0xff]  ;;  %v537_v53 = vld [vmem:[#allocation7 + $0x130] sm:$0xff] }
  0x8f   : > { %1820 = vst [vmem:[#allocation3 + $0x68] sm:$0xff] %v5031_v1  ;;  %1821 = vst [vmem:[#allocation3 + $0x70] sm:$0x3] %v5031_v1  ;;  %3784 = vmatpush1.bf16.msra.mxu0 %v3783_v50  ;;  %v3813_v50 = vpack.c.bf16 %v536_v45, %v535_v43  ;;  %v538_v54 = vld [vmem:[#allocation7 + $0x138] sm:$0xff]  ;;  %v543_v4 = vld [vmem:[#allocation7 + $0x160] sm:$0xff] }
  0x90   : > { %1822 = vst [vmem:[#allocation3 + $0x78] sm:$0xff] %v5031_v1  ;;  %1823 = vst [vmem:[#allocation3 + $0x80] sm:$0xff] %v5031_v1  ;;  %3785 = vmatprep.subr.bf16.mxu0 %v6910_v0  ;;  %v3816_v58 = vpack.c.bf16 %v538_v54, %v537_v53  ;;  %v542_v63 = vld [vmem:[#allocation7 + $0x158] sm:$0xff]  ;;  %v544_v5 = vld [vmem:[#allocation7 + $0x168] sm:$0xff] }
  0x91   : > { %1824 = vst [vmem:[#allocation3 + $0x88] sm:$0x3] %v5031_v1  ;;  %1825 = vst [vmem:[#allocation3 + $0x90] sm:$0xff] %v5031_v1  ;;  %v3825_v8 = vpack.c.bf16 %v544_v5, %v543_v4  ;;  %v545_v9 = vld [vmem:[#allocation7 + $0x170] sm:$0xff]  ;;  %v547_v13 = vld [vmem:[#allocation7 + $0x180] sm:$0xff] }
  0x92   : > { %1826 = vst [vmem:[#allocation3 + $0x98] sm:$0xff] %v5031_v1  ;;  %1827 = vst [vmem:[#allocation3 + $0xa0] sm:$0x3] %v5031_v1  ;;  %v549_v22 = vld [vmem:[#allocation7 + $0x190] sm:$0xff]  ;;  %v551_v31 = vld [vmem:[#allocation7 + $0x1a0] sm:$0xff] }
  0x93   : > { %1828 = vst [vmem:[#allocation3 + $0xa8] sm:$0xff] %v5031_v1  ;;  %1829 = vst [vmem:[#allocation3 + $0xb0] sm:$0xff] %v5031_v1  ;;  %3787 = vmatpush1.bf16.msra.mxu0 %v3786_v57  ;;  %v553_v37 = vld [vmem:[#allocation7 + $0x1b0] sm:$0xff]  ;;  %v555_v43 = vld [vmem:[#allocation7 + $0x1c0] sm:$0xff] }
  0x94   : > { %1830 = vst [vmem:[#allocation3 + $0xb8] sm:$0x3] %v5031_v1  ;;  %1831 = vst [vmem:[#allocation3 + $0xc0] sm:$0xff] %v5031_v1  ;;  %3788 = vmatprep.subr.bf16.mxu0 %v6910_v0  ;;  %v557_v53 = vld [vmem:[#allocation7 + $0x1d0] sm:$0xff] }
  0x95   : > { %1832 = vst [vmem:[#allocation3 + $0xc8] sm:$0xff] %v5031_v1  ;;  %1833 = vst [vmem:[#allocation3 + $0xd0] sm:$0x3] %v5031_v1 }
  0x96   : > { %1834 = vst [vmem:[#allocation3 + $0xd8] sm:$0xff] %v5031_v1  ;;  %1835 = vst [vmem:[#allocation3 + $0xe0] sm:$0xff] %v5031_v1 }
  0x97   : > { %1836 = vst [vmem:[#allocation3 + $0xe8] sm:$0x3] %v5031_v1  ;;  %1837 = vst [vmem:[#allocation3 + $0xf0] sm:$0xff] %v5031_v1  ;;  %3790 = vmatpush1.bf16.msra.mxu0 %v3789_v61 }
  0x98   : > { %1838 = vst [vmem:[#allocation3 + $0xf8] sm:$0xff] %v5031_v1  ;;  %1839 = vst [vmem:[#allocation3 + $0x100] sm:$0x3] %v5031_v1  ;;  %3791 = vmatprep.subr.bf16.mxu0 %v6910_v0 }
  0x99   : > { %1840 = vst [vmem:[#allocation3 + $0x108] sm:$0xff] %v5031_v1  ;;  %1841 = vst [vmem:[#allocation3 + $0x110] sm:$0xff] %v5031_v1 }
  0x9a   : > { %1842 = vst [vmem:[#allocation3 + $0x118] sm:$0x3] %v5031_v1  ;;  %1843 = vst [vmem:[#allocation3 + $0x120] sm:$0xff] %v5031_v1 }
  0x9b   : > { %1844 = vst [vmem:[#allocation3 + $0x128] sm:$0xff] %v5031_v1  ;;  %1845 = vst [vmem:[#allocation3 + $0x130] sm:$0x3] %v5031_v1  ;;  %3793 = vmatpush1.bf16.msra.mxu0 %v3792_v3 }
  0x9c   : > { %1846 = vst [vmem:[#allocation3 + $0x138] sm:$0xff] %v5031_v1  ;;  %1847 = vst [vmem:[#allocation3 + $0x140] sm:$0xff] %v5031_v1  ;;  %3794 = vmatprep.subr.bf16.mxu0 %v6910_v0 }
  0x9d   : > { %1848 = vst [vmem:[#allocation3 + $0x148] sm:$0x3] %v5031_v1  ;;  %1849 = vst [vmem:[#allocation3 + $0x150] sm:$0xff] %v5031_v1 }
  0x9e   : > { %1850 = vst [vmem:[#allocation3 + $0x158] sm:$0xff] %v5031_v1  ;;  %1851 = vst [vmem:[#allocation3 + $0x160] sm:$0x3] %v5031_v1 }
  0x9f   : > { %1852 = vst [vmem:[#allocation3 + $0x168] sm:$0xff] %v5031_v1  ;;  %1853 = vst [vmem:[#allocation3 + $0x170] sm:$0xff] %v5031_v1  ;;  %3796 = vmatpush1.bf16.msra.mxu0 %v3795_v7 }
  0xa0   : > { %1854 = vst [vmem:[#allocation3 + $0x178] sm:$0x3] %v5031_v1  ;;  %1855 = vst [vmem:[#allocation3 + $0x180] sm:$0xff] %v5031_v1  ;;  %3797 = vmatprep.subr.bf16.mxu0 %v6910_v0 }
  0xa1   : > { %1856 = vst [vmem:[#allocation3 + $0x188] sm:$0xff] %v5031_v1  ;;  %1857 = vst [vmem:[#allocation3 + $0x190] sm:$0x3] %v5031_v1 }
  0xa2   : > { %1858 = vst [vmem:[#allocation3 + $0x198] sm:$0xff] %v5031_v1  ;;  %1859 = vst [vmem:[#allocation3 + $0x1a0] sm:$0xff] %v5031_v1 }
  0xa3   : > { %1860 = vst [vmem:[#allocation3 + $0x1a8] sm:$0x3] %v5031_v1  ;;  %359 = vst [vmem:[#allocation2 + $0x19] sm:$0xff] %v5375_v17  ;;  %3799 = vmatpush1.bf16.msra.mxu0 %v3798_v11 }
  0xa4   : > { %360 = vst [vmem:[#allocation2 + $0x21] sm:$0xff] %v5379_v18  ;;  %361 = vst [vmem:[#allocation2 + $0x31] sm:$0xff] %v5382_v19  ;;  %3800 = vmatprep.subr.bf16.mxu0 %v6910_v0 }
  0xa5   : > { %362 = vst [vmem:[#allocation2 + $0x39] sm:$0xff] %v5387_v20  ;;  %363 = vst [vmem:[#allocation2 + $0x49] sm:$0xff] %v5390_v21 }
  0xa6   : > { %364 = vst [vmem:[#allocation2 + $0x51] sm:$0xff] %v5395_v23  ;;  %365 = vst [vmem:[#allocation2 + $0x61] sm:$0xff] %v5400_v26 }
  0xa7   : > { %366 = vst [vmem:[#allocation2 + $0x69] sm:$0xff] %v5404_v27  ;;  %367 = vst [vmem:[#allocation2 + $0x79] sm:$0xff] %v5407_v28  ;;  %3802 = vmatpush1.bf16.msra.mxu0 %v3801_v15 }
  0xa8   : > { %368 = vst [vmem:[#allocation2 + $0x81] sm:$0xff] %v5412_v29  ;;  %369 = vst [vmem:[#allocation2 + $0x91] sm:$0xff] %v5415_v30  ;;  %3803 = vmatprep.subr.bf16.mxu0 %v6910_v0 }
  0xa9   : > { %370 = vst [vmem:[#allocation2 + $0x99] sm:$0xff] %v5420_v32  ;;  %371 = vst [vmem:[#allocation2 + $0xa9] sm:$0xff] %v5425_v35 }
  0xaa   : > { %372 = vst [vmem:[#allocation2 + $0xb1] sm:$0xff] %v5429_v36  ;;  %373 = vst [vmem:[#allocation2 + $0xc1] sm:$0xff] %v5433_v38  ;;  %v5511_v46 = vld [vmem:[#allocation2 + $0x18] sm:$0xff] }
  0xab   : > { %374 = vst [vmem:[#allocation2 + $0xc9] sm:$0xff] %v5438_v41  ;;  %375 = vst [vmem:[#allocation2 + $0xd9] sm:$0xff] %v5442_v42  ;;  %3805 = vmatpush1.bf16.msra.mxu0 %v3804_v24  ;;  %v5516_v57 = vld [vmem:[#allocation2 + $0x20] sm:$0xff]  ;;  %v5521_v59 = vld [vmem:[#allocation2 + $0x30] sm:$0xff] }
  0xac   : > { %376 = vst [vmem:[#allocation2 + $0xe1] sm:$0xff] %v5446_v44  ;;  %377 = vst [vmem:[#allocation2 + $0xf1] sm:$0xff] %v5451_v47  ;;  %3806 = vmatprep.subr.bf16.mxu0 %v6910_v0  ;;  %v5523_v62 = vld [vmem:[#allocation2 + $0x32] sm:$0xff]  ;;  %v5534_v7 = vld [vmem:[#allocation2 + $0x48] sm:$0xff] }
  0xad   : > { %378 = vst [vmem:[#allocation2 + $0xf9] sm:$0xff] %v5455_v48  ;;  %379 = vst [vmem:[#allocation2 + $0x109] sm:$0xff] %v5458_v49  ;;  %3630 = vmatprep.mubr.f32.mxu1 %v5523_v62  ;;  %v5529_v3 = vld [vmem:[#allocation2 + $0x38] sm:$0xff]  ;;  %v5539_v11 = vld [vmem:[#allocation2 + $0x50] sm:$0xff] }
  0xae   : > { %380 = vst [vmem:[#allocation2 + $0x111] sm:$0xff] %v5463_v51  ;;  %381 = vst [vmem:[#allocation2 + $0x121] sm:$0xff] %v5466_v52  ;;  %715 = vmatmul.mubr.f32.vlgmr.msra.gmra.mrb[0].mxu0 %v5031_v1  ;;  %v5544_v15 = vld [vmem:[#allocation2 + $0x60] sm:$0xff]  ;;  %v5549_v24 = vld [vmem:[#allocation2 + $0x68] sm:$0xff] }
  0xaf   : > { %382 = vst [vmem:[#allocation2 + $0x129] sm:$0xff] %v5472_v55  ;;  %383 = vst [vmem:[#allocation2 + $0x139] sm:$0xff] %v5476_v56  ;;  %3808 = vmatpush1.bf16.msra.mxu0 %v3807_v33  ;;  %719 = vmatprep.mubr.f32.mxu0 %v428_v34  ;;  %v5554_v33 = vld [vmem:[#allocation2 + $0x78] sm:$0xff]  ;;  %v5559_v39 = vld [vmem:[#allocation2 + $0x80] sm:$0xff] }
  0xb0   : > { %384 = vst [vmem:[#allocation2 + $0x141] sm:$0xff] %v5481_v60  ;;  %385 = vst [vmem:[#allocation2 + $0x151] sm:$0xff] %v5486_v2  ;;  %3809 = vmatprep.subr.bf16.mxu0 %v6910_v0  ;;  %v5564_v45 = vld [vmem:[#allocation2 + $0x90] sm:$0xff]  ;;  %v5569_v54 = vld [vmem:[#allocation2 + $0x98] sm:$0xff] }
  0xb1   : > { %386 = vst [vmem:[#allocation2 + $0x159] sm:$0xff] %v5491_v6  ;;  %387 = vst [vmem:[#allocation2 + $0x169] sm:$0xff] %v5496_v10 }
  0xb2   : > { %388 = vst [vmem:[#allocation2 + $0x171] sm:$0xff] %v5501_v14  ;;  %720 = vmatmul.mubr.f32.gmra.mrb[2].mxu0 %v5031_v1  ;;  %v539_v1 = vld [vmem:[#allocation7 + $0x140] sm:$0xff]  ;;  %v5593_v4 = vld [vmem:[#allocation2 + $0xd8] sm:$0xff] }
  0xb3   : > { %724 = vmatprep.mubr.f32.mxu0 %v5375_v17  ;;  %3811 = vmatpush1.bf16.msra.mxu0 %v3810_v40  ;;  %v540_v17 = vld [vmem:[#allocation7 + $0x148] sm:$0xff]  ;;  %v5601_v5 = vld [vmem:[#allocation2 + $0xf0] sm:$0xff] }
  0xb4   : > { %3812 = vmatprep.subr.bf16.mxu0 %v6910_v0  ;;  %v3819_v61 = vpack.c.bf16 %v540_v17, %v539_v1  ;;  %v559_v1 = vld [vmem:[#allocation7 + $0x1e0] sm:$0xff]  ;;  %v5574_v17 = vld [vmem:[#allocation2 + $0xa8] sm:$0xff] }
  0xb6   : > { %725 = vmatmul.mubr.f32.gmra.mrb[4].mxu0 %v5511_v46 }
  0xb7   : > { %729 = vmatprep.mubr.f32.mxu0 %v5379_v18  ;;  %3814 = vmatpush1.bf16.msra.mxu0 %v3813_v50  ;;  %v541_v18 = vld [vmem:[#allocation7 + $0x150] sm:$0xff] }
  0xb8   : > { %3815 = vmatprep.subr.bf16.mxu0 %v6910_v0 }
  0xba   : > { %730 = vmatmul.mubr.f32.gmra.mrb[6].mxu0 %v5516_v57 }
  0xbb   : > { %734 = vmatprep.mubr.f32.mxu0 %v5382_v19  ;;  %3817 = vmatpush1.bf16.msra.mxu0 %v3816_v58  ;;  %v3822_v19 = vpack.c.bf16 %v542_v63, %v541_v18  ;;  %v561_v18 = vld [vmem:[#allocation7 + $0x1f0] sm:$0xff] }
  0xbc   : > { %3818 = vmatprep.subr.bf16.mxu0 %v6910_v0  ;;  %v5579_v63 = vld [vmem:[#allocation2 + $0xb0] sm:$0xff] }
  0xbe   : > { %735 = vmatmul.mubr.f32.gmra.mrb[8].mxu0 %v5521_v59 }
  0xbf   : > { %739 = vmatprep.mubr.f32.mxu0 %v5387_v20  ;;  %3820 = vmatpush1.bf16.msra.mxu0 %v3819_v61  ;;  %v546_v20 = vld [vmem:[#allocation7 + $0x178] sm:$0xff] }
  0xc0   : > { %3821 = vmatprep.subr.bf16.mxu0 %v6910_v0  ;;  %v3828_v12 = vpack.c.bf16 %v546_v20, %v545_v9  ;;  %v563_v9 = vld [vmem:[#allocation7 + $0x200] sm:$0xff] }
  0xc1   : > { %v463_v20 = vld [vmem:[#allocation2 + $0x2] sm:$0xff] }
  0xc2   : > { %740 = vmatmul.mubr.f32.gmra.mrb[10].mxu0 %v5529_v3 }
  0xc3   : > { %744 = vmatprep.mubr.f32.mxu0 %v5390_v21  ;;  %3823 = vmatpush1.bf16.msra.mxu0 %v3822_v19  ;;  %v548_v21 = vld [vmem:[#allocation7 + $0x188] sm:$0xff] }
  0xc4   : > { %3824 = vmatprep.subr.bf16.mxu0 %v6910_v0  ;;  %v3831_v16 = vpack.c.bf16 %v548_v21, %v547_v13  ;;  %v565_v13 = vld [vmem:[#allocation7 + $0x210] sm:$0xff]  ;;  %v566_v21 = vld [vmem:[#allocation7 + $0x218] sm:$0xff] }
  0xc6   : > { %745 = vmatmul.mubr.f32.gmra.mrb[12].mxu0 %v5534_v7 }
  0xc7   : > { %749 = vmatprep.mubr.f32.mxu0 %v5395_v23  ;;  %3826 = vmatpush1.bf16.msra.mxu0 %v3825_v8  ;;  %v550_v23 = vld [vmem:[#allocation7 + $0x198] sm:$0xff] }
  0xc8   : > { %3827 = vmatprep.subr.bf16.mxu0 %v6910_v0  ;;  %v3834_v25 = vpack.c.bf16 %v550_v23, %v549_v22  ;;  %v5644_v8 = vld [vmem:[%s5252_s12 + $0xf8] sm:$0xff]  ;;  %v568_v22 = vld [vmem:[#allocation7 + $0x228] sm:$0xff] }
  0xc9   : > { %390 = vst [vmem:[#allocation2 + $0x189] sm:$0xff] %v5644_v8  ;;  %v5660_v23 = vld [vmem:[#allocation2 + $0x1a] sm:$0xff] }
  0xca   : > { %750 = vmatmul.mubr.f32.gmra.mrb[14].mxu0 %v5539_v11 }
  0xcb   : > { %754 = vmatprep.mubr.f32.mxu0 %v5400_v26  ;;  %3829 = vmatpush1.bf16.msra.mxu0 %v3828_v12  ;;  %v552_v26 = vld [vmem:[#allocation7 + $0x1a8] sm:$0xff] }
  0xcc   : > { %3830 = vmatprep.subr.bf16.mxu0 %v6910_v0  ;;  %v3837_v34 = vpack.c.bf16 %v552_v26, %v551_v31  ;;  %v570_v31 = vld [vmem:[#allocation7 + $0x238] sm:$0xff] }
  0xce   : > { %755 = vmatmul.mubr.f32.gmra.mrb[16].mxu0 %v5544_v15 }
  0xcf   : > { %759 = vmatprep.mubr.f32.mxu0 %v5404_v27  ;;  %3832 = vmatpush1.bf16.msra.mxu0 %v3831_v16  ;;  %v554_v27 = vld [vmem:[#allocation7 + $0x1b8] sm:$0xff]  ;;  %v3858_v16 = vpack.c.bf16 %v566_v21, %v565_v13  ;;  %v585_v13 = vld [vmem:[#allocation7 + $0x2b0] sm:$0xff]  ;;  %v5703_v21 = vld [vmem:[#allocation2 + $0x82] sm:$0xff] }
  0xd0   : > { %3833 = vmatprep.subr.bf16.mxu0 %v6910_v0  ;;  %v3840_v40 = vpack.c.bf16 %v554_v27, %v553_v37  ;;  %v573_v27 = vld [vmem:[#allocation7 + $0x250] sm:$0xff] }
  0xd2   : > { %760 = vmatmul.mubr.f32.gmra.mrb[18].mxu0 %v5549_v24 }
  0xd3   : > { %764 = vmatprep.mubr.f32.mxu0 %v5407_v28  ;;  %3835 = vmatpush1.bf16.msra.mxu0 %v3834_v25  ;;  %v556_v28 = vld [vmem:[#allocation7 + $0x1c8] sm:$0xff]  ;;  %v569_v25 = vld [vmem:[#allocation7 + $0x230] sm:$0xff] }
  0xd4   : > { %3836 = vmatprep.subr.bf16.mxu0 %v6910_v0  ;;  %v3843_v50 = vpack.c.bf16 %v556_v28, %v555_v43  ;;  %v3864_v26 = vpack.c.bf16 %v570_v31, %v569_v25  ;;  %v575_v28 = vld [vmem:[#allocation7 + $0x260] sm:$0xff] }
  0xd5   : > { %v5713_v25 = vld [vmem:[#allocation2 + $0x9a] sm:$0xff] }
  0xd6   : > { %765 = vmatmul.mubr.f32.gmra.mrb[20].mxu0 %v5554_v33 }
  0xd7   : > { %769 = vmatprep.mubr.f32.mxu0 %v5412_v29  ;;  %3838 = vmatpush1.bf16.msra.mxu0 %v3837_v34  ;;  %v558_v29 = vld [vmem:[#allocation7 + $0x1d8] sm:$0xff]  ;;  %v571_v34 = vld [vmem:[#allocation7 + $0x240] sm:$0xff] }
  0xd8   : > { %3839 = vmatprep.subr.bf16.mxu0 %v6910_v0  ;;  %v3846_v58 = vpack.c.bf16 %v558_v29, %v557_v53  ;;  %v577_v29 = vld [vmem:[#allocation7 + $0x270] sm:$0xff] }
  0xda   : > { %770 = vmatmul.mubr.f32.gmra.mrb[22].mxu0 %v5559_v39 }
  0xdb   : > { %774 = vmatprep.mubr.f32.mxu0 %v5415_v30  ;;  %3841 = vmatpush1.bf16.msra.mxu0 %v3840_v40  ;;  %v560_v30 = vld [vmem:[#allocation7 + $0x1e8] sm:$0xff]  ;;  %v574_v40 = vld [vmem:[#allocation7 + $0x258] sm:$0xff] }
  0xdc   : > { %3842 = vmatprep.subr.bf16.mxu0 %v6910_v0  ;;  %v3849_v61 = vpack.c.bf16 %v560_v30, %v559_v1  ;;  %v3870_v43 = vpack.c.bf16 %v574_v40, %v573_v27  ;;  %v579_v30 = vld [vmem:[#allocation7 + $0x280] sm:$0xff]  ;;  %v5723_v27 = vld [vmem:[#allocation2 + $0xb2] sm:$0xff] }
  0xde   : > { %775 = vmatmul.mubr.f32.gmra.mrb[24].mxu0 %v5564_v45 }
  0xdf   : > { %779 = vmatprep.mubr.f32.mxu0 %v5420_v32  ;;  %3844 = vmatpush1.bf16.msra.mxu0 %v3843_v50  ;;  %v562_v32 = vld [vmem:[#allocation7 + $0x1f8] sm:$0xff]  ;;  %v576_v50 = vld [vmem:[#allocation7 + $0x268] sm:$0xff] }
  0xe0   : > { %3845 = vmatprep.subr.bf16.mxu0 %v6910_v0  ;;  %v3852_v19 = vpack.c.bf16 %v562_v32, %v561_v18  ;;  %v3873_v53 = vpack.c.bf16 %v576_v50, %v575_v28  ;;  %v581_v32 = vld [vmem:[#allocation7 + $0x290] sm:$0xff]  ;;  %v628_v50 = vld [vmem:[#allocation7 + $0x408] sm:$0xff] }
  0xe1   : > { %v5745_v28 = vld [vmem:[#allocation2 + $0xf2] sm:$0xff] }
  0xe2   : > { %780 = vmatmul.mubr.f32.gmra.mrb[26].mxu0 %v5569_v54 }
  0xe3   : > { %784 = vmatprep.mubr.f32.mxu0 %v5425_v35  ;;  %3847 = vmatpush1.bf16.msra.mxu0 %v3846_v58  ;;  %v5584_v35 = vld [vmem:[#allocation2 + $0xc0] sm:$0xff]  ;;  %v5683_v58 = vld [vmem:[#allocation2 + $0x52] sm:$0xff] }
  0xe4   : > { %3848 = vmatprep.subr.bf16.mxu0 %v6910_v0 }
  0xe6   : > { %785 = vmatmul.mubr.f32.gmra.mrb[28].mxu0 %v5574_v17 }
  0xe7   : > { %789 = vmatprep.mubr.f32.mxu0 %v5429_v36  ;;  %3850 = vmatpush1.bf16.msra.mxu0 %v3849_v61  ;;  %v5589_v36 = vld [vmem:[#allocation2 + $0xc8] sm:$0xff] }
  0xe8   : > { %3851 = vmatprep.subr.bf16.mxu0 %v6910_v0  ;;  %v5688_v61 = vld [vmem:[#allocation2 + $0x62] sm:$0xff] }
  0xea   : > { %790 = vmatmul.mubr.f32.gmra.mrb[30].mxu0 %v5579_v63 }
  0xeb   : > { %794 = vmatprep.mubr.f32.mxu0 %v5433_v38  ;;  %3853 = vmatpush1.bf16.msra.mxu0 %v3852_v19  ;;  %v5597_v38 = vld [vmem:[#allocation2 + $0xe0] sm:$0xff]  ;;  %v5693_v19 = vld [vmem:[#allocation2 + $0x6a] sm:$0xff] }
  0xec   : > { %3854 = vmatprep.subr.bf16.mxu0 %v6910_v0 }
  0xee   : > { %795 = vmatmul.mubr.f32.gmra.mrb[32].mxu0 %v5584_v35 }
  0xef   : > { %799 = vmatprep.mubr.f32.mxu0 %v5438_v41  ;;  %v5605_v41 = vld [vmem:[#allocation2 + $0xf8] sm:$0xff] }
  0xf2   : > { %800 = vmatmul.mubr.f32.gmra.mrb[34].mxu0 %v5589_v36 }
  0xf3   : > { %804 = vmatprep.mubr.f32.mxu0 %v5442_v42  ;;  %v5609_v42 = vld [vmem:[#allocation2 + $0x108] sm:$0xff] }
  0xf6   : > { %805 = vmatmul.mubr.f32.gmra.mrb[36].mxu0 %v5593_v4 }
  0xf7   : > { %809 = vmatprep.mubr.f32.mxu0 %v5446_v44  ;;  %v5613_v44 = vld [vmem:[#allocation2 + $0x110] sm:$0xff] }
  0xfa   : > { %810 = vmatmul.mubr.f32.gmra.mrb[38].mxu0 %v5597_v38 }
  0xfb   : > { %814 = vmatprep.mubr.f32.mxu0 %v5451_v47  ;;  %v5617_v47 = vld [vmem:[#allocation2 + $0x120] sm:$0xff] }
  0xfe   : > { %815 = vmatmul.mubr.f32.gmra.mrb[40].mxu0 %v5601_v5 }
  0xff   : > { %819 = vmatprep.mubr.f32.mxu0 %v5455_v48  ;;  %v5621_v48 = vld [vmem:[#allocation2 + $0x128] sm:$0xff] }
 0x102   : > { %820 = vmatmul.mubr.f32.gmra.mrb[42].mxu0 %v5605_v41 }
 0x103   : > { %824 = vmatprep.mubr.f32.mxu0 %v5458_v49  ;;  %v5625_v49 = vld [vmem:[#allocation2 + $0x138] sm:$0xff] }
 0x106   : > { %825 = vmatmul.mubr.f32.gmra.mrb[44].mxu0 %v5609_v42 }
 0x107   : > { %829 = vmatprep.mubr.f32.mxu0 %v5463_v51  ;;  %v5629_v51 = vld [vmem:[#allocation2 + $0x140] sm:$0xff] }
 0x10a   : > { %830 = vmatmul.mubr.f32.gmra.mrb[46].mxu0 %v5613_v44 }
 0x10b   : > { %834 = vmatprep.mubr.f32.mxu0 %v5466_v52  ;;  %v5633_v52 = vld [vmem:[#allocation2 + $0x150] sm:$0xff] }
 0x10e   : > { %835 = vmatmul.mubr.f32.gmra.mrb[48].mxu0 %v5617_v47 }
 0x10f   : > { %839 = vmatprep.mubr.f32.mxu0 %v5472_v55  ;;  %v5636_v55 = vld [vmem:[%s5252_s12 + $0xf0] sm:$0xff] }
 0x110   : > { %389 = vst [vmem:[#allocation2 + $0x181] sm:$0xff] %v5636_v55 }
 0x112   : > { %840 = vmatmul.mubr.f32.gmra.mrb[50].mxu0 %v5621_v48 }
 0x113   : > { %844 = vmatprep.mubr.f32.mxu0 %v5476_v56  ;;  %v5641_v56 = vld [vmem:[#allocation2 + $0x158] sm:$0xff] }
 0x116   : > { %845 = vmatmul.mubr.f32.gmra.mrb[52].mxu0 %v5625_v49 }
 0x117   : > { %849 = vmatprep.mubr.f32.mxu0 %v5481_v60  ;;  %v5649_v60 = vld [vmem:[#allocation2 + $0x168] sm:$0xff] }
 0x11a   : > { %850 = vmatmul.mubr.f32.gmra.mrb[54].mxu0 %v5629_v51 }
 0x11b   : > { %854 = vmatprep.mubr.f32.mxu0 %v5486_v2  ;;  %v5653_v2 = vld [vmem:[#allocation2 + $0x170] sm:$0xff] }
 0x11e   : > { %855 = vmatmul.mubr.f32.gmra.mrb[56].mxu0 %v5633_v52 }
 0x11f   : > { %859 = vmatprep.mubr.f32.mxu0 %v5491_v6  ;;  %v564_v6 = vld [vmem:[#allocation7 + $0x208] sm:$0xff] }
 0x120   : > { %v3855_v12 = vpack.c.bf16 %v564_v6, %v563_v9  ;;  %v583_v6 = vld [vmem:[#allocation7 + $0x2a0] sm:$0xff] }
 0x122   : > { %860 = vmatmul.mubr.f32.gmra.mrb[58].mxu0 %v5641_v56 }
 0x123   : > { %864 = vmatprep.mubr.f32.mxu0 %v5496_v10  ;;  %v464_v10 = vld [vmem:[#allocation2 + $0xa] sm:$0xff] }
 0x126   : > { %865 = vmatmul.mubr.f32.gmra.mrb[60].mxu0 %v5649_v60 }
 0x127   : > { %869 = vmatprep.mubr.f32.mxu0 %v5501_v14  ;;  %v567_v14 = vld [vmem:[#allocation7 + $0x220] sm:$0xff] }
 0x12a   : > { %870 = vmatmul.mubr.f32.gmra.mrb[62].mxu0 %v5653_v2 }
 0x12b   : > { %939 = vmatprep.mubr.f32.mxu0 %v5511_v46  ;;  %v3861_v46 = vpack.c.bf16 %v568_v22, %v567_v14  ;;  %v5708_v14 = vld [vmem:[#allocation2 + $0x92] sm:$0xff] }
 0x12e   : > { %940 = vmatmul.mubr.f32.vlgmr.msra.gmra.mrb[0].mxu0 %v463_v20  ;;  %v5698_v20 = vld [vmem:[#allocation2 + $0x7a] sm:$0xff] }
 0x12f   : > { %3856 = vmatpush1.bf16.msra.mxu0 %v3855_v12  ;;  %944 = vmatprep.mubr.f32.mxu0 %v5516_v57  ;;  %v5665_v57 = vld [vmem:[#allocation2 + $0x22] sm:$0xff] }
 0x130   : > { %3857 = vmatprep.subr.bf16.mxu0 %v6910_v0 }
 0x132   : > { %945 = vmatmul.mubr.f32.gmra.mrb[2].mxu0 %v464_v10 }
 0x133   : > { %949 = vmatprep.mubr.f32.mxu0 %v5521_v59  ;;  %3859 = vmatpush1.bf16.msra.mxu0 %v3858_v16  ;;  %v572_v59 = vld [vmem:[#allocation7 + $0x248] sm:$0xff]  ;;  %v587_v16 = vld [vmem:[#allocation7 + $0x2c0] sm:$0xff] }
 0x134   : > { %3860 = vmatprep.subr.bf16.mxu0 %v6910_v0  ;;  %v3867_v37 = vpack.c.bf16 %v572_v59, %v571_v34  ;;  %v5718_v34 = vld [vmem:[#allocation2 + $0xaa] sm:$0xff] }
 0x136   : > { %950 = vmatmul.mubr.f32.gmra.mrb[4].mxu0 %v5660_v23 }
 0x137   : > { %954 = vmatprep.mubr.f32.mxu0 %v5529_v3  ;;  %3862 = vmatpush1.bf16.msra.mxu0 %v3861_v46  ;;  %v5673_v3 = vld [vmem:[#allocation2 + $0x3a] sm:$0xff]  ;;  %v589_v46 = vld [vmem:[#allocation7 + $0x2d0] sm:$0xff] }
 0x138   : > { %3863 = vmatprep.subr.bf16.mxu0 %v6910_v0 }
 0x13a   : > { %955 = vmatmul.mubr.f32.gmra.mrb[6].mxu0 %v5665_v57 }
 0x13b   : > { %959 = vmatprep.mubr.f32.mxu0 %v5534_v7  ;;  %3865 = vmatpush1.bf16.msra.mxu0 %v3864_v26  ;;  %v5678_v7 = vld [vmem:[#allocation2 + $0x4a] sm:$0xff]  ;;  %v591_v26 = vld [vmem:[#allocation7 + $0x2e0] sm:$0xff] }
 0x13c   : > { %3866 = vmatprep.subr.bf16.mxu0 %v6910_v0 }
 0x13e   : > { %960 = vmatmul.mubr.f32.gmra.mrb[8].mxu0 %v5523_v62 }
 0x13f   : > { %964 = vmatprep.mubr.f32.mxu0 %v5539_v11  ;;  %3868 = vmatpush1.bf16.msra.mxu0 %v3867_v37  ;;  %v578_v11 = vld [vmem:[#allocation7 + $0x278] sm:$0xff]  ;;  %v593_v37 = vld [vmem:[#allocation7 + $0x2f0] sm:$0xff] }
 0x140   : > { %3869 = vmatprep.subr.bf16.mxu0 %v6910_v0  ;;  %v3876_v1 = vpack.c.bf16 %v578_v11, %v577_v29  ;;  %v630_v29 = vld [vmem:[#allocation7 + $0x418] sm:$0xff] }
 0x142   : > { %965 = vmatmul.mubr.f32.gmra.mrb[10].mxu0 %v5673_v3 }
 0x143   : > { %969 = vmatprep.mubr.f32.mxu0 %v5544_v15  ;;  %3871 = vmatpush1.bf16.msra.mxu0 %v3870_v43  ;;  %v580_v15 = vld [vmem:[#allocation7 + $0x288] sm:$0xff]  ;;  %v5737_v43 = vld [vmem:[#allocation2 + $0xda] sm:$0xff] }
 0x144   : > { %3872 = vmatprep.subr.bf16.mxu0 %v6910_v0  ;;  %v3879_v18 = vpack.c.bf16 %v580_v15, %v579_v30  ;;  %v632_v30 = vld [vmem:[#allocation7 + $0x428] sm:$0xff] }
 0x146   : > { %970 = vmatmul.mubr.f32.gmra.mrb[12].mxu0 %v5678_v7 }
 0x147   : > { %974 = vmatprep.mubr.f32.mxu0 %v5549_v24  ;;  %3874 = vmatpush1.bf16.msra.mxu0 %v3873_v53  ;;  %v582_v24 = vld [vmem:[#allocation7 + $0x298] sm:$0xff] }
 0x148   : > { %3875 = vmatprep.subr.bf16.mxu0 %v6910_v0  ;;  %v3882_v9 = vpack.c.bf16 %v582_v24, %v581_v32  ;;  %v634_v32 = vld [vmem:[#allocation7 + $0x438] sm:$0xff] }
 0x14a   : > { %975 = vmatmul.mubr.f32.gmra.mrb[14].mxu0 %v5683_v58 }
 0x14b   : > { %979 = vmatprep.mubr.f32.mxu0 %v5554_v33  ;;  %3877 = vmatpush1.bf16.msra.mxu0 %v3876_v1  ;;  %v584_v33 = vld [vmem:[#allocation7 + $0x2a8] sm:$0xff]  ;;  %v631_v1 = vld [vmem:[#allocation7 + $0x420] sm:$0xff] }
 0x14c   : > { %3878 = vmatprep.subr.bf16.mxu0 %v6910_v0  ;;  %v3885_v12 = vpack.c.bf16 %v584_v33, %v583_v6  ;;  %v3958_v15 = vpack.c.bf16 %v632_v30, %v631_v1  ;;  %v636_v6 = vld [vmem:[#allocation7 + $0x448] sm:$0xff]  ;;  %v602_v1 = vld [vmem:[#allocation7 + $0x338] sm:$0xff] }
 0x14e   : > { %980 = vmatmul.mubr.f32.gmra.mrb[16].mxu0 %v5688_v61 }
 0x14f   : > { %984 = vmatprep.mubr.f32.mxu0 %v5559_v39  ;;  %3880 = vmatpush1.bf16.msra.mxu0 %v3879_v18  ;;  %v586_v39 = vld [vmem:[#allocation7 + $0x2b8] sm:$0xff]  ;;  %v633_v18 = vld [vmem:[#allocation7 + $0x430] sm:$0xff] }
 0x150   : > { %3881 = vmatprep.subr.bf16.mxu0 %v6910_v0  ;;  %v3888_v10 = vpack.c.bf16 %v586_v39, %v585_v13  ;;  %v3962_v24 = vpack.c.bf16 %v634_v32, %v633_v18  ;;  %v638_v13 = vld [vmem:[#allocation7 + $0x458] sm:$0xff]  ;;  %v5783_v39 = vld [vmem:[#allocation2 + $0x180] sm:$0xff] }
 0x151   : > { %v5813_v18 = vld [vmem:[#allocation2 + $0x39] sm:$0xff] }
 0x152   : > { %985 = vmatmul.mubr.f32.gmra.mrb[18].mxu0 %v5693_v19 }
 0x153   : > { %989 = vmatprep.mubr.f32.mxu0 %v5564_v45  ;;  %3883 = vmatpush1.bf16.msra.mxu0 %v3882_v9  ;;  %v588_v45 = vld [vmem:[#allocation7 + $0x2c8] sm:$0xff]  ;;  %v635_v9 = vld [vmem:[#allocation7 + $0x440] sm:$0xff] }
 0x154   : > { %3884 = vmatprep.subr.bf16.mxu0 %v6910_v0  ;;  %v3891_v22 = vpack.c.bf16 %v588_v45, %v587_v16  ;;  %v3966_v33 = vpack.c.bf16 %v636_v6, %v635_v9  ;;  %v639_v16 = vld [vmem:[#allocation7 + $0x460] sm:$0xff]  ;;  %v640_v45 = vld [vmem:[#allocation7 + $0x468] sm:$0xff] }
 0x155   : > { %v5820_v9 = vld [vmem:[#allocation2 + $0x49] sm:$0xff] }
 0x156   : > { %990 = vmatmul.mubr.f32.gmra.mrb[20].mxu0 %v5698_v20 }
 0x157   : > { %994 = vmatprep.mubr.f32.mxu0 %v5569_v54  ;;  %3886 = vmatpush1.bf16.msra.mxu0 %v3885_v12  ;;  %v590_v54 = vld [vmem:[#allocation7 + $0x2d8] sm:$0xff]  ;;  %v637_v12 = vld [vmem:[#allocation7 + $0x450] sm:$0xff] }
 0x158   : > { %3887 = vmatprep.subr.bf16.mxu0 %v6910_v0  ;;  %v3894_v31 = vpack.c.bf16 %v590_v54, %v589_v46  ;;  %v5793_v46 = vld [vmem:[#allocation2 + $0x172] sm:$0xff] }
 0x159   : > { %v641_v54 = vld [vmem:[#allocation7 + $0x470] sm:$0xff] }
 0x15a   : > { %995 = vmatmul.mubr.f32.gmra.mrb[22].mxu0 %v5703_v21 }
 0x15b   : > { %999 = vmatprep.mubr.f32.mxu0 %v5574_v17  ;;  %3889 = vmatpush1.bf16.msra.mxu0 %v3888_v10  ;;  %v592_v17 = vld [vmem:[#allocation7 + $0x2e8] sm:$0xff]  ;;  %v3970_v10 = vpack.c.bf16 %v638_v13, %v637_v12  ;;  %v5827_v12 = vld [vmem:[#allocation2 + $0x51] sm:$0xff] }
 0x15c   : > { %3890 = vmatprep.subr.bf16.mxu0 %v6910_v0  ;;  %v3897_v59 = vpack.c.bf16 %v592_v17, %v591_v26  ;;  %v595_v26 = vld [vmem:[#allocation7 + $0x300] sm:$0xff]  ;;  %v596_v17 = vld [vmem:[#allocation7 + $0x308] sm:$0xff] }
 0x15e   : > { %1000 = vmatmul.mubr.f32.gmra.mrb[24].mxu0 %v5708_v14 }
 0x15f   : > { %1004 = vmatprep.mubr.f32.mxu0 %v5579_v63  ;;  %3892 = vmatpush1.bf16.msra.mxu0 %v3891_v22  ;;  %v594_v63 = vld [vmem:[#allocation7 + $0x2f8] sm:$0xff]  ;;  %v5789_v22 = vld [vmem:[#allocation2 + $0x188] sm:$0xff] }
 0x160   : > { %3893 = vmatprep.subr.bf16.mxu0 %v6910_v0  ;;  %v3900_v40 = vpack.c.bf16 %v594_v63, %v593_v37  ;;  %v3903_v37 = vpack.c.bf16 %v596_v17, %v595_v26  ;;  %v597_v63 = vld [vmem:[#allocation7 + $0x310] sm:$0xff]  ;;  %v614_v26 = vld [vmem:[#allocation7 + $0x398] sm:$0xff] }
 0x161   : > { %v5848_v17 = vld [vmem:[#allocation2 + $0x79] sm:$0xff] }
 0x162   : > { %1005 = vmatmul.mubr.f32.gmra.mrb[26].mxu0 %v5713_v25 }
 0x163   : > { %1009 = vmatprep.mubr.f32.mxu0 %v5584_v35  ;;  %3895 = vmatpush1.bf16.msra.mxu0 %v3894_v31  ;;  %v5728_v35 = vld [vmem:[#allocation2 + $0xc2] sm:$0xff]  ;;  %v642_v31 = vld [vmem:[#allocation7 + $0x478] sm:$0xff] }
 0x164   : > { %3896 = vmatprep.subr.bf16.mxu0 %v6910_v0 }
 0x166   : > { %1010 = vmatmul.mubr.f32.gmra.mrb[28].mxu0 %v5718_v34 }
 0x167   : > { %1014 = vmatprep.mubr.f32.mxu0 %v5589_v36  ;;  %3898 = vmatpush1.bf16.msra.mxu0 %v3897_v59  ;;  %v5733_v36 = vld [vmem:[#allocation2 + $0xca] sm:$0xff]  ;;  %v3978_v59 = vpack.c.bf16 %v642_v31, %v641_v54 }
 0x168   : > { %3899 = vmatprep.subr.bf16.mxu0 %v6910_v0  ;;  %v5841_v54 = vld [vmem:[#allocation2 + $0x69] sm:$0xff] }
 0x16a   : > { %1015 = vmatmul.mubr.f32.gmra.mrb[30].mxu0 %v5723_v27 }
 0x16b   : > { %1019 = vmatprep.mubr.f32.mxu0 %v5593_v4  ;;  %3901 = vmatpush1.bf16.msra.mxu0 %v3900_v40  ;;  %v5741_v4 = vld [vmem:[#allocation2 + $0xe2] sm:$0xff]  ;;  %v598_v40 = vld [vmem:[#allocation7 + $0x318] sm:$0xff] }
 0x16c   : > { %3902 = vmatprep.subr.bf16.mxu0 %v6910_v0 }
 0x16e   : > { %1020 = vmatmul.mubr.f32.gmra.mrb[32].mxu0 %v5728_v35 }
 0x16f   : > { %1024 = vmatprep.mubr.f32.mxu0 %v5597_v38  ;;  %v5749_v38 = vld [vmem:[#allocation2 + $0xfa] sm:$0xff] }
 0x172   : > { %1025 = vmatmul.mubr.f32.gmra.mrb[34].mxu0 %v5733_v36 }
 0x173   : > { %1029 = vmatprep.mubr.f32.mxu0 %v5601_v5  ;;  %v5753_v5 = vld [vmem:[#allocation2 + $0x10a] sm:$0xff] }
 0x176   : > { %1030 = vmatmul.mubr.f32.gmra.mrb[36].mxu0 %v5737_v43 }
 0x177   : > { %1034 = vmatprep.mubr.f32.mxu0 %v5605_v41  ;;  %v5757_v41 = vld [vmem:[#allocation2 + $0x112] sm:$0xff] }
 0x17a   : > { %1035 = vmatmul.mubr.f32.gmra.mrb[38].mxu0 %v5741_v4 }
 0x17b   : > { %1039 = vmatprep.mubr.f32.mxu0 %v5609_v42  ;;  %v5761_v42 = vld [vmem:[#allocation2 + $0x122] sm:$0xff] }
 0x17e   : > { %1040 = vmatmul.mubr.f32.gmra.mrb[40].mxu0 %v5745_v28 }
 0x17f   : > { %1044 = vmatprep.mubr.f32.mxu0 %v5613_v44  ;;  %v627_v44 = vld [vmem:[#allocation7 + $0x400] sm:$0xff] }
 0x180   : > { %v3950_v53 = vpack.c.bf16 %v628_v50, %v627_v44  ;;  %v4743_v44 = vld [vmem:[#allocation2 + $0x19] sm:$0xff]  ;;  %v3906_v50 = vpack.c.bf16 %v598_v40, %v597_v63  ;;  %v5855_v63 = vld [vmem:[#allocation2 + $0x81] sm:$0xff] }
 0x182   : > { %1045 = vmatmul.mubr.f32.gmra.mrb[42].mxu0 %v5749_v38  ;;  %3951 = vmatprep.subr.bf16.mxu1 %v3950_v53 }
 0x183   : > { %1049 = vmatprep.mubr.f32.mxu0 %v5617_v47  ;;  %v5765_v47 = vld [vmem:[#allocation2 + $0x12a] sm:$0xff]  ;;  %3953 = vmatpush3.bf16.msra.mxu1 %v3950_v53  ;;  %v599_v53 = vld [vmem:[#allocation7 + $0x320] sm:$0xff] }
 0x186   : > { %1050 = vmatmul.mubr.f32.gmra.mrb[44].mxu0 %v5753_v5 }
 0x187   : > { %1054 = vmatprep.mubr.f32.mxu0 %v5621_v48  ;;  %v629_v48 = vld [vmem:[#allocation7 + $0x410] sm:$0xff] }
 0x188   : > { %v3954_v11 = vpack.c.bf16 %v630_v29, %v629_v48  ;;  %v600_v48 = vld [vmem:[#allocation7 + $0x328] sm:$0xff] }
 0x189   : > { %v3909_v29 = vpack.c.bf16 %v600_v48, %v599_v53  ;;  %v620_v48 = vld [vmem:[#allocation7 + $0x3c8] sm:$0xff] }
 0x18a   : > { %1055 = vmatmul.mubr.f32.gmra.mrb[46].mxu0 %v5757_v41  ;;  %3955 = vmatprep.subr.bf16.mxu1 %v3954_v11 }
 0x18b   : > { %1059 = vmatprep.mubr.f32.mxu0 %v5625_v49  ;;  %v5769_v49 = vld [vmem:[#allocation2 + $0x13a] sm:$0xff]  ;;  %3957 = vmatpush3.bf16.msra.mxu1 %v3954_v11  ;;  %v601_v11 = vld [vmem:[#allocation7 + $0x330] sm:$0xff] }
 0x18c   : > { %3959 = vmatprep.subr.bf16.mxu1 %v3958_v15  ;;  %v3912_v30 = vpack.c.bf16 %v602_v1, %v601_v11  ;;  %v622_v11 = vld [vmem:[#allocation7 + $0x3d8] sm:$0xff]  ;;  %v5876_v1 = vld [vmem:[#allocation2 + $0xa9] sm:$0xff] }
 0x18e   : > { %1060 = vmatmul.mubr.f32.gmra.mrb[48].mxu0 %v5761_v42 }
 0x18f   : > { %1064 = vmatprep.mubr.f32.mxu0 %v5629_v51  ;;  %v5773_v51 = vld [vmem:[#allocation2 + $0x142] sm:$0xff]  ;;  %3961 = vmatpush3.bf16.msra.mxu1 %v3958_v15 }
 0x190   : > { %3963 = vmatprep.subr.bf16.mxu1 %v3962_v24  ;;  %v604_v15 = vld [vmem:[#allocation7 + $0x348] sm:$0xff] }
 0x192   : > { %1065 = vmatmul.mubr.f32.gmra.mrb[50].mxu0 %v5765_v47 }
 0x193   : > { %1069 = vmatprep.mubr.f32.mxu0 %v5633_v52  ;;  %v5777_v52 = vld [vmem:[#allocation2 + $0x152] sm:$0xff]  ;;  %3965 = vmatpush3.bf16.msra.mxu1 %v3962_v24 }
 0x194   : > { %3967 = vmatprep.subr.bf16.mxu1 %v3966_v33  ;;  %v606_v24 = vld [vmem:[#allocation7 + $0x358] sm:$0xff] }
 0x196   : > { %1070 = vmatmul.mubr.f32.gmra.mrb[52].mxu0 %v5769_v49 }
 0x197   : > { %1074 = vmatprep.mubr.f32.mxu0 %v5641_v56  ;;  %v5781_v56 = vld [vmem:[#allocation2 + $0x15a] sm:$0xff]  ;;  %3969 = vmatpush3.bf16.msra.mxu1 %v3966_v33  ;;  %v608_v33 = vld [vmem:[#allocation7 + $0x368] sm:$0xff] }
 0x198   : > { %3971 = vmatprep.subr.bf16.mxu1 %v3970_v10 }
 0x19a   : > { %1075 = vmatmul.mubr.f32.gmra.mrb[54].mxu0 %v5773_v51 }
 0x19b   : > { %1079 = vmatprep.mubr.f32.mxu0 %v5649_v60  ;;  %v5787_v60 = vld [vmem:[#allocation2 + $0x16a] sm:$0xff]  ;;  %3973 = vmatpush3.bf16.msra.mxu1 %v3970_v10  ;;  %v610_v10 = vld [vmem:[#allocation7 + $0x378] sm:$0xff] }
 0x19e   : > { %1080 = vmatmul.mubr.f32.gmra.mrb[56].mxu0 %v5777_v52 }
 0x19f   : > { %1084 = vmatprep.mubr.f32.mxu0 %v5653_v2  ;;  %v3974_v2 = vpack.c.bf16 %v640_v45, %v639_v16  ;;  %v5834_v16 = vld [vmem:[#allocation2 + $0x61] sm:$0xff] }
 0x1a1   : > { %3975 = vmatprep.subr.bf16.mxu1 %v3974_v2 }
 0x1a2   : > { %1085 = vmatmul.mubr.f32.gmra.mrb[58].mxu0 %v5781_v56  ;;  %3977 = vmatpush3.bf16.msra.mxu1 %v3974_v2  ;;  %v612_v2 = vld [vmem:[#allocation7 + $0x388] sm:$0xff] }
 0x1a3   : > { %1089 = vmatprep.mubr.f32.mxu0 %v5783_v39  ;;  %3979 = vmatprep.subr.bf16.mxu1 %v3978_v59 }
 0x1a6   : > { %1090 = vmatmul.mubr.f32.gmra.mrb[60].mxu0 %v5787_v60  ;;  %3981 = vmatpush3.bf16.msra.mxu1 %v3978_v59 }
 0x1a7   : > { %1094 = vmatprep.mubr.f32.mxu0 %v5789_v22  ;;  %3982 = vmatprep.subr.bf16.mxu1 %v6910_v0 }
 0x1a9   : > { %3631 = vmatmul.mubr.f32.vlgmr.msra.gmra.mrb[0].mxu1 %v5673_v3 }
 0x1aa   : > { %1095 = vmatmul.mubr.f32.gmra.mrb[62].mxu0 %v5793_v46  ;;  %3633 = vmatprep.mubr.f32.mxu1 %v5678_v7 }
 0x1ab   : > { %1164 = vmatprep.mubr.f32.mxu0 %v5660_v23  ;;  %v4744_v23 = vld [vmem:[#allocation2 + $0x21] sm:$0xff] }
 0x1ad   : > { %3634 = vmatmul.mubr.f32.gmra.mrb[2].mxu1 %v5683_v58 }
 0x1ae   : > { %1165 = vmatmul.mubr.f32.vlgmr.msra.gmra.mrb[0].mxu0 %v4743_v44  ;;  %3636 = vmatprep.mubr.f32.mxu1 %v5688_v61  ;;  %v618_v44 = vld [vmem:[#allocation7 + $0x3b8] sm:$0xff] }
 0x1af   : > { %3904 = vmatpush1.bf16.msra.mxu0 %v3903_v37  ;;  %1169 = vmatprep.mubr.f32.mxu0 %v5665_v57  ;;  %v5806_v57 = vld [vmem:[#allocation2 + $0x31] sm:$0xff]  ;;  %v616_v37 = vld [vmem:[#allocation7 + $0x3a8] sm:$0xff] }
 0x1b0   : > { %3905 = vmatprep.subr.bf16.mxu0 %v6910_v0 }
 0x1b1   : > { %3637 = vmatmul.mubr.f32.gmra.mrb[4].mxu1 %v5693_v19 }
 0x1b2   : > { %1170 = vmatmul.mubr.f32.gmra.mrb[2].mxu0 %v4744_v23  ;;  %3639 = vmatprep.mubr.f32.mxu1 %v5698_v20  ;;  %v5869_v23 = vld [vmem:[#allocation2 + $0x99] sm:$0xff] }
 0x1b3   : > { %1174 = vmatprep.mubr.f32.mxu0 %v5523_v62  ;;  %3907 = vmatpush1.bf16.msra.mxu0 %v3906_v50  ;;  %v603_v62 = vld [vmem:[#allocation7 + $0x340] sm:$0xff]  ;;  %v5862_v50 = vld [vmem:[#allocation2 + $0x91] sm:$0xff] }
 0x1b4   : > { %3908 = vmatprep.subr.bf16.mxu0 %v6910_v0  ;;  %v3915_v32 = vpack.c.bf16 %v604_v15, %v603_v62  ;;  %v624_v62 = vld [vmem:[#allocation7 + $0x3e8] sm:$0xff]  ;;  %v5883_v15 = vld [vmem:[#allocation2 + $0xb1] sm:$0xff] }
 0x1b5   : > { %3640 = vmatmul.mubr.f32.gmra.mrb[6].mxu1 %v5703_v21 }
 0x1b6   : > { %1175 = vmatmul.mubr.f32.gmra.mrb[4].mxu0 %v5806_v57  ;;  %3642 = vmatprep.mubr.f32.mxu1 %v5708_v14 }
 0x1b7   : > { %1179 = vmatprep.mubr.f32.mxu0 %v5673_v3  ;;  %3910 = vmatpush1.bf16.msra.mxu0 %v3909_v29  ;;  %v605_v3 = vld [vmem:[#allocation7 + $0x350] sm:$0xff] }
 0x1b8   : > { %3911 = vmatprep.subr.bf16.mxu0 %v6910_v0  ;;  %v3918_v6 = vpack.c.bf16 %v606_v24, %v605_v3  ;;  %v495_v3 = vld [vmem:[#allocation2 + $0x182] sm:$0xff]  ;;  %v626_v24 = vld [vmem:[#allocation7 + $0x3f8] sm:$0xff] }
 0x1b9   : > { %3643 = vmatmul.mubr.f32.gmra.mrb[8].mxu1 %v5713_v25 }
 0x1ba   : > { %1180 = vmatmul.mubr.f32.gmra.mrb[6].mxu0 %v5813_v18  ;;  %3645 = vmatprep.mubr.f32.mxu1 %v5718_v34 }
 0x1bb   : > { %1184 = vmatprep.mubr.f32.mxu0 %v5678_v7  ;;  %3913 = vmatpush1.bf16.msra.mxu0 %v3912_v30  ;;  %v607_v7 = vld [vmem:[#allocation7 + $0x360] sm:$0xff] }
 0x1bc   : > { %3914 = vmatprep.subr.bf16.mxu0 %v6910_v0  ;;  %v3921_v13 = vpack.c.bf16 %v608_v33, %v607_v7  ;;  %v5889_v7 = vld [vmem:[#allocation2 + $0xc1] sm:$0xff] }
 0x1bd   : > { %3646 = vmatmul.mubr.f32.gmra.mrb[10].mxu1 %v5723_v27 }
 0x1be   : > { %1185 = vmatmul.mubr.f32.gmra.mrb[8].mxu0 %v5820_v9  ;;  %3648 = vmatprep.mubr.f32.mxu1 %v5728_v35 }
 0x1bf   : > { %1189 = vmatprep.mubr.f32.mxu0 %v5683_v58  ;;  %3916 = vmatpush1.bf16.msra.mxu0 %v3915_v32  ;;  %v609_v58 = vld [vmem:[#allocation7 + $0x370] sm:$0xff] }
 0x1c0   : > { %3917 = vmatprep.subr.bf16.mxu0 %v6910_v0  ;;  %v3924_v45 = vpack.c.bf16 %v610_v10, %v609_v58  ;;  %v5902_v58 = vld [vmem:[#allocation2 + $0xe1] sm:$0xff]  ;;  %v5914_v10 = vld [vmem:[#allocation2 + $0x109] sm:$0xff] }
 0x1c1   : > { %3649 = vmatmul.mubr.f32.gmra.mrb[12].mxu1 %v5733_v36 }
 0x1c2   : > { %1190 = vmatmul.mubr.f32.gmra.mrb[10].mxu0 %v5827_v12  ;;  %3651 = vmatprep.mubr.f32.mxu1 %v5737_v43 }
 0x1c3   : > { %1194 = vmatprep.mubr.f32.mxu0 %v5688_v61  ;;  %3919 = vmatpush1.bf16.msra.mxu0 %v3918_v6  ;;  %v611_v61 = vld [vmem:[#allocation7 + $0x380] sm:$0xff]  ;;  %v496_v6 = vld [vmem:[#allocation2 + $0x18a] sm:$0xff] }
 0x1c4   : > { %3920 = vmatprep.subr.bf16.mxu0 %v6910_v0  ;;  %v3927_v31 = vpack.c.bf16 %v612_v2, %v611_v61  ;;  %v2004_v61 = vld [vmem:[#allocation9 + $0x10] sm:$0xff]  ;;  %v2005_v2 = vld [vmem:[#allocation9 + $0x18] sm:$0xff] }
 0x1c5   : > { %3652 = vmatmul.mubr.f32.gmra.mrb[14].mxu1 %v5741_v4 }
 0x1c6   : > { %1195 = vmatmul.mubr.f32.gmra.mrb[12].mxu0 %v5834_v16  ;;  %3654 = vmatprep.mubr.f32.mxu1 %v5745_v28 }
 0x1c7   : > { %1199 = vmatprep.mubr.f32.mxu0 %v5693_v19  ;;  %3922 = vmatpush1.bf16.msra.mxu0 %v3921_v13  ;;  %v613_v19 = vld [vmem:[#allocation7 + $0x390] sm:$0xff]  ;;  %v5898_v13 = vld [vmem:[#allocation2 + $0xd9] sm:$0xff] }
 0x1c8   : > { %3923 = vmatprep.subr.bf16.mxu0 %v6910_v0  ;;  %v3930_v59 = vpack.c.bf16 %v614_v26, %v613_v19  ;;  %v4773_v19 = vld [vmem:[#allocation2 + $0x30] sm:$0xff]  ;;  %v2007_v26 = vld [vmem:[#allocation9 + $0x28] sm:$0xff] }
 0x1c9   : > { %3655 = vmatmul.mubr.f32.gmra.mrb[16].mxu1 %v5749_v38 }
 0x1ca   : > { %1200 = vmatmul.mubr.f32.gmra.mrb[14].mxu0 %v5841_v54  ;;  %3657 = vmatprep.mubr.f32.mxu1 %v5753_v5 }
 0x1cb   : > { %1204 = vmatprep.mubr.f32.mxu0 %v5698_v20  ;;  %3925 = vmatpush1.bf16.msra.mxu0 %v3924_v45  ;;  %v615_v20 = vld [vmem:[#allocation7 + $0x3a0] sm:$0xff]  ;;  %v2003_v45 = vld [vmem:[#allocation9 + $0x8] sm:$0xff] }
 0x1cc   : > { %3926 = vmatprep.subr.bf16.mxu0 %v6910_v0  ;;  %v3933_v40 = vpack.c.bf16 %v616_v37, %v615_v20  ;;  %v2008_v20 = vld [vmem:[#allocation9 + $0x30] sm:$0xff]  ;;  %v2130_v37 = vld [vmem:[#allocation9 + $0x400] sm:$0xff] }
 0x1cd   : > { %3658 = vmatmul.mubr.f32.gmra.mrb[18].mxu1 %v5757_v41 }
 0x1ce   : > { %1205 = vmatmul.mubr.f32.gmra.mrb[16].mxu0 %v5848_v17  ;;  %3660 = vmatprep.mubr.f32.mxu1 %v5761_v42 }
 0x1cf   : > { %1209 = vmatprep.mubr.f32.mxu0 %v5703_v21  ;;  %3928 = vmatpush1.bf16.msra.mxu0 %v3927_v31  ;;  %v617_v21 = vld [vmem:[#allocation7 + $0x3b0] sm:$0xff]  ;;  %v3986_v31 = vpack.c.bf16 %v2005_v2, %v2004_v61  ;;  %v2022_v61 = vld [vmem:[#allocation9 + $0xa0] sm:$0xff]  ;;  %v4782_v2 = vld [vmem:[#allocation2 + $0x98] sm:$0xff] }
 0x1d0   : > { %3929 = vmatprep.subr.bf16.mxu0 %v6910_v0  ;;  %v3936_v53 = vpack.c.bf16 %v618_v44, %v617_v21 }
 0x1d1   : > { %3661 = vmatmul.mubr.f32.gmra.mrb[20].mxu1 %v5765_v47 }
 0x1d2   : > { %1210 = vmatmul.mubr.f32.gmra.mrb[18].mxu0 %v5855_v63  ;;  %3663 = vmatprep.mubr.f32.mxu1 %v5769_v49 }
 0x1d3   : > { %1214 = vmatprep.mubr.f32.mxu0 %v5708_v14  ;;  %3931 = vmatpush1.bf16.msra.mxu0 %v3930_v59  ;;  %v619_v14 = vld [vmem:[#allocation7 + $0x3c0] sm:$0xff] }
 0x1d4   : > { %3932 = vmatprep.subr.bf16.mxu0 %v6910_v0  ;;  %v3939_v29 = vpack.c.bf16 %v620_v48, %v619_v14  ;;  %v2011_v14 = vld [vmem:[#allocation9 + $0x48] sm:$0xff] }
 0x1d5   : > { %3664 = vmatmul.mubr.f32.gmra.mrb[22].mxu1 %v5773_v51 }
 0x1d6   : > { %1215 = vmatmul.mubr.f32.gmra.mrb[20].mxu0 %v5862_v50  ;;  %3666 = vmatprep.mubr.f32.mxu1 %v5777_v52 }
 0x1d7   : > { %1219 = vmatprep.mubr.f32.mxu0 %v5713_v25  ;;  %3934 = vmatpush1.bf16.msra.mxu0 %v3933_v40  ;;  %v621_v25 = vld [vmem:[#allocation7 + $0x3d0] sm:$0xff]  ;;  %v2131_v40 = vld [vmem:[#allocation9 + $0x408] sm:$0xff] }
 0x1d8   : > { %3935 = vmatprep.subr.bf16.mxu0 %v6910_v0  ;;  %v3942_v30 = vpack.c.bf16 %v622_v11, %v621_v25  ;;  %v5960_v21 = vpack.c.bf16 %v2131_v40, %v2130_v37  ;;  %v2013_v25 = vld [vmem:[#allocation9 + $0x58] sm:$0xff]  ;;  %v4785_v37 = vld [vmem:[#allocation2 + $0xc0] sm:$0xff] }
 0x1d9   : > { %3667 = vmatmul.mubr.f32.gmra.mrb[24].mxu1 %v5781_v56  ;;  %v4787_v40 = vld [vmem:[#allocation2 + $0xd8] sm:$0xff] }
 0x1da   : > { %1220 = vmatmul.mubr.f32.gmra.mrb[22].mxu0 %v5869_v23  ;;  %3669 = vmatprep.mubr.f32.mxu1 %v5787_v60  ;;  %6988 = vst [vmem:[#allocation14_spill] sm:$0xff] %v5960_v21 }
 0x1db   : > { %1224 = vmatprep.mubr.f32.mxu0 %v5718_v34  ;;  %3937 = vmatpush1.bf16.msra.mxu0 %v3936_v53  ;;  %v623_v34 = vld [vmem:[#allocation7 + $0x3e0] sm:$0xff]  ;;  %v4775_v53 = vld [vmem:[#allocation2 + $0x48] sm:$0xff] }
 0x1dc   : > { %3938 = vmatprep.subr.bf16.mxu0 %v6910_v0  ;;  %v3945_v32 = vpack.c.bf16 %v624_v62, %v623_v34  ;;  %v2015_v34 = vld [vmem:[#allocation9 + $0x68] sm:$0xff] }
 0x1dd   : > { %3670 = vmatmul.mubr.f32.gmra.mrb[26].mxu1 %v5793_v46 }
 0x1de   : > { %1225 = vmatmul.mubr.f32.gmra.mrb[24].mxu0 %v5876_v1  ;;  %3672 = vmatprep.mubr.f32.mxu1 %v495_v3 }
 0x1df   : > { %1229 = vmatprep.mubr.f32.mxu0 %v5723_v27  ;;  %3940 = vmatpush1.bf16.msra.mxu0 %v3939_v29  ;;  %v625_v27 = vld [vmem:[#allocation7 + $0x3f0] sm:$0xff] }
 0x1e0   : > { %3941 = vmatprep.subr.bf16.mxu0 %v6910_v0  ;;  %v3948_v33 = vpack.c.bf16 %v626_v24, %v625_v27  ;;  %v2012_v29 = vld [vmem:[#allocation9 + $0x50] sm:$0xff]  ;;  %v2017_v27 = vld [vmem:[#allocation9 + $0x78] sm:$0xff] }
 0x1e1   : > { %3673 = vmatmul.mubr.f32.gmra.mrb[28].mxu1 %v496_v6  ;;  %v3998_v11 = vpack.c.bf16 %v2013_v25, %v2012_v29  ;;  %v4779_v24 = vld [vmem:[#allocation2 + $0x78] sm:$0xff] }
 0x1e2   : > { %1230 = vmatmul.mubr.f32.gmra.mrb[26].mxu0 %v5883_v15 }
 0x1e3   : > { %1234 = vmatprep.mubr.f32.mxu0 %v5728_v35  ;;  %3943 = vmatpush1.bf16.msra.mxu0 %v3942_v30  ;;  %v5894_v35 = vld [vmem:[#allocation2 + $0xc9] sm:$0xff]  ;;  %v4777_v30 = vld [vmem:[#allocation2 + $0x60] sm:$0xff] }
 0x1e4   : > { %3944 = vmatprep.subr.bf16.mxu0 %v6910_v0 }
 0x1e6   : > { %1235 = vmatmul.mubr.f32.gmra.mrb[28].mxu0 %v5889_v7 }
 0x1e7   : > { %1239 = vmatprep.mubr.f32.mxu0 %v5733_v36  ;;  %3946 = vmatpush1.bf16.msra.mxu0 %v3945_v32  ;;  %v5906_v36 = vld [vmem:[#allocation2 + $0xf1] sm:$0xff]  ;;  %v4778_v32 = vld [vmem:[#allocation2 + $0x68] sm:$0xff] }
 0x1e8   : > { %3947 = vmatprep.subr.bf16.mxu0 %v6910_v0 }
 0x1ea   : > { %1240 = vmatmul.mubr.f32.gmra.mrb[30].mxu0 %v5894_v35 }
 0x1eb   : > { %1244 = vmatprep.mubr.f32.mxu0 %v5737_v43  ;;  %3949 = vmatpush1.bf16.msra.mxu0 %v3948_v33  ;;  %v5910_v43 = vld [vmem:[#allocation2 + $0xf9] sm:$0xff]  ;;  %v2019_v33 = vld [vmem:[#allocation9 + $0x88] sm:$0xff] }
 0x1ec   : > { %4175 = vmatprep.subr.bf16.mxu0 %v5960_v21 }
 0x1ee   : > { %1245 = vmatmul.mubr.f32.gmra.mrb[32].mxu0 %v5898_v13 }
 0x1ef   : > { %1249 = vmatprep.mubr.f32.mxu0 %v5741_v4  ;;  %v5918_v4 = vld [vmem:[#allocation2 + $0x111] sm:$0xff] }
 0x1f2   : > { %1250 = vmatmul.mubr.f32.gmra.mrb[34].mxu0 %v5902_v58 }
 0x1f3   : > { %1254 = vmatprep.mubr.f32.mxu0 %v5745_v28  ;;  %v5922_v28 = vld [vmem:[#allocation2 + $0x121] sm:$0xff] }
 0x1f6   : > { %1255 = vmatmul.mubr.f32.gmra.mrb[36].mxu0 %v5906_v36 }
 0x1f7   : > { %1259 = vmatprep.mubr.f32.mxu0 %v5749_v38  ;;  %v5926_v38 = vld [vmem:[#allocation2 + $0x129] sm:$0xff] }
 0x1fa   : > { %1260 = vmatmul.mubr.f32.gmra.mrb[38].mxu0 %v5910_v43 }
 0x1fb   : > { %1264 = vmatprep.mubr.f32.mxu0 %v5753_v5  ;;  %v5930_v5 = vld [vmem:[#allocation2 + $0x139] sm:$0xff] }
 0x1fe   : > { %1265 = vmatmul.mubr.f32.gmra.mrb[40].mxu0 %v5914_v10 }
 0x1ff   : > { %1269 = vmatprep.mubr.f32.mxu0 %v5757_v41  ;;  %v5934_v41 = vld [vmem:[#allocation2 + $0x141] sm:$0xff] }
 0x202   : > { %1270 = vmatmul.mubr.f32.gmra.mrb[42].mxu0 %v5918_v4 }
 0x203   : > { %1274 = vmatprep.mubr.f32.mxu0 %v5761_v42  ;;  %v5938_v42 = vld [vmem:[#allocation2 + $0x151] sm:$0xff] }
 0x206   : > { %1275 = vmatmul.mubr.f32.gmra.mrb[44].mxu0 %v5922_v28 }
 0x207   : > { %1279 = vmatprep.mubr.f32.mxu0 %v5765_v47  ;;  %v5942_v47 = vld [vmem:[#allocation2 + $0x159] sm:$0xff] }
 0x20a   : > { %1280 = vmatmul.mubr.f32.gmra.mrb[46].mxu0 %v5926_v38 }
 0x20b   : > { %1284 = vmatprep.mubr.f32.mxu0 %v5769_v49  ;;  %v5946_v49 = vld [vmem:[#allocation2 + $0x169] sm:$0xff] }
 0x20e   : > { %1285 = vmatmul.mubr.f32.gmra.mrb[48].mxu0 %v5930_v5 }
 0x20f   : > { %1289 = vmatprep.mubr.f32.mxu0 %v5773_v51  ;;  %v5950_v51 = vld [vmem:[#allocation2 + $0x171] sm:$0xff] }
 0x212   : > { %1290 = vmatmul.mubr.f32.gmra.mrb[50].mxu0 %v5934_v41 }
 0x213   : > { %1294 = vmatprep.mubr.f32.mxu0 %v5777_v52  ;;  %v497_v52 = vld [vmem:[#allocation2 + $0x19a] sm:$0xff] }
 0x214   : > { %3675 = vmatprep.mubr.f32.mxu1 %v497_v52  ;;  %v4780_v52 = vld [vmem:[#allocation2 + $0x80] sm:$0xff] }
 0x216   : > { %1295 = vmatmul.mubr.f32.gmra.mrb[52].mxu0 %v5938_v42 }
 0x217   : > { %1299 = vmatprep.mubr.f32.mxu0 %v5781_v56  ;;  %v498_v56 = vld [vmem:[#allocation2 + $0x1a2] sm:$0xff] }
 0x218   : > { %3676 = vmatmul.mubr.f32.gmra.mrb[30].mxu1 %v498_v56  ;;  %v2020_v56 = vld [vmem:[#allocation9 + $0x90] sm:$0xff] }
 0x21a   : > { %1300 = vmatmul.mubr.f32.gmra.mrb[54].mxu0 %v5942_v47 }
 0x21b   : > { %1304 = vmatprep.mubr.f32.mxu0 %v5787_v60  ;;  %v2002_v60 = vld [vmem:[#allocation9] sm:$0xff] }
 0x21e   : > { %1305 = vmatmul.mubr.f32.gmra.mrb[56].mxu0 %v5946_v49 }
 0x21f   : > { %1309 = vmatprep.mubr.f32.mxu0 %v5793_v46  ;;  %v3983_v46 = vpack.c.bf16 %v2003_v45, %v2002_v60  ;;  %v2021_v60 = vld [vmem:[#allocation9 + $0x98] sm:$0xff]  ;;  %v4781_v45 = vld [vmem:[#allocation2 + $0x90] sm:$0xff] }
 0x221   : > { %3984 = vmatpush1.bf16.msra.mxu1 %v3983_v46  ;;  %v2023_v46 = vld [vmem:[#allocation9 + $0xa8] sm:$0xff] }
 0x222   : > { %1310 = vmatmul.mubr.f32.gmra.mrb[58].mxu0 %v5950_v51  ;;  %3985 = vmatprep.subr.bf16.mxu1 %v6910_v0 }
 0x223   : > { %1314 = vmatprep.mubr.f32.mxu0 %v495_v3  ;;  %v2016_v3 = vld [vmem:[#allocation9 + $0x70] sm:$0xff] }
 0x225   : > { %3987 = vmatpush1.bf16.msra.mxu1 %v3986_v31  ;;  %v2024_v31 = vld [vmem:[#allocation9 + $0xb0] sm:$0xff] }
 0x226   : > { %1315 = vmatmul.mubr.f32.gmra.mrb[60].mxu0 %v5636_v55  ;;  %v2006_v55 = vld [vmem:[#allocation9 + $0x20] sm:$0xff]  ;;  %3988 = vmatprep.subr.bf16.mxu1 %v6910_v0 }
 0x227   : > { %1319 = vmatprep.mubr.f32.mxu0 %v496_v6  ;;  %v3989_v59 = vpack.c.bf16 %v2007_v26, %v2006_v55  ;;  %v2018_v6 = vld [vmem:[#allocation9 + $0x80] sm:$0xff]  ;;  %v4783_v55 = vld [vmem:[#allocation2 + $0xa8] sm:$0xff] }
 0x228   : > { %v2026_v26 = vld [vmem:[#allocation9 + $0xc0] sm:$0xff] }
 0x229   : > { %3990 = vmatpush1.bf16.msra.mxu1 %v3989_v59  ;;  %v2027_v59 = vld [vmem:[#allocation9 + $0xc8] sm:$0xff] }
 0x22a   : > { %1320 = vmatmul.mubr.f32.gmra.mrb[62].mxu0 %v5644_v8  ;;  %v4774_v8 = vld [vmem:[#allocation2 + $0x38] sm:$0xff]  ;;  %3991 = vmatprep.subr.bf16.mxu1 %v6910_v0 }
 0x22b   : > { %1389 = vmatprep.mubr.f32.mxu0 %v5806_v57  ;;  %v2009_v57 = vld [vmem:[#allocation9 + $0x38] sm:$0xff] }
 0x22c   : > { %v3992_v44 = vpack.c.bf16 %v2009_v57, %v2008_v20  ;;  %v2028_v20 = vld [vmem:[#allocation9 + $0xd0] sm:$0xff]  ;;  %v2029_v57 = vld [vmem:[#allocation9 + $0xd8] sm:$0xff] }
 0x22e   : > { %1390 = vmatmul.mubr.f32.vlgmr.msra.gmra.mrb[0].mxu0 %v4773_v19  ;;  %3993 = vmatpush1.bf16.msra.mxu1 %v3992_v44  ;;  %v2025_v19 = vld [vmem:[#allocation9 + $0xb8] sm:$0xff]  ;;  %v4789_v44 = vld [vmem:[#allocation2 + $0xf0] sm:$0xff] }
 0x22f   : > { %1394 = vmatprep.mubr.f32.mxu0 %v5813_v18  ;;  %v2010_v18 = vld [vmem:[#allocation9 + $0x40] sm:$0xff]  ;;  %4177 = vmatpush3.bf16.msra.mxu0 %v5960_v21 }
 0x230   : > { %v3995_v48 = vpack.c.bf16 %v2011_v14, %v2010_v18  ;;  %3994 = vmatprep.subr.bf16.mxu1 %v6910_v0  ;;  %v2031_v18 = vld [vmem:[#allocation9 + $0xe8] sm:$0xff]  ;;  %v4792_v14 = vld [vmem:[#allocation2 + $0x110] sm:$0xff] }
 0x232   : > { %1395 = vmatmul.mubr.f32.gmra.mrb[2].mxu0 %v4774_v8  ;;  %3996 = vmatpush1.bf16.msra.mxu1 %v3995_v48  ;;  %v4784_v8 = vld [vmem:[#allocation2 + $0xb0] sm:$0xff]  ;;  %v4793_v48 = vld [vmem:[#allocation2 + $0x120] sm:$0xff] }
 0x233   : > { %1399 = vmatprep.mubr.f32.mxu0 %v5820_v9  ;;  %v4776_v9 = vld [vmem:[#allocation2 + $0x50] sm:$0xff]  ;;  %3997 = vmatprep.subr.bf16.mxu1 %v6910_v0 }
 0x236   : > { %1400 = vmatmul.mubr.f32.gmra.mrb[4].mxu0 %v4775_v53  ;;  %3999 = vmatpush1.bf16.msra.mxu1 %v3998_v11  ;;  %v4791_v53 = vld [vmem:[#allocation2 + $0x108] sm:$0xff] }
 0x237   : > { %1404 = vmatprep.mubr.f32.mxu0 %v5827_v12  ;;  %v2014_v12 = vld [vmem:[#allocation9 + $0x60] sm:$0xff]  ;;  %4000 = vmatprep.subr.bf16.mxu1 %v6910_v0  ;;  %v4794_v11 = vld [vmem:[#allocation2 + $0x128] sm:$0xff] }
 0x238   : > { %v4001_v62 = vpack.c.bf16 %v2015_v34, %v2014_v12  ;;  %v2134_v12 = vld [vmem:[#allocation9 + $0x420] sm:$0xff]  ;;  %v2135_v34 = vld [vmem:[#allocation9 + $0x428] sm:$0xff] }
 0x23a   : > { %1405 = vmatmul.mubr.f32.gmra.mrb[6].mxu0 %v4776_v9  ;;  %4002 = vmatpush1.bf16.msra.mxu1 %v4001_v62  ;;  %v2132_v9 = vld [vmem:[#allocation9 + $0x410] sm:$0xff]  ;;  %v6008_v62 = vld [vmem:[#allocation2] sm:$0xff] }
 0x23b   : > { %1409 = vmatprep.mubr.f32.mxu0 %v5834_v16  ;;  %v4004_v16 = vpack.c.bf16 %v2017_v27, %v2016_v3  ;;  %4003 = vmatprep.subr.bf16.mxu1 %v6910_v0  ;;  %v4796_v3 = vld [vmem:[#allocation2 + $0x138] sm:$0xff]  ;;  %v2136_v27 = vld [vmem:[#allocation9 + $0x430] sm:$0xff] }
 0x23e   : > { %1410 = vmatmul.mubr.f32.gmra.mrb[8].mxu0 %v4777_v30  ;;  %4005 = vmatpush1.bf16.msra.mxu1 %v4004_v16  ;;  %v2137_v16 = vld [vmem:[#allocation9 + $0x438] sm:$0xff] }
 0x23f   : > { %1414 = vmatprep.mubr.f32.mxu0 %v5841_v54  ;;  %v4007_v54 = vpack.c.bf16 %v2019_v33, %v2018_v6  ;;  %4006 = vmatprep.subr.bf16.mxu1 %v6910_v0  ;;  %v4797_v6 = vld [vmem:[#allocation2 + $0x140] sm:$0xff] }
 0x242   : > { %1415 = vmatmul.mubr.f32.gmra.mrb[10].mxu0 %v4778_v32  ;;  %4008 = vmatpush1.bf16.msra.mxu1 %v4007_v54  ;;  %v1931_v32 = vld [vmem:[#allocation3 + $0x9] sm:$0xff] }
 0x243   : > { %1419 = vmatprep.mubr.f32.mxu0 %v5848_v17  ;;  %v4010_v17 = vpack.c.bf16 %v2021_v60, %v2020_v56  ;;  %4009 = vmatprep.subr.bf16.mxu1 %v6910_v0  ;;  %v2138_v54 = vld [vmem:[#allocation9 + $0x440] sm:$0xff]  ;;  %v2035_v60 = vld [vmem:[#allocation9 + $0x108] sm:$0xff] }
 0x244   : > { %v2034_v56 = vld [vmem:[#allocation9 + $0x100] sm:$0xff] }
 0x246   : > { %1420 = vmatmul.mubr.f32.gmra.mrb[12].mxu0 %v4779_v24  ;;  %4011 = vmatpush1.bf16.msra.mxu1 %v4010_v17  ;;  %v4031_v17 = vpack.c.bf16 %v2035_v60, %v2034_v56 }
 0x247   : > { %1424 = vmatprep.mubr.f32.mxu0 %v5855_v63  ;;  %v4013_v63 = vpack.c.bf16 %v2023_v46, %v2022_v61  ;;  %4012 = vmatprep.subr.bf16.mxu1 %v6910_v0  ;;  %v2140_v61 = vld [vmem:[#allocation9 + $0x450] sm:$0xff]  ;;  %v2141_v46 = vld [vmem:[#allocation9 + $0x458] sm:$0xff] }
 0x24a   : > { %1425 = vmatmul.mubr.f32.gmra.mrb[14].mxu0 %v4780_v52  ;;  %4014 = vmatpush1.bf16.msra.mxu1 %v4013_v63  ;;  %v2139_v52 = vld [vmem:[#allocation9 + $0x448] sm:$0xff]  ;;  %v6028_v63 = vpack.c.bf16 %v2141_v46, %v2140_v61 }
 0x24b   : > { %1429 = vmatprep.mubr.f32.mxu0 %v5862_v50  ;;  %v4016_v50 = vpack.c.bf16 %v2025_v19, %v2024_v31  ;;  %4015 = vmatprep.subr.bf16.mxu1 %v6910_v0  ;;  %v2142_v19 = vld [vmem:[#allocation9 + $0x460] sm:$0xff]  ;;  %v2051_v61 = vld [vmem:[#allocation9 + $0x188] sm:$0xff] }
 0x24c   : > { %6993 = vst [vmem:[#allocation19_spill] sm:$0xff] %v6028_v63 }
 0x24e   : > { %1430 = vmatmul.mubr.f32.gmra.mrb[16].mxu0 %v4781_v45  ;;  %4017 = vmatpush1.bf16.msra.mxu1 %v4016_v50  ;;  %v4798_v45 = vld [vmem:[#allocation2 + $0x150] sm:$0xff]  ;;  %v2143_v50 = vld [vmem:[#allocation9 + $0x468] sm:$0xff] }
 0x24f   : > { %1434 = vmatprep.mubr.f32.mxu0 %v5869_v23  ;;  %v4019_v23 = vpack.c.bf16 %v2027_v59, %v2026_v26  ;;  %4018 = vmatprep.subr.bf16.mxu1 %v6910_v0  ;;  %v2037_v26 = vld [vmem:[#allocation9 + $0x118] sm:$0xff] }
 0x252   : > { %1435 = vmatmul.mubr.f32.gmra.mrb[18].mxu0 %v4782_v2  ;;  %4020 = vmatpush1.bf16.msra.mxu1 %v4019_v23  ;;  %v4799_v2 = vld [vmem:[#allocation2 + $0x158] sm:$0xff]  ;;  %v4800_v23 = vld [vmem:[#allocation2 + $0x168] sm:$0xff] }
 0x253   : > { %1439 = vmatprep.mubr.f32.mxu0 %v5876_v1  ;;  %v4022_v1 = vpack.c.bf16 %v2029_v57, %v2028_v20  ;;  %4021 = vmatprep.subr.bf16.mxu1 %v6910_v0  ;;  %v2145_v20 = vld [vmem:[#allocation9 + $0x478] sm:$0xff] }
 0x256   : > { %1440 = vmatmul.mubr.f32.gmra.mrb[20].mxu0 %v4783_v55  ;;  %4023 = vmatpush1.bf16.msra.mxu1 %v4022_v1  ;;  %v2036_v55 = vld [vmem:[#allocation9 + $0x110] sm:$0xff] }
 0x257   : > { %1444 = vmatprep.mubr.f32.mxu0 %v5883_v15  ;;  %v4786_v15 = vld [vmem:[#allocation2 + $0xc8] sm:$0xff]  ;;  %4024 = vmatprep.subr.bf16.mxu1 %v6910_v0  ;;  %v4034_v59 = vpack.c.bf16 %v2037_v26, %v2036_v55  ;;  %v4801_v1 = vld [vmem:[#allocation2 + $0x170] sm:$0xff]  ;;  %v2053_v55 = vld [vmem:[#allocation9 + $0x198] sm:$0xff] }
 0x25a   : > { %1445 = vmatmul.mubr.f32.gmra.mrb[22].mxu0 %v4784_v8  ;;  %v2144_v8 = vld [vmem:[#allocation9 + $0x470] sm:$0xff] }
 0x25b   : > { %1449 = vmatprep.mubr.f32.mxu0 %v5889_v7  ;;  %v4788_v7 = vld [vmem:[#allocation2 + $0xe0] sm:$0xff]  ;;  %v6043_v57 = vpack.c.bf16 %v2145_v20, %v2144_v8  ;;  %v2055_v20 = vld [vmem:[#allocation9 + $0x1a8] sm:$0xff] }
 0x25c   : > { %v2054_v8 = vld [vmem:[#allocation9 + $0x1a0] sm:$0xff] }
 0x25d   : > { %6995 = vst [vmem:[#allocation21_spill] sm:$0xff] %v6043_v57 }
 0x25e   : > { %1450 = vmatmul.mubr.f32.gmra.mrb[24].mxu0 %v4785_v37 }
 0x25f   : > { %1454 = vmatprep.mubr.f32.mxu0 %v5894_v35  ;;  %v4790_v35 = vld [vmem:[#allocation2 + $0xf8] sm:$0xff] }
 0x262   : > { %1455 = vmatmul.mubr.f32.gmra.mrb[26].mxu0 %v4786_v15  ;;  %v4802_v15 = vld [vmem:[#allocation2 + $0x181] sm:$0xff] }
 0x263   : > { %1459 = vmatprep.mubr.f32.mxu0 %v5898_v13  ;;  %v2030_v13 = vld [vmem:[#allocation9 + $0xe0] sm:$0xff] }
 0x266   : > { %1460 = vmatmul.mubr.f32.gmra.mrb[28].mxu0 %v4787_v40  ;;  %v2038_v40 = vld [vmem:[#allocation9 + $0x120] sm:$0xff] }
 0x267   : > { %1464 = vmatprep.mubr.f32.mxu0 %v5902_v58  ;;  %v4025_v58 = vpack.c.bf16 %v2031_v18, %v2030_v13  ;;  %v462_v18 = vld [vmem:[#allocation2 + $0x1a1] sm:$0xff] }
 0x269   : > { %4026 = vmatpush1.bf16.msra.mxu1 %v4025_v58  ;;  %v2041_v58 = vld [vmem:[#allocation9 + $0x138] sm:$0xff] }
 0x26a   : > { %1465 = vmatmul.mubr.f32.gmra.mrb[30].mxu0 %v4788_v7  ;;  %4027 = vmatprep.subr.bf16.mxu1 %v6910_v0  ;;  %v2039_v7 = vld [vmem:[#allocation9 + $0x128] sm:$0xff] }
 0x26b   : > { %1469 = vmatprep.mubr.f32.mxu0 %v5906_v36  ;;  %v2032_v36 = vld [vmem:[#allocation9 + $0xf0] sm:$0xff] }
 0x26e   : > { %1470 = vmatmul.mubr.f32.gmra.mrb[32].mxu0 %v4789_v44  ;;  %v4803_v44 = vld [vmem:[#allocation2 + $0x189] sm:$0xff] }
 0x26f   : > { %1474 = vmatprep.mubr.f32.mxu0 %v5910_v43  ;;  %v2033_v43 = vld [vmem:[#allocation9 + $0xf8] sm:$0xff] }
 0x270   : > { %v4028_v29 = vpack.c.bf16 %v2033_v43, %v2032_v36 }
 0x272   : > { %1475 = vmatmul.mubr.f32.gmra.mrb[34].mxu0 %v4790_v35  ;;  %4029 = vmatpush1.bf16.msra.mxu1 %v4028_v29  ;;  %v461_v35 = vld [vmem:[#allocation2 + $0x199] sm:$0xff] }
 0x273   : > { %1479 = vmatprep.mubr.f32.mxu0 %v5914_v10  ;;  %v2133_v10 = vld [vmem:[#allocation9 + $0x418] sm:$0xff]  ;;  %4030 = vmatprep.subr.bf16.mxu1 %v6910_v0 }
 0x276   : > { %1480 = vmatmul.mubr.f32.gmra.mrb[36].mxu0 %v4791_v53 }
 0x277   : > { %1484 = vmatprep.mubr.f32.mxu0 %v5918_v4  ;;  %v5996_v4 = vpack.c.bf16 %v2133_v10, %v2132_v9 }
 0x279   : > { %6989 = vst [vmem:[#allocation15_spill] sm:$0xff] %v5996_v4  ;;  %4179 = vmatprep.subr.bf16.mxu0 %v5996_v4 }
 0x27a   : > { %1485 = vmatmul.mubr.f32.gmra.mrb[38].mxu0 %v4792_v14  ;;  %v2040_v14 = vld [vmem:[#allocation9 + $0x130] sm:$0xff] }
 0x27b   : > { %1489 = vmatprep.mubr.f32.mxu0 %v5922_v28  ;;  %v1930_v28 = vld [vmem:[#allocation3 + $0x1] sm:$0xff]  ;;  %4181 = vmatpush3.bf16.msra.mxu0 %v5996_v4  ;;  %v4040_v36 = vpack.c.bf16 %v2041_v58, %v2040_v14  ;;  %v2058_v14 = vld [vmem:[#allocation9 + $0x1c0] sm:$0xff]  ;;  %v2059_v58 = vld [vmem:[#allocation9 + $0x1c8] sm:$0xff] }
 0x27c   : > { %v5999_v25 = vpop.f32.mrb[0].mxu1  ;;  %2217 = vmatprep.mubr.f32.mxu1 %v1930_v28  ;;  %v2044_v28 = vld [vmem:[#allocation9 + $0x150] sm:$0xff] }
 0x27d   : > { %v6002_v30 = vpop.f32.mrb[1].mxu1  ;;  %2218 = vmatmul.mubr.f32.vlgmr.msra.gmra.mrb[32].mxu1 %v6008_v62 }
 0x27e   : > { %1490 = vmatmul.mubr.f32.gmra.mrb[40].mxu0 %v4793_v48  ;;  %2222 = vmatprep.mubr.f32.mxu1 %v1931_v32  ;;  %v2043_v48 = vld [vmem:[#allocation9 + $0x148] sm:$0xff]  ;;  %v2046_v32 = vld [vmem:[#allocation9 + $0x160] sm:$0xff] }
 0x27f   : > { %1494 = vmatprep.mubr.f32.mxu0 %v5926_v38  ;;  %v6006_v38 = vpack.c.bf16 %v2135_v34, %v2134_v12  ;;  %4032 = vmatpush1.bf16.msra.mxu1 %v4031_v17 }
 0x280   : > { %v6018_v24 = vpop.f32.mrb[2].mxu1  ;;  %4033 = vmatprep.subr.bf16.mxu1 %v6910_v0 }
 0x281   : > { %6990 = vst [vmem:[#allocation16_spill] sm:$0xff] %v6006_v38  ;;  %4183 = vmatprep.subr.bf16.mxu0 %v6006_v38  ;;  %2223 = vmatmul.mubr.f32.gmra.mrb[34].mxu1 %v6008_v62  ;;  %v6020_v33 = vpop.f32.mrb[3].mxu1 }
 0x282   : > { %1495 = vmatmul.mubr.f32.gmra.mrb[42].mxu0 %v4794_v11  ;;  %v2045_v11 = vld [vmem:[#allocation9 + $0x158] sm:$0xff] }
 0x283   : > { %1499 = vmatprep.mubr.f32.mxu0 %v5930_v5  ;;  %4185 = vmatpush3.bf16.msra.mxu0 %v6006_v38  ;;  %v6014_v5 = vpack.c.bf16 %v2137_v16, %v2136_v27  ;;  %v4046_v12 = vpack.c.bf16 %v2045_v11, %v2044_v28  ;;  %v2061_v28 = vld [vmem:[#allocation9 + $0x1d8] sm:$0xff] }
 0x284   : > { %4035 = vmatpush1.bf16.msra.mxu1 %v4034_v59 }
 0x285   : > { %6991 = vst [vmem:[#allocation17_spill] sm:$0xff] %v6014_v5  ;;  %4187 = vmatprep.subr.bf16.mxu0 %v6014_v5  ;;  %4036 = vmatprep.subr.bf16.mxu1 %v6910_v0 }
 0x286   : > { %1500 = vmatmul.mubr.f32.gmra.mrb[44].mxu0 %v4796_v3  ;;  %v2047_v3 = vld [vmem:[#allocation9 + $0x168] sm:$0xff] }
 0x287   : > { %1504 = vmatprep.mubr.f32.mxu0 %v5934_v41  ;;  %4189 = vmatpush3.bf16.msra.mxu0 %v6014_v5  ;;  %v6024_v41 = vpack.c.bf16 %v2139_v52, %v2138_v54  ;;  %v4049_v27 = vpack.c.bf16 %v2047_v3, %v2046_v32  ;;  %v2048_v54 = vld [vmem:[#allocation9 + $0x170] sm:$0xff]  ;;  %v2049_v52 = vld [vmem:[#allocation9 + $0x178] sm:$0xff]  ;;  %v2062_v3 = vld [vmem:[#allocation9 + $0x1e0] sm:$0xff] }
 0x288   : > { %v4052_v56 = vpack.c.bf16 %v2049_v52, %v2048_v54  ;;  %v6120_v52 = vld [vmem:[%s6903_s2] ss:$0 sm:$0xff] }
 0x289   : > { %6992 = vst [vmem:[#allocation18_spill] sm:$0xff] %v6024_v41  ;;  %4191 = vmatprep.subr.bf16.mxu0 %v6024_v41 }
 0x28a   : > { %1505 = vmatmul.mubr.f32.gmra.mrb[46].mxu0 %v4797_v6 }
 0x28b   : > { %1509 = vmatprep.mubr.f32.mxu0 %v5938_v42  ;;  %4193 = vmatpush3.bf16.msra.mxu0 %v6024_v41  ;;  %v6033_v42 = vpop.f32.mrb[4].mxu1 }
 0x28c   : > { %4195 = vmatprep.subr.bf16.mxu0 %v6028_v63  ;;  %v6035_v31 = vpop.f32.mrb[5].mxu1 }
 0x28e   : > { %1510 = vmatmul.mubr.f32.gmra.mrb[48].mxu0 %v4798_v45  ;;  %v2050_v45 = vld [vmem:[#allocation9 + $0x180] sm:$0xff] }
 0x28f   : > { %1514 = vmatprep.mubr.f32.mxu0 %v5942_v47  ;;  %v6038_v47 = vpack.c.bf16 %v2143_v50, %v2142_v19  ;;  %4197 = vmatpush3.bf16.msra.mxu0 %v6028_v63  ;;  %v4055_v46 = vpack.c.bf16 %v2051_v61, %v2050_v45  ;;  %v2052_v50 = vld [vmem:[#allocation9 + $0x190] sm:$0xff] }
 0x290   : > { %v4058_v26 = vpack.c.bf16 %v2053_v55, %v2052_v50  ;;  %v2065_v50 = vld [vmem:[#allocation9 + $0x1f8] sm:$0xff] }
 0x291   : > { %6994 = vst [vmem:[#allocation20_spill] sm:$0xff] %v6038_v47  ;;  %4199 = vmatprep.subr.bf16.mxu0 %v6038_v47 }
 0x292   : > { %1515 = vmatmul.mubr.f32.gmra.mrb[50].mxu0 %v4799_v2 }
 0x293   : > { %1519 = vmatprep.mubr.f32.mxu0 %v5946_v49  ;;  %4201 = vmatpush3.bf16.msra.mxu0 %v6038_v47  ;;  %v6048_v49 = vpop.f32.mrb[6].mxu1 }
 0x294   : > { %4203 = vmatprep.subr.bf16.mxu0 %v6043_v57  ;;  %v6050_v37 = vpop.f32.mrb[7].mxu1 }
 0x295   : > { %v6055_v53 = vpop.f32.mrb[8].mxu1 }
 0x296   : > { %1520 = vmatmul.mubr.f32.gmra.mrb[52].mxu0 %v4800_v23  ;;  %v6058_v13 = vpop.f32.mrb[9].mxu1 }
 0x297   : > { %1524 = vmatprep.mubr.f32.mxu0 %v5950_v51  ;;  %4205 = vmatpush3.bf16.msra.mxu0 %v6043_v57  ;;  %v4037_v51 = vpack.c.bf16 %v2039_v7, %v2038_v40  ;;  %v2056_v7 = vld [vmem:[#allocation9 + $0x1b0] sm:$0xff] }
 0x299   : > { %4038 = vmatpush1.bf16.msra.mxu1 %v4037_v51  ;;  %v2057_v51 = vld [vmem:[#allocation9 + $0x1b8] sm:$0xff] }
 0x29a   : > { %1525 = vmatmul.mubr.f32.gmra.mrb[54].mxu0 %v4801_v1  ;;  %4039 = vmatprep.subr.bf16.mxu1 %v6910_v0  ;;  %v4061_v1 = vpack.c.bf16 %v2055_v20, %v2054_v8 }
 0x29b   : > { %1529 = vmatprep.mubr.f32.mxu0 %v4802_v15 }
 0x29d   : > { %4041 = vmatpush1.bf16.msra.mxu1 %v4040_v36  ;;  %v4067_v36 = vpack.c.bf16 %v2059_v58, %v2058_v14 }
 0x29e   : > { %1530 = vmatmul.mubr.f32.gmra.mrb[56].mxu0 %v5783_v39  ;;  %4042 = vmatprep.subr.bf16.mxu1 %v6910_v0  ;;  %v6062_v39 = vpop.f32.mrb[10].mxu1 }
 0x29f   : > { %1534 = vmatprep.mubr.f32.mxu0 %v4803_v44  ;;  %v6065_v43 = vpop.f32.mrb[11].mxu1  ;;  %v4064_v44 = vpack.c.bf16 %v2057_v51, %v2056_v7 }
 0x2a0   : > { %v6068_v10 = vpop.f32.mrb[12].mxu1 }
 0x2a1   : > { %v6070_v29 = vpop.f32.mrb[13].mxu1 }
 0x2a2   : > { %1535 = vmatmul.mubr.f32.gmra.mrb[58].mxu0 %v5789_v22  ;;  %v2042_v22 = vld [vmem:[#allocation9 + $0x140] sm:$0xff]  ;;  %v6073_v34 = vpop.f32.mrb[14].mxu1 }
 0x2a3   : > { %1539 = vmatprep.mubr.f32.mxu0 %v461_v35  ;;  %v4043_v9 = vpack.c.bf16 %v2043_v48, %v2042_v22 }
 0x2a5   : > { %4044 = vmatpush1.bf16.msra.mxu1 %v4043_v9  ;;  %v2060_v9 = vld [vmem:[#allocation9 + $0x1d0] sm:$0xff] }
 0x2a6   : > { %1540 = vmatmul.mubr.f32.gmra.mrb[60].mxu0 %v6008_v62  ;;  %4045 = vmatprep.subr.bf16.mxu1 %v6910_v0  ;;  %v4070_v11 = vpack.c.bf16 %v2061_v28, %v2060_v9 }
 0x2a7   : > { %1544 = vmatprep.mubr.f32.mxu0 %v462_v18 }
 0x2a9   : > { %4047 = vmatpush1.bf16.msra.mxu1 %v4046_v12 }
 0x2aa   : > { %1545 = vmatmul.mubr.f32.gmra.mrb[62].mxu0 %v6008_v62  ;;  %4048 = vmatprep.subr.bf16.mxu1 %v6910_v0  ;;  %v6075_v62 = vpop.f32.mrb[15].mxu1 }
 0x2ab   : > { %v6078_v16 = vpop.f32.mrb[16].mxu1 }
 0x2ac   : > { %v6080_v6 = vpop.f32.mrb[17].mxu1 }
 0x2ad   : > { %4050 = vmatpush1.bf16.msra.mxu1 %v4049_v27  ;;  %v6083_v60 = vpop.f32.mrb[18].mxu1  ;;  %v2063_v27 = vld [vmem:[#allocation9 + $0x1e8] sm:$0xff] }
 0x2ae   : > { %4051 = vmatprep.subr.bf16.mxu1 %v6910_v0  ;;  %v6085_v17 = vpop.f32.mrb[19].mxu1  ;;  %v4073_v54 = vpack.c.bf16 %v2063_v27, %v2062_v3 }
 0x2af   : > { %v6088_v2 = vpop.f32.mrb[20].mxu1 }
 0x2b0   : > { %v6090_v19 = vpop.f32.mrb[21].mxu1 }
 0x2b1   : > { %4053 = vmatpush1.bf16.msra.mxu1 %v4052_v56  ;;  %v6093_v59 = vpop.f32.mrb[22].mxu1 }
 0x2b2   : > { %4054 = vmatprep.subr.bf16.mxu1 %v6910_v0  ;;  %v6095_v23 = vpop.f32.mrb[23].mxu1 }
 0x2b3   : > { %v6098_v15 = vpop.f32.mrb[24].mxu1 }
 0x2b4   : > { %v6100_v40 = vpop.f32.mrb[25].mxu1 }
 0x2b5   : > { %4056 = vmatpush1.bf16.msra.mxu1 %v4055_v46  ;;  %v6103_v35 = vpop.f32.mrb[26].mxu1  ;;  %v2064_v46 = vld [vmem:[#allocation9 + $0x1f0] sm:$0xff] }
 0x2b6   : > { %4057 = vmatprep.subr.bf16.mxu1 %v6910_v0  ;;  %v6105_v18 = vpop.f32.mrb[27].mxu1  ;;  %v4076_v55 = vpack.c.bf16 %v2065_v50, %v2064_v46 }
 0x2b7   : > { %v6108_v22 = vpop.f32.mrb[28].mxu1 }
 0x2b8   : > { %v6110_v48 = vpop.f32.mrb[29].mxu1 }
 0x2b9   : > { %4059 = vmatpush1.bf16.msra.mxu1 %v4058_v26 }
 0x2ba   : > { %4060 = vmatprep.subr.bf16.mxu1 %v6910_v0 }
 0x2bd   : > { %4062 = vmatpush1.bf16.msra.mxu1 %v4061_v1 }
 0x2be   : > { %4063 = vmatprep.subr.bf16.mxu1 %v6910_v0 }
 0x2c1   : > { %4065 = vmatpush1.bf16.msra.mxu1 %v4064_v44 }
 0x2c2   : > { %4066 = vmatprep.subr.bf16.mxu1 %v6910_v0 }
 0x2c5   : > { %4068 = vmatpush1.bf16.msra.mxu1 %v4067_v36 }
 0x2c6   : > { %4069 = vmatprep.subr.bf16.mxu1 %v6910_v0 }
 0x2c9   : > { %4071 = vmatpush1.bf16.msra.mxu1 %v4070_v11 }
 0x2ca   : > { %4072 = vmatprep.subr.bf16.mxu1 %v6910_v0 }
 0x2cd   : > { %4074 = vmatpush1.bf16.msra.mxu1 %v4073_v54 }
 0x2ce   : > { %4075 = vmatprep.subr.bf16.mxu1 %v6910_v0 }
 0x2d1   : > { %4077 = vmatpush1.bf16.msra.mxu1 %v4076_v55 }
 0x2d2   : > { %4078 = vmatprep.subr.bf16.mxu1 %v6910_v0 }
 0x2eb   : > { %v6113_v12 = vpop.f32.mrb[30].mxu1 }
 0x2ec   : > { %v6115_v32 = vpop.f32.mrb[31].mxu1 }
 0x301   : > { %v1391_v56 = vpop.f32.mrb[0].mxu0 }
 0x302   : > { %v4222_v45 = vadd.f32 %v6120_v52, %v1391_v56  ;;  %v1393_v61 = vpop.f32.mrb[1].mxu0 }
 0x304   : > { %v1617_v26 = vadd.f32 %v4222_v45, %v6002_v30 }
 0x305   : > { %v1396_v8 = vpop.f32.mrb[2].mxu0 }
 0x306   : > { %v6125_v20 = vmax.f32 %v1617_v26, 0.0  ;;  %v4223_v1 = vadd.f32 %v6120_v52, %v1396_v8  ;;  %v1398_v7 = vpop.f32.mrb[3].mxu0 }
 0x308   : > { %6996 = vst [vmem:[#allocation22_spill] sm:$0xff] %v6125_v20  ;;  %1862 = vst [vmem:[#allocation3 + $0x19] sm:$0xff] %v6125_v20  ;;  %v1622_v51 = vadd.f32 %v4223_v1, %v5999_v25  ;;  %2227 = vmatprep.mubr.f32.mxu1 %v6125_v20 }
 0x309   : > { %v1401_v44 = vpop.f32.mrb[4].mxu0 }
 0x30a   : > { %v6132_v14 = vmax.f32 %v1622_v51, 0.0  ;;  %v4224_v30 = vadd.f32 %v6120_v52, %v1401_v44  ;;  %v1403_v58 = vpop.f32.mrb[5].mxu0 }
 0x30c   : > { %6997 = vst [vmem:[#allocation23_spill] sm:$0xff] %v6132_v14  ;;  %1863 = vst [vmem:[#allocation3 + $0x21] sm:$0xff] %v6132_v14  ;;  %v1627_v36 = vadd.f32 %v4224_v30, %v6020_v33 }
 0x30d   : > { %v1406_v9 = vpop.f32.mrb[6].mxu0 }
 0x30e   : > { %v6137_v28 = vmax.f32 %v1627_v36, 0.0  ;;  %v4225_v11 = vadd.f32 %v6120_v52, %v1406_v9  ;;  %v1408_v3 = vpop.f32.mrb[7].mxu0 }
 0x30f   : > { %v6140_v27 = vld [vmem:[#allocation3 + $0x18] sm:$0xff] }
 0x310   : > { %6998 = vst [vmem:[#allocation24_spill] sm:$0xff] %v6137_v28  ;;  %1864 = vst [vmem:[#allocation3 + $0x31] sm:$0xff] %v6137_v28  ;;  %v1632_v25 = vadd.f32 %v4225_v11, %v6018_v24  ;;  %2228 = vmatmul.mubr.f32.gmra.mrb[36].mxu1 %v6140_v27 }
 0x311   : > { %v1411_v54 = vpop.f32.mrb[8].mxu0  ;;  %2232 = vmatprep.mubr.f32.mxu1 %v6132_v14 }
 0x312   : > { %v6146_v56 = vmax.f32 %v1632_v25, 0.0  ;;  %v4226_v33 = vadd.f32 %v6120_v52, %v1411_v54  ;;  %v1413_v45 = vpop.f32.mrb[9].mxu0 }
 0x313   : > { %v6149_v61 = vld [vmem:[#allocation3 + $0x20] sm:$0xff] }
 0x314   : > { %6999 = vst [vmem:[#allocation25_spill] sm:$0xff] %v6146_v56  ;;  %1865 = vst [vmem:[#allocation3 + $0x39] sm:$0xff] %v6146_v56  ;;  %v1637_v46 = vadd.f32 %v4226_v33, %v6035_v31  ;;  %2233 = vmatmul.mubr.f32.gmra.mrb[38].mxu1 %v6149_v61 }
 0x315   : > { %v1416_v50 = vpop.f32.mrb[10].mxu0  ;;  %2237 = vmatprep.mubr.f32.mxu1 %v6137_v28 }
 0x316   : > { %v6155_v24 = vmax.f32 %v1637_v46, 0.0  ;;  %v4227_v55 = vadd.f32 %v6120_v52, %v1416_v50  ;;  %v1418_v26 = vpop.f32.mrb[11].mxu0 }
 0x317   : > { %v6158_v8 = vld [vmem:[#allocation3 + $0x30] sm:$0xff] }
 0x318   : > { %7000 = vst [vmem:[#allocation26_spill] sm:$0xff] %v6155_v24  ;;  %1866 = vst [vmem:[#allocation3 + $0x49] sm:$0xff] %v6155_v24  ;;  %v1642_v1 = vadd.f32 %v4227_v55, %v6033_v42  ;;  %2238 = vmatmul.mubr.f32.gmra.mrb[40].mxu1 %v6158_v8 }
 0x319   : > { %v1421_v7 = vpop.f32.mrb[12].mxu0  ;;  %2242 = vmatprep.mubr.f32.mxu1 %v6146_v56 }
 0x31a   : > { %v6164_v31 = vmax.f32 %v1642_v1, 0.0  ;;  %v4228_v51 = vadd.f32 %v6120_v52, %v1421_v7  ;;  %v1423_v44 = vpop.f32.mrb[13].mxu0 }
 0x31b   : > { %v6167_v30 = vld [vmem:[#allocation3 + $0x32] sm:$0xff]  ;;  %v6171_v36 = vld [vmem:[#allocation3 + $0x3a] sm:$0xff] }
 0x31c   : > { %7001 = vst [vmem:[#allocation27_spill] sm:$0xff] %v6164_v31  ;;  %v6169_v58 = vld [vmem:[#allocation3 + $0x38] sm:$0xff]  ;;  %1867 = vst [vmem:[#allocation3 + $0x51] sm:$0xff] %v6164_v31  ;;  %v1647_v42 = vadd.f32 %v4228_v51, %v6050_v37  ;;  %3710 = vmatprep.mubr.f32.mxu0 %v6167_v30 }
 0x31d   : > { %2243 = vmatmul.mubr.f32.gmra.mrb[42].mxu1 %v6169_v58  ;;  %v1426_v9 = vpop.f32.mrb[14].mxu0  ;;  %3711 = vmatmul.mubr.f32.vlgmr.msra.gmra.mrb[64].mxu0 %v6171_v36 }
 0x31e   : > { %2247 = vmatprep.mubr.f32.mxu1 %v6155_v24  ;;  %v6179_v11 = vmax.f32 %v1647_v42, 0.0  ;;  %v4229_v3 = vadd.f32 %v6120_v52, %v1426_v9  ;;  %v1428_v25 = vpop.f32.mrb[15].mxu0 }
 0x31f   : > { %v6182_v54 = vld [vmem:[#allocation3 + $0x48] sm:$0xff] }
 0x320   : > { %7002 = vst [vmem:[#allocation28_spill] sm:$0xff] %v6179_v11  ;;  %1868 = vst [vmem:[#allocation3 + $0x61] sm:$0xff] %v6179_v11  ;;  %v1652_v37 = vadd.f32 %v4229_v3, %v6048_v49 }
 0x321   : > { %2248 = vmatmul.mubr.f32.gmra.mrb[44].mxu1 %v6182_v54  ;;  %v1431_v33 = vpop.f32.mrb[16].mxu0 }
 0x322   : > { %2252 = vmatprep.mubr.f32.mxu1 %v6164_v31  ;;  %v6188_v45 = vmax.f32 %v1652_v37, 0.0  ;;  %v4230_v46 = vadd.f32 %v6120_v52, %v1431_v33  ;;  %v1433_v50 = vpop.f32.mrb[17].mxu0 }
 0x323   : > { %v6191_v55 = vld [vmem:[#allocation3 + $0x4a] sm:$0xff]  ;;  %v6195_v1 = vld [vmem:[#allocation3 + $0x52] sm:$0xff] }
 0x324   : > { %7003 = vst [vmem:[#allocation29_spill] sm:$0xff] %v6188_v45  ;;  %v6193_v26 = vld [vmem:[#allocation3 + $0x50] sm:$0xff]  ;;  %1869 = vst [vmem:[#allocation3 + $0x69] sm:$0xff] %v6188_v45  ;;  %v1657_v49 = vadd.f32 %v4230_v46, %v6058_v13  ;;  %3713 = vmatprep.mubr.f32.mxu0 %v6191_v55 }
 0x325   : > { %2253 = vmatmul.mubr.f32.gmra.mrb[46].mxu1 %v6193_v26  ;;  %v1436_v7 = vpop.f32.mrb[18].mxu0  ;;  %3714 = vmatmul.mubr.f32.gmra.mrb[66].mxu0 %v6195_v1 }
 0x326   : > { %2257 = vmatprep.mubr.f32.mxu1 %v6179_v11  ;;  %v6203_v51 = vmax.f32 %v1657_v49, 0.0  ;;  %v4231_v44 = vadd.f32 %v6120_v52, %v1436_v7  ;;  %v1438_v42 = vpop.f32.mrb[19].mxu0 }
 0x327   : > { %v6206_v9 = vld [vmem:[#allocation3 + $0x60] sm:$0xff] }
 0x328   : > { %7004 = vst [vmem:[#allocation30_spill] sm:$0xff] %v6203_v51  ;;  %1870 = vst [vmem:[#allocation3 + $0x79] sm:$0xff] %v6203_v51  ;;  %v1662_v13 = vadd.f32 %v4231_v44, %v6055_v53 }
 0x329   : > { %2258 = vmatmul.mubr.f32.gmra.mrb[48].mxu1 %v6206_v9  ;;  %v1441_v3 = vpop.f32.mrb[20].mxu0 }
 0x32a   : > { %2262 = vmatprep.mubr.f32.mxu1 %v6188_v45  ;;  %v6212_v25 = vmax.f32 %v1662_v13, 0.0  ;;  %v4232_v37 = vadd.f32 %v6120_v52, %v1441_v3  ;;  %v1443_v33 = vpop.f32.mrb[21].mxu0 }
 0x32b   : > { %v6215_v46 = vld [vmem:[#allocation3 + $0x62] sm:$0xff]  ;;  %v6219_v49 = vld [vmem:[#allocation3 + $0x6a] sm:$0xff] }
 0x32c   : > { %7005 = vst [vmem:[#allocation31_spill] sm:$0xff] %v6212_v25  ;;  %v6217_v50 = vld [vmem:[#allocation3 + $0x68] sm:$0xff]  ;;  %1871 = vst [vmem:[#allocation3 + $0x81] sm:$0xff] %v6212_v25  ;;  %v1667_v53 = vadd.f32 %v4232_v37, %v6065_v43  ;;  %3716 = vmatprep.mubr.f32.mxu0 %v6215_v46 }
 0x32d   : > { %2263 = vmatmul.mubr.f32.gmra.mrb[50].mxu1 %v6217_v50  ;;  %v1446_v7 = vpop.f32.mrb[22].mxu0  ;;  %3717 = vmatmul.mubr.f32.gmra.mrb[68].mxu0 %v6219_v49 }
 0x32e   : > { %2267 = vmatprep.mubr.f32.mxu1 %v6203_v51  ;;  %v6227_v44 = vmax.f32 %v1667_v53, 0.0  ;;  %v4233_v42 = vadd.f32 %v6120_v52, %v1446_v7  ;;  %v1448_v13 = vpop.f32.mrb[23].mxu0 }
 0x32f   : > { %v6230_v3 = vld [vmem:[#allocation3 + $0x78] sm:$0xff] }
 0x330   : > { %7006 = vst [vmem:[#allocation32_spill] sm:$0xff] %v6227_v44  ;;  %1872 = vst [vmem:[#allocation3 + $0x91] sm:$0xff] %v6227_v44  ;;  %v1672_v43 = vadd.f32 %v4233_v42, %v6062_v39 }
 0x331   : > { %2268 = vmatmul.mubr.f32.gmra.mrb[52].mxu1 %v6230_v3  ;;  %v1451_v37 = vpop.f32.mrb[24].mxu0 }
 0x332   : > { %2272 = vmatprep.mubr.f32.mxu1 %v6212_v25  ;;  %v6236_v33 = vmax.f32 %v1672_v43, 0.0  ;;  %v4234_v0 = vadd.f32 %v6120_v52, %v1451_v37  ;;  %v1453_v53 = vpop.f32.mrb[25].mxu0 }
 0x333   : > { %v6239_v57 = vld [vmem:[#allocation3 + $0x7a] sm:$0xff]  ;;  %v6243_v13 = vld [vmem:[#allocation3 + $0x82] sm:$0xff] }
 0x334   : > { %7007 = vst [vmem:[#allocation33_spill] sm:$0xff] %v6236_v33  ;;  %v6241_v7 = vld [vmem:[#allocation3 + $0x80] sm:$0xff]  ;;  %1873 = vst [vmem:[#allocation3 + $0x99] sm:$0xff] %v6236_v33  ;;  %v1677_v39 = vadd.f32 %v4234_v0, %v6070_v29  ;;  %3719 = vmatprep.mubr.f32.mxu0 %v6239_v57 }
 0x335   : > { %2273 = vmatmul.mubr.f32.gmra.mrb[54].mxu1 %v6241_v7  ;;  %v1456_v42 = vpop.f32.mrb[26].mxu0  ;;  %3720 = vmatmul.mubr.f32.gmra.mrb[70].mxu0 %v6243_v13 }
 0x336   : > { %2277 = vmatprep.mubr.f32.mxu1 %v6227_v44  ;;  %v6251_v43 = vmax.f32 %v1677_v39, 0.0  ;;  %v4235_v37 = vadd.f32 %v6120_v52, %v1456_v42  ;;  %v1458_v53 = vpop.f32.mrb[27].mxu0 }
 0x337   : > { %v6254_v47 = vld [vmem:[#allocation3 + $0x90] sm:$0xff] }
 0x338   : > { %7008 = vst [vmem:[#allocation34_spill] sm:$0xff] %v6251_v43  ;;  %1874 = vst [vmem:[#allocation3 + $0xa9] sm:$0xff] %v6251_v43  ;;  %v1682_v0 = vadd.f32 %v4235_v37, %v6068_v10 }
 0x339   : > { %2278 = vmatmul.mubr.f32.gmra.mrb[56].mxu1 %v6254_v47  ;;  %v1461_v29 = vpop.f32.mrb[28].mxu0 }
 0x33a   : > { %2282 = vmatprep.mubr.f32.mxu1 %v6236_v33  ;;  %v6260_v63 = vmax.f32 %v1682_v0, 0.0  ;;  %v4236_v41 = vadd.f32 %v6120_v52, %v1461_v29  ;;  %v1463_v39 = vpop.f32.mrb[29].mxu0 }
 0x33b   : > { %v6263_v5 = vld [vmem:[#allocation3 + $0x92] sm:$0xff]  ;;  %v6267_v53 = vld [vmem:[#allocation3 + $0x9a] sm:$0xff] }
 0x33c   : > { %7009 = vst [vmem:[#allocation35_spill] sm:$0xff] %v6260_v63  ;;  %v6265_v42 = vld [vmem:[#allocation3 + $0x98] sm:$0xff]  ;;  %1875 = vst [vmem:[#allocation3 + $0xb1] sm:$0xff] %v6260_v63  ;;  %v1687_v10 = vadd.f32 %v4236_v41, %v6075_v62  ;;  %3722 = vmatprep.mubr.f32.mxu0 %v6263_v5 }
 0x33d   : > { %2283 = vmatmul.mubr.f32.gmra.mrb[58].mxu1 %v6265_v42  ;;  %v1466_v37 = vpop.f32.mrb[30].mxu0  ;;  %3723 = vmatmul.mubr.f32.gmra.mrb[72].mxu0 %v6267_v53 }
 0x33e   : > { %2287 = vmatprep.mubr.f32.mxu1 %v6251_v43  ;;  %v6275_v0 = vmax.f32 %v1687_v10, 0.0  ;;  %v4237_v29 = vadd.f32 %v6120_v52, %v1466_v37  ;;  %v1468_v39 = vpop.f32.mrb[31].mxu0 }
 0x33f   : > { %v6278_v38 = vld [vmem:[#allocation3 + $0xa8] sm:$0xff] }
 0x340   : > { %7010 = vst [vmem:[#allocation36_spill] sm:$0xff] %v6275_v0  ;;  %1876 = vst [vmem:[#allocation3 + $0xc1] sm:$0xff] %v6275_v0  ;;  %v1692_v41 = vadd.f32 %v4237_v29, %v6073_v34 }
 0x341   : > { %2288 = vmatmul.mubr.f32.gmra.mrb[60].mxu1 %v6278_v38  ;;  %v1471_v62 = vpop.f32.mrb[32].mxu0 }
 0x342   : > { %2292 = vmatprep.mubr.f32.mxu1 %v6260_v63  ;;  %v6284_v4 = vmax.f32 %v1692_v41, 0.0  ;;  %v4238_v21 = vadd.f32 %v6120_v52, %v1471_v62  ;;  %v1473_v10 = vpop.f32.mrb[33].mxu0 }
 0x343   : > { %v6287_v43 = vld [vmem:[#allocation3 + $0xaa] sm:$0xff]  ;;  %v6291_v39 = vld [vmem:[#allocation3 + $0xb2] sm:$0xff] }
 0x344   : > { %7011 = vst [vmem:[#allocation37_spill] sm:$0xff] %v6284_v4  ;;  %v6289_v37 = vld [vmem:[#allocation3 + $0xb0] sm:$0xff]  ;;  %1877 = vst [vmem:[#allocation3 + $0xc9] sm:$0xff] %v6284_v4  ;;  %v1697_v34 = vadd.f32 %v4238_v21, %v6080_v6  ;;  %3725 = vmatprep.mubr.f32.mxu0 %v6287_v43 }
 0x345   : > { %2293 = vmatmul.mubr.f32.gmra.mrb[62].mxu1 %v6289_v37  ;;  %v1476_v29 = vpop.f32.mrb[34].mxu0  ;;  %3726 = vmatmul.mubr.f32.gmra.mrb[74].mxu0 %v6291_v39 }
 0x346   : > { %2297 = vmatprep.mubr.f32.mxu1 %v6275_v0  ;;  %v6299_v41 = vmax.f32 %v1697_v34, 0.0  ;;  %v4239_v62 = vadd.f32 %v6120_v52, %v1476_v29  ;;  %v1478_v10 = vpop.f32.mrb[35].mxu0 }
 0x347   : > { %v6302_v63 = vld [vmem:[#allocation3 + $0xc0] sm:$0xff] }
 0x348   : > { %7012 = vst [vmem:[#allocation38_spill] sm:$0xff] %v6299_v41  ;;  %1878 = vst [vmem:[#allocation3 + $0xd9] sm:$0xff] %v6299_v41  ;;  %v1702_v21 = vadd.f32 %v4239_v62, %v6078_v16 }
 0x349   : > { %2298 = vmatmul.mubr.f32.gmra.mrb[64].mxu1 %v6302_v63  ;;  %v1481_v6 = vpop.f32.mrb[36].mxu0 }
 0x34a   : > { %2302 = vmatprep.mubr.f32.mxu1 %v6284_v4  ;;  %v6308_v33 = vmax.f32 %v1702_v21, 0.0  ;;  %v4240_v0 = vadd.f32 %v6120_v52, %v1481_v6  ;;  %v1483_v34 = vpop.f32.mrb[37].mxu0 }
 0x34b   : > { %v6311_v44 = vld [vmem:[#allocation3 + $0xc2] sm:$0xff]  ;;  %v6315_v10 = vld [vmem:[#allocation3 + $0xca] sm:$0xff] }
 0x34c   : > { %7013 = vst [vmem:[#allocation39_spill] sm:$0xff] %v6308_v33  ;;  %v6313_v29 = vld [vmem:[#allocation3 + $0xc8] sm:$0xff]  ;;  %1879 = vst [vmem:[#allocation3 + $0xe1] sm:$0xff] %v6308_v33  ;;  %v1707_v16 = vadd.f32 %v4240_v0, %v6085_v17  ;;  %3728 = vmatprep.mubr.f32.mxu0 %v6311_v44 }
 0x34d   : > { %2303 = vmatmul.mubr.f32.gmra.mrb[66].mxu1 %v6313_v29  ;;  %v1486_v62 = vpop.f32.mrb[38].mxu0  ;;  %3729 = vmatmul.mubr.f32.gmra.mrb[76].mxu0 %v6315_v10 }
 0x34e   : > { %2307 = vmatprep.mubr.f32.mxu1 %v6299_v41  ;;  %v6323_v21 = vmax.f32 %v1707_v16, 0.0  ;;  %v4241_v6 = vadd.f32 %v6120_v52, %v1486_v62  ;;  %v1488_v34 = vpop.f32.mrb[39].mxu0 }
 0x34f   : > { %v6326_v4 = vld [vmem:[#allocation3 + $0xd8] sm:$0xff] }
 0x350   : > { %7014 = vst [vmem:[#allocation40_spill] sm:$0xff] %v6323_v21  ;;  %1880 = vst [vmem:[#allocation3 + $0xf1] sm:$0xff] %v6323_v21  ;;  %v1712_v17 = vadd.f32 %v4241_v6, %v6083_v60 }
 0x351   : > { %2308 = vmatmul.mubr.f32.gmra.mrb[68].mxu1 %v6326_v4  ;;  %v1491_v0 = vpop.f32.mrb[40].mxu0 }
 0x352   : > { %2312 = vmatprep.mubr.f32.mxu1 %v6308_v33  ;;  %v6332_v25 = vmax.f32 %v1712_v17, 0.0  ;;  %v4242_v41 = vadd.f32 %v6120_v52, %v1491_v0  ;;  %v1493_v16 = vpop.f32.mrb[41].mxu0 }
 0x353   : > { %v6335_v51 = vld [vmem:[#allocation3 + $0xda] sm:$0xff]  ;;  %v6339_v34 = vld [vmem:[#allocation3 + $0xe2] sm:$0xff] }
 0x354   : > { %7015 = vst [vmem:[#allocation41_spill] sm:$0xff] %v6332_v25  ;;  %v6337_v62 = vld [vmem:[#allocation3 + $0xe0] sm:$0xff]  ;;  %1881 = vst [vmem:[#allocation3 + $0xf9] sm:$0xff] %v6332_v25  ;;  %v1717_v60 = vadd.f32 %v4242_v41, %v6090_v19  ;;  %3731 = vmatprep.mubr.f32.mxu0 %v6335_v51 }
 0x355   : > { %2313 = vmatmul.mubr.f32.gmra.mrb[70].mxu1 %v6337_v62  ;;  %v1496_v6 = vpop.f32.mrb[42].mxu0  ;;  %3732 = vmatmul.mubr.f32.gmra.mrb[78].mxu0 %v6339_v34 }
 0x356   : > { %2317 = vmatprep.mubr.f32.mxu1 %v6323_v21  ;;  %v6347_v17 = vmax.f32 %v1717_v60, 0.0  ;;  %v4243_v0 = vadd.f32 %v6120_v52, %v1496_v6  ;;  %v1498_v16 = vpop.f32.mrb[43].mxu0 }
 0x357   : > { %v6350_v33 = vld [vmem:[#allocation3 + $0xf0] sm:$0xff] }
 0x358   : > { %7016 = vst [vmem:[#allocation42_spill] sm:$0xff] %v6347_v17  ;;  %1882 = vst [vmem:[#allocation3 + $0x109] sm:$0xff] %v6347_v17  ;;  %v1722_v19 = vadd.f32 %v4243_v0, %v6088_v2 }
 0x359   : > { %2318 = vmatmul.mubr.f32.gmra.mrb[72].mxu1 %v6350_v33  ;;  %v1501_v41 = vpop.f32.mrb[44].mxu0 }
 0x35a   : > { %2322 = vmatprep.mubr.f32.mxu1 %v6332_v25  ;;  %v6356_v45 = vmax.f32 %v1722_v19, 0.0  ;;  %v4244_v21 = vadd.f32 %v6120_v52, %v1501_v41  ;;  %v1503_v60 = vpop.f32.mrb[45].mxu0 }
 0x35b   : > { %v6359_v11 = vld [vmem:[#allocation3 + $0xf2] sm:$0xff]  ;;  %v6363_v16 = vld [vmem:[#allocation3 + $0xfa] sm:$0xff] }
 0x35c   : > { %7017 = vst [vmem:[#allocation43_spill] sm:$0xff] %v6356_v45  ;;  %v6361_v6 = vld [vmem:[#allocation3 + $0xf8] sm:$0xff]  ;;  %1883 = vst [vmem:[#allocation3 + $0x111] sm:$0xff] %v6356_v45  ;;  %v1727_v2 = vadd.f32 %v4244_v21, %v6095_v23  ;;  %3734 = vmatprep.mubr.f32.mxu0 %v6359_v11 }
 0x35d   : > { %2323 = vmatmul.mubr.f32.gmra.mrb[74].mxu1 %v6361_v6  ;;  %v1506_v0 = vpop.f32.mrb[46].mxu0  ;;  %3735 = vmatmul.mubr.f32.gmra.mrb[80].mxu0 %v6363_v16 }
 0x35e   : > { %2327 = vmatprep.mubr.f32.mxu1 %v6347_v17  ;;  %v6371_v19 = vmax.f32 %v1727_v2, 0.0  ;;  %v4245_v41 = vadd.f32 %v6120_v52, %v1506_v0  ;;  %v1508_v60 = vpop.f32.mrb[47].mxu0 }
 0x35f   : > { %v6374_v25 = vld [vmem:[#allocation3 + $0x108] sm:$0xff] }
 0x360   : > { %7018 = vst [vmem:[#allocation44_spill] sm:$0xff] %v6371_v19  ;;  %1884 = vst [vmem:[#allocation3 + $0x121] sm:$0xff] %v6371_v19  ;;  %v1732_v23 = vadd.f32 %v4245_v41, %v6093_v59 }
 0x361   : > { %2328 = vmatmul.mubr.f32.gmra.mrb[76].mxu1 %v6374_v25  ;;  %v1511_v21 = vpop.f32.mrb[48].mxu0 }
 0x362   : > { %2332 = vmatprep.mubr.f32.mxu1 %v6356_v45  ;;  %v6380_v31 = vmax.f32 %v1732_v23, 0.0  ;;  %v4246_v17 = vadd.f32 %v6120_v52, %v1511_v21  ;;  %v1513_v2 = vpop.f32.mrb[49].mxu0 }
 0x363   : > { %v6383_v24 = vld [vmem:[#allocation3 + $0x10a] sm:$0xff]  ;;  %v6387_v60 = vld [vmem:[#allocation3 + $0x112] sm:$0xff] }
 0x364   : > { %7019 = vst [vmem:[#allocation45_spill] sm:$0xff] %v6380_v31  ;;  %v6385_v0 = vld [vmem:[#allocation3 + $0x110] sm:$0xff]  ;;  %1885 = vst [vmem:[#allocation3 + $0x129] sm:$0xff] %v6380_v31  ;;  %v1737_v59 = vadd.f32 %v4246_v17, %v6100_v40  ;;  %3737 = vmatprep.mubr.f32.mxu0 %v6383_v24 }
 0x365   : > { %2333 = vmatmul.mubr.f32.gmra.mrb[78].mxu1 %v6385_v0  ;;  %v1516_v41 = vpop.f32.mrb[50].mxu0  ;;  %3738 = vmatmul.mubr.f32.gmra.mrb[82].mxu0 %v6387_v60 }
 0x366   : > { %2337 = vmatprep.mubr.f32.mxu1 %v6371_v19  ;;  %v6395_v23 = vmax.f32 %v1737_v59, 0.0  ;;  %v4247_v21 = vadd.f32 %v6120_v52, %v1516_v41  ;;  %v1518_v2 = vpop.f32.mrb[51].mxu0 }
 0x367   : > { %v6398_v45 = vld [vmem:[#allocation3 + $0x120] sm:$0xff] }
 0x368   : > { %7020 = vst [vmem:[#allocation46_spill] sm:$0xff] %v6395_v23  ;;  %1886 = vst [vmem:[#allocation3 + $0x139] sm:$0xff] %v6395_v23  ;;  %v1742_v40 = vadd.f32 %v4247_v21, %v6098_v15 }
 0x369   : > { %2338 = vmatmul.mubr.f32.gmra.mrb[80].mxu1 %v6398_v45  ;;  %v1521_v17 = vpop.f32.mrb[52].mxu0 }
 0x36a   : > { %2342 = vmatprep.mubr.f32.mxu1 %v6380_v31  ;;  %v6404_v56 = vmax.f32 %v1742_v40, 0.0  ;;  %v4248_v19 = vadd.f32 %v6120_v52, %v1521_v17  ;;  %v1523_v59 = vpop.f32.mrb[53].mxu0 }
 0x36b   : > { %v6407_v28 = vld [vmem:[#allocation3 + $0x122] sm:$0xff]  ;;  %v6411_v2 = vld [vmem:[#allocation3 + $0x12a] sm:$0xff] }
 0x36c   : > { %7021 = vst [vmem:[#allocation47_spill] sm:$0xff] %v6404_v56  ;;  %v6409_v41 = vld [vmem:[#allocation3 + $0x128] sm:$0xff]  ;;  %1887 = vst [vmem:[#allocation3 + $0x141] sm:$0xff] %v6404_v56  ;;  %v1747_v15 = vadd.f32 %v4248_v19, %v6105_v18  ;;  %3740 = vmatprep.mubr.f32.mxu0 %v6407_v28 }
 0x36d   : > { %2343 = vmatmul.mubr.f32.gmra.mrb[82].mxu1 %v6409_v41  ;;  %v1526_v21 = vpop.f32.mrb[54].mxu0  ;;  %3741 = vmatmul.mubr.f32.gmra.mrb[84].mxu0 %v6411_v2 }
 0x36e   : > { %2347 = vmatprep.mubr.f32.mxu1 %v6395_v23  ;;  %v6419_v40 = vmax.f32 %v1747_v15, 0.0  ;;  %v4249_v17 = vadd.f32 %v6120_v52, %v1526_v21  ;;  %v1528_v59 = vpop.f32.mrb[55].mxu0 }
 0x36f   : > { %v6422_v31 = vld [vmem:[#allocation3 + $0x138] sm:$0xff] }
 0x370   : > { %7022 = vst [vmem:[#allocation48_spill] sm:$0xff] %v6419_v40  ;;  %1888 = vst [vmem:[#allocation3 + $0x151] sm:$0xff] %v6419_v40  ;;  %v1752_v18 = vadd.f32 %v4249_v17, %v6103_v35 }
 0x371   : > { %2348 = vmatmul.mubr.f32.gmra.mrb[84].mxu1 %v6422_v31  ;;  %v1531_v19 = vpop.f32.mrb[56].mxu0 }
 0x372   : > { %2352 = vmatprep.mubr.f32.mxu1 %v6404_v56  ;;  %v6428_v14 = vmax.f32 %v1752_v18, 0.0  ;;  %v4250_v23 = vadd.f32 %v6120_v52, %v1531_v19  ;;  %v1533_v15 = vpop.f32.mrb[57].mxu0 }
 0x373   : > { %v6431_v20 = vld [vmem:[#allocation3 + $0x13a] sm:$0xff]  ;;  %v6435_v59 = vld [vmem:[#allocation3 + $0x142] sm:$0xff] }
 0x374   : > { %7023 = vst [vmem:[#allocation49_spill] sm:$0xff] %v6428_v14  ;;  %7024 = vst [vmem:[#allocation50_spill] sm:$0xff] %v6431_v20  ;;  %v6433_v21 = vld [vmem:[#allocation3 + $0x140] sm:$0xff]  ;;  %v1757_v35 = vadd.f32 %v4250_v23, %v6110_v48  ;;  %3743 = vmatprep.mubr.f32.mxu0 %v6431_v20 }
 0x375   : > { %7025 = vst [vmem:[#allocation51_spill] sm:$0xff] %v6435_v59  ;;  %1889 = vst [vmem:[#allocation3 + $0x159] sm:$0xff] %v6428_v14  ;;  %2353 = vmatmul.mubr.f32.gmra.mrb[86].mxu1 %v6433_v21  ;;  %v1536_v17 = vpop.f32.mrb[58].mxu0  ;;  %3744 = vmatmul.mubr.f32.gmra.mrb[86].mxu0 %v6435_v59 }
 0x376   : > { %2357 = vmatprep.mubr.f32.mxu1 %v6419_v40  ;;  %v6443_v18 = vmax.f32 %v1757_v35, 0.0  ;;  %v4251_v19 = vadd.f32 %v6120_v52, %v1536_v17  ;;  %v1538_v15 = vpop.f32.mrb[59].mxu0 }
 0x377   : > { %v6446_v56 = vld [vmem:[#allocation3 + $0x150] sm:$0xff] }
 0x378   : > { %7026 = vst [vmem:[#allocation52_spill] sm:$0xff] %v6443_v18  ;;  %1890 = vst [vmem:[#allocation3 + $0x169] sm:$0xff] %v6443_v18  ;;  %v1762_v48 = vadd.f32 %v4251_v19, %v6108_v22 }
 0x379   : > { %2358 = vmatmul.mubr.f32.gmra.mrb[88].mxu1 %v6446_v56  ;;  %v1541_v23 = vpop.f32.mrb[60].mxu0 }
 0x37a   : > { %2362 = vmatprep.mubr.f32.mxu1 %v6428_v14  ;;  %v6452_v20 = vmax.f32 %v1762_v48, 0.0  ;;  %v4252_v40 = vadd.f32 %v6120_v52, %v1541_v23  ;;  %v1543_v35 = vpop.f32.mrb[61].mxu0 }
 0x37b   : > { %v2067_v35 = vld [vmem:[#allocation9 + $0x208] sm:$0xff] }
 0x37c   : > { %7027 = vst [vmem:[#allocation53_spill] sm:$0xff] %v6452_v20  ;;  %v6455_v59 = vld [vmem:[#allocation3 + $0x158] sm:$0xff]  ;;  %1891 = vst [vmem:[#allocation3 + $0x171] sm:$0xff] %v6452_v20  ;;  %v1767_v17 = vadd.f32 %v4252_v40, %v6115_v32  ;;  %v2066_v40 = vld [vmem:[#allocation9 + $0x200] sm:$0xff] }
 0x37d   : > { %2363 = vmatmul.mubr.f32.gmra.mrb[90].mxu1 %v6455_v59  ;;  %v1546_v15 = vpop.f32.mrb[62].mxu0 }
 0x37e   : > { %2367 = vmatprep.mubr.f32.mxu1 %v6443_v18  ;;  %v6461_v22 = vmax.f32 %v1767_v17, 0.0  ;;  %v4253_v19 = vadd.f32 %v6120_v52, %v1546_v15  ;;  %v1548_v48 = vpop.f32.mrb[63].mxu0  ;;  %v1966_v52 = vld [vmem:[#allocation3 + $0x2] sm:$0xff]  ;;  %v4079_v17 = vpack.c.bf16 %v2067_v35, %v2066_v40  ;;  %v6481_v35 = vld [vmem:[#allocation3 + $0x1a] sm:$0xff] }
 0x37f   : > { %v6464_v14 = vld [vmem:[#allocation3 + $0x168] sm:$0xff]  ;;  %v2068_v15 = vld [vmem:[#allocation9 + $0x210] sm:$0xff] }
 0x380   : > { %7028 = vst [vmem:[#allocation54_spill] sm:$0xff] %v6461_v22  ;;  %1892 = vst [vmem:[#allocation3 + $0x181] sm:$0xff] %v6461_v22  ;;  %v1772_v23 = vadd.f32 %v4253_v19, %v6113_v12  ;;  %v2069_v12 = vld [vmem:[#allocation9 + $0x218] sm:$0xff]  ;;  %v2070_v22 = vld [vmem:[#allocation9 + $0x220] sm:$0xff] }
 0x381   : > { %2368 = vmatmul.mubr.f32.gmra.mrb[92].mxu1 %v6464_v14  ;;  %v1967_v19 = vld [vmem:[#allocation3 + $0xa] sm:$0xff]  ;;  %v4082_v48 = vpack.c.bf16 %v2069_v12, %v2068_v15  ;;  %v6486_v15 = vld [vmem:[#allocation3 + $0x22] sm:$0xff]  ;;  %v2079_v12 = vld [vmem:[#allocation9 + $0x268] sm:$0xff] }
 0x382   : > { %2372 = vmatprep.mubr.f32.mxu1 %v6452_v20  ;;  %v6470_v32 = vmax.f32 %v1772_v23, 0.0  ;;  %v7030_v23 = vmov 0.0|0.0   ;;  %v2071_v20 = vld [vmem:[#allocation9 + $0x228] sm:$0xff]  ;;  %v2073_v40 = vld [vmem:[#allocation9 + $0x238] sm:$0xff] }
 0x383   : > { %v6472_v18 = vld [vmem:[#allocation3 + $0x170] sm:$0xff] }
 0x384   : > { %7029 = vst [vmem:[#allocation55_spill] sm:$0xff] %v6470_v32  ;;  %1893 = vst [vmem:[#allocation3 + $0x189] sm:$0xff] %v6470_v32  ;;  %v4085_v32 = vpack.c.bf16 %v2071_v20, %v2070_v22  ;;  %v2077_v22 = vld [vmem:[#allocation9 + $0x258] sm:$0xff] }
 0x385   : > { %2373 = vmatmul.mubr.f32.gmra.mrb[94].mxu1 %v6472_v18 }
 0x386   : > { %2442 = vmatprep.mubr.f32.mxu1 %v6140_v27  ;;  %v2072_v27 = vld [vmem:[#allocation9 + $0x230] sm:$0xff] }
 0x389   : > { %2443 = vmatmul.mubr.f32.vlgmr.msra.gmra.mrb[32].mxu1 %v1966_v52  ;;  %v2074_v52 = vld [vmem:[#allocation9 + $0x240] sm:$0xff] }
 0x38a   : > { %2447 = vmatprep.mubr.f32.mxu1 %v6149_v61  ;;  %4080 = vmatpush1.bf16.msra.mxu1 %v4079_v17  ;;  %v4088_v61 = vpack.c.bf16 %v2073_v40, %v2072_v27  ;;  %v2075_v17 = vld [vmem:[#allocation9 + $0x248] sm:$0xff]  ;;  %v2082_v27 = vld [vmem:[#allocation9 + $0x280] sm:$0xff] }
 0x38b   : > { %4081 = vmatprep.subr.bf16.mxu1 %v7030_v23  ;;  %v4091_v20 = vpack.c.bf16 %v2075_v17, %v2074_v52  ;;  %v2083_v40 = vld [vmem:[#allocation9 + $0x288] sm:$0xff]  ;;  %v2085_v52 = vld [vmem:[#allocation9 + $0x298] sm:$0xff]  ;;  %v2086_v17 = vld [vmem:[#allocation9 + $0x2a0] sm:$0xff] }
 0x38d   : > { %2448 = vmatmul.mubr.f32.gmra.mrb[34].mxu1 %v1967_v19  ;;  %v2080_v19 = vld [vmem:[#allocation9 + $0x270] sm:$0xff] }
 0x38e   : > { %2452 = vmatprep.mubr.f32.mxu1 %v6158_v8  ;;  %4083 = vmatpush1.bf16.msra.mxu1 %v4082_v48  ;;  %v2076_v8 = vld [vmem:[#allocation9 + $0x250] sm:$0xff]  ;;  %v2081_v48 = vld [vmem:[#allocation9 + $0x278] sm:$0xff] }
 0x38f   : > { %4084 = vmatprep.subr.bf16.mxu1 %v7030_v23 }
 0x391   : > { %2453 = vmatmul.mubr.f32.gmra.mrb[36].mxu1 %v6481_v35 }
 0x392   : > { %2457 = vmatprep.mubr.f32.mxu1 %v6169_v58  ;;  %4086 = vmatpush1.bf16.msra.mxu1 %v4085_v32  ;;  %v4094_v58 = vpack.c.bf16 %v2077_v22, %v2076_v8  ;;  %v2078_v32 = vld [vmem:[#allocation9 + $0x260] sm:$0xff]  ;;  %v2088_v8 = vld [vmem:[#allocation9 + $0x2b0] sm:$0xff]  ;;  %v2089_v22 = vld [vmem:[#allocation9 + $0x2b8] sm:$0xff] }
 0x393   : > { %4087 = vmatprep.subr.bf16.mxu1 %v7030_v23 }
 0x395   : > { %2458 = vmatmul.mubr.f32.gmra.mrb[38].mxu1 %v6486_v15 }
 0x396   : > { %2462 = vmatprep.mubr.f32.mxu1 %v6182_v54  ;;  %4089 = vmatpush1.bf16.msra.mxu1 %v4088_v61  ;;  %v4097_v54 = vpack.c.bf16 %v2079_v12, %v2078_v32  ;;  %v2084_v61 = vld [vmem:[#allocation9 + $0x290] sm:$0xff]  ;;  %v2091_v32 = vld [vmem:[#allocation9 + $0x2c8] sm:$0xff] }
 0x397   : > { %4090 = vmatprep.subr.bf16.mxu1 %v7030_v23  ;;  %v2092_v12 = vld [vmem:[#allocation9 + $0x2d0] sm:$0xff] }
 0x399   : > { %2463 = vmatmul.mubr.f32.gmra.mrb[40].mxu1 %v6167_v30 }
 0x39a   : > { %2467 = vmatprep.mubr.f32.mxu1 %v6193_v26  ;;  %4092 = vmatpush1.bf16.msra.mxu1 %v4091_v20  ;;  %v4100_v26 = vpack.c.bf16 %v2081_v48, %v2080_v19  ;;  %v2087_v20 = vld [vmem:[#allocation9 + $0x2a8] sm:$0xff]  ;;  %v2094_v19 = vld [vmem:[#allocation9 + $0x2e0] sm:$0xff] }
 0x39b   : > { %4093 = vmatprep.subr.bf16.mxu1 %v7030_v23  ;;  %v2095_v48 = vld [vmem:[#allocation9 + $0x2e8] sm:$0xff] }
 0x39d   : > { %2468 = vmatmul.mubr.f32.gmra.mrb[42].mxu1 %v6171_v36 }
 0x39e   : > { %2472 = vmatprep.mubr.f32.mxu1 %v6206_v9  ;;  %4095 = vmatpush1.bf16.msra.mxu1 %v4094_v58  ;;  %v4103_v9 = vpack.c.bf16 %v2083_v40, %v2082_v27  ;;  %v2090_v58 = vld [vmem:[#allocation9 + $0x2c0] sm:$0xff]  ;;  %v2097_v27 = vld [vmem:[#allocation9 + $0x2f8] sm:$0xff] }
 0x39f   : > { %4096 = vmatprep.subr.bf16.mxu1 %v7030_v23 }
 0x3a1   : > { %2473 = vmatmul.mubr.f32.gmra.mrb[44].mxu1 %v6191_v55 }
 0x3a2   : > { %2477 = vmatprep.mubr.f32.mxu1 %v6217_v50  ;;  %4098 = vmatpush1.bf16.msra.mxu1 %v4097_v54  ;;  %v4106_v50 = vpack.c.bf16 %v2085_v52, %v2084_v61  ;;  %v2093_v54 = vld [vmem:[#allocation9 + $0x2d8] sm:$0xff]  ;;  %v6555_v61 = vld [vmem:[#allocation3 + $0x152] sm:$0xff] }
 0x3a3   : > { %4099 = vmatprep.subr.bf16.mxu1 %v7030_v23 }
 0x3a5   : > { %2478 = vmatmul.mubr.f32.gmra.mrb[46].mxu1 %v6195_v1 }
 0x3a6   : > { %2482 = vmatprep.mubr.f32.mxu1 %v6230_v3  ;;  %4101 = vmatpush1.bf16.msra.mxu1 %v4100_v26  ;;  %v4109_v3 = vpack.c.bf16 %v2087_v20, %v2086_v17  ;;  %v2096_v26 = vld [vmem:[#allocation9 + $0x2f0] sm:$0xff] }
 0x3a7   : > { %4102 = vmatprep.subr.bf16.mxu1 %v7030_v23  ;;  %v6563_v17 = vld [vmem:[#allocation3 + $0x15a] sm:$0xff] }
 0x3a8   : > { %v6566_v20 = vld [vmem:[#allocation3 + $0x180] sm:$0xff] }
 0x3a9   : > { %2483 = vmatmul.mubr.f32.gmra.mrb[48].mxu1 %v6215_v46 }
 0x3aa   : > { %2487 = vmatprep.mubr.f32.mxu1 %v6241_v7  ;;  %4104 = vmatpush1.bf16.msra.mxu1 %v4103_v9  ;;  %v4112_v7 = vpack.c.bf16 %v2089_v22, %v2088_v8  ;;  %v7032_v9 = vld [vmem:[#allocation51_spill] sm:$0xff]  ;;  %v6574_v22 = vld [vmem:[#allocation3 + $0x188] sm:$0xff] }
 0x3ab   : > { %4105 = vmatprep.subr.bf16.mxu1 %v7030_v23 }
 0x3ad   : > { %2488 = vmatmul.mubr.f32.gmra.mrb[50].mxu1 %v6219_v49 }
 0x3ae   : > { %2492 = vmatprep.mubr.f32.mxu1 %v6254_v47  ;;  %4107 = vmatpush1.bf16.msra.mxu1 %v4106_v50  ;;  %v4115_v47 = vpack.c.bf16 %v2091_v32, %v2090_v58  ;;  %v2098_v58 = vld [vmem:[#allocation9 + $0x300] sm:$0xff]  ;;  %v2099_v32 = vld [vmem:[#allocation9 + $0x308] sm:$0xff] }
 0x3af   : > { %4108 = vmatprep.subr.bf16.mxu1 %v7030_v23 }
 0x3b1   : > { %2493 = vmatmul.mubr.f32.gmra.mrb[52].mxu1 %v6239_v57 }
 0x3b2   : > { %2497 = vmatprep.mubr.f32.mxu1 %v6265_v42  ;;  %4110 = vmatpush1.bf16.msra.mxu1 %v4109_v3  ;;  %v4118_v42 = vpack.c.bf16 %v2093_v54, %v2092_v12  ;;  %v6569_v3 = vld [vmem:[#allocation3 + $0x16a] sm:$0xff]  ;;  %v4127_v12 = vpack.c.bf16 %v2099_v32, %v2098_v58  ;;  %v2100_v54 = vld [vmem:[#allocation9 + $0x310] sm:$0xff] }
 0x3b3   : > { %4111 = vmatprep.subr.bf16.mxu1 %v7030_v23  ;;  %v2104_v58 = vld [vmem:[#allocation9 + $0x330] sm:$0xff]  ;;  %v2105_v32 = vld [vmem:[#allocation9 + $0x338] sm:$0xff] }
 0x3b5   : > { %2498 = vmatmul.mubr.f32.gmra.mrb[54].mxu1 %v6243_v13 }
 0x3b6   : > { %2502 = vmatprep.mubr.f32.mxu1 %v6278_v38  ;;  %4113 = vmatpush1.bf16.msra.mxu1 %v4112_v7  ;;  %v4121_v38 = vpack.c.bf16 %v2095_v48, %v2094_v19  ;;  %v7035_v48 = vld [vmem:[#allocation22_spill] sm:$0xff] }
 0x3b7   : > { %4114 = vmatprep.subr.bf16.mxu1 %v7030_v23 }
 0x3b9   : > { %2503 = vmatmul.mubr.f32.gmra.mrb[56].mxu1 %v6263_v5 }
 0x3ba   : > { %2507 = vmatprep.mubr.f32.mxu1 %v6289_v37  ;;  %4116 = vmatpush1.bf16.msra.mxu1 %v4115_v47  ;;  %v4124_v37 = vpack.c.bf16 %v2097_v27, %v2096_v26  ;;  %v6579_v47 = vld [vmem:[#allocation3 + $0x172] sm:$0xff] }
 0x3bb   : > { %4117 = vmatprep.subr.bf16.mxu1 %v7030_v23  ;;  %v2102_v27 = vld [vmem:[#allocation9 + $0x320] sm:$0xff] }
 0x3bd   : > { %2508 = vmatmul.mubr.f32.gmra.mrb[58].mxu1 %v6267_v53 }
 0x3be   : > { %2512 = vmatprep.mubr.f32.mxu1 %v6302_v63  ;;  %4119 = vmatpush1.bf16.msra.mxu1 %v4118_v42  ;;  %v2101_v42 = vld [vmem:[#allocation9 + $0x318] sm:$0xff] }
 0x3bf   : > { %4120 = vmatprep.subr.bf16.mxu1 %v7030_v23  ;;  %v4130_v26 = vpack.c.bf16 %v2101_v42, %v2100_v54  ;;  %v7038_v54 = vld [vmem:[#allocation25_spill] sm:$0xff] }
 0x3c1   : > { %2513 = vmatmul.mubr.f32.gmra.mrb[60].mxu1 %v6287_v43 }
 0x3c2   : > { %2517 = vmatprep.mubr.f32.mxu1 %v6313_v29  ;;  %4122 = vmatpush1.bf16.msra.mxu1 %v4121_v38  ;;  %v7031_v29 = vld [vmem:[#allocation50_spill] sm:$0xff] }
 0x3c3   : > { %4123 = vmatprep.subr.bf16.mxu1 %v7030_v23 }
 0x3c5   : > { %2518 = vmatmul.mubr.f32.gmra.mrb[62].mxu1 %v6291_v39 }
 0x3c6   : > { %2522 = vmatprep.mubr.f32.mxu1 %v6326_v4  ;;  %4125 = vmatpush1.bf16.msra.mxu1 %v4124_v37  ;;  %v2103_v37 = vld [vmem:[#allocation9 + $0x328] sm:$0xff] }
 0x3c7   : > { %4126 = vmatprep.subr.bf16.mxu1 %v7030_v23 }
 0x3c9   : > { %2523 = vmatmul.mubr.f32.gmra.mrb[64].mxu1 %v6311_v44 }
 0x3ca   : > { %2527 = vmatprep.mubr.f32.mxu1 %v6337_v62 }
 0x3cd   : > { %2528 = vmatmul.mubr.f32.gmra.mrb[66].mxu1 %v6315_v10 }
 0x3ce   : > { %2532 = vmatprep.mubr.f32.mxu1 %v6350_v33 }
 0x3d1   : > { %2533 = vmatmul.mubr.f32.gmra.mrb[68].mxu1 %v6335_v51 }
 0x3d2   : > { %2537 = vmatprep.mubr.f32.mxu1 %v6361_v6 }
 0x3d5   : > { %2538 = vmatmul.mubr.f32.gmra.mrb[70].mxu1 %v6339_v34 }
 0x3d6   : > { %2542 = vmatprep.mubr.f32.mxu1 %v6374_v25 }
 0x3d9   : > { %2543 = vmatmul.mubr.f32.gmra.mrb[72].mxu1 %v6359_v11 }
 0x3da   : > { %2547 = vmatprep.mubr.f32.mxu1 %v6385_v0 }
 0x3dd   : > { %2548 = vmatmul.mubr.f32.gmra.mrb[74].mxu1 %v6363_v16 }
 0x3de   : > { %2552 = vmatprep.mubr.f32.mxu1 %v6398_v45 }
 0x3e1   : > { %2553 = vmatmul.mubr.f32.gmra.mrb[76].mxu1 %v6383_v24 }
 0x3e2   : > { %2557 = vmatprep.mubr.f32.mxu1 %v6409_v41 }
 0x3e5   : > { %2558 = vmatmul.mubr.f32.gmra.mrb[78].mxu1 %v6387_v60 }
 0x3e6   : > { %2562 = vmatprep.mubr.f32.mxu1 %v6422_v31 }
 0x3e9   : > { %2563 = vmatmul.mubr.f32.gmra.mrb[80].mxu1 %v6407_v28 }
 0x3ea   : > { %2567 = vmatprep.mubr.f32.mxu1 %v6433_v21 }
 0x3ed   : > { %2568 = vmatmul.mubr.f32.gmra.mrb[82].mxu1 %v6411_v2 }
 0x3ee   : > { %2572 = vmatprep.mubr.f32.mxu1 %v6446_v56 }
 0x3f0   : > { %v6547_v63 = vpop.f32.mrb[64].mxu0 }
 0x3f1   : > { %2573 = vmatmul.mubr.f32.gmra.mrb[84].mxu1 %v7031_v29  ;;  %v6550_v40 = vpop.f32.mrb[65].mxu0 }
 0x3f2   : > { %2577 = vmatprep.mubr.f32.mxu1 %v6455_v59 }
 0x3f5   : > { %2578 = vmatmul.mubr.f32.gmra.mrb[86].mxu1 %v7032_v9 }
 0x3f6   : > { %2582 = vmatprep.mubr.f32.mxu1 %v6464_v14 }
 0x3f8   : > { %v6557_v52 = vpop.f32.mrb[66].mxu0 }
 0x3f9   : > { %2583 = vmatmul.mubr.f32.gmra.mrb[88].mxu1 %v6555_v61  ;;  %v6560_v50 = vpop.f32.mrb[67].mxu0 }
 0x3fa   : > { %2587 = vmatprep.mubr.f32.mxu1 %v6472_v18 }
 0x3fd   : > { %2588 = vmatmul.mubr.f32.gmra.mrb[90].mxu1 %v6563_v17 }
 0x3fe   : > { %2592 = vmatprep.mubr.f32.mxu1 %v6566_v20 }
 0x400   : > { %v6571_v8 = vpop.f32.mrb[68].mxu0 }
 0x401   : > { %7033 = vst [vmem:[#allocation50_spill] sm:$0xff] %v6571_v8  ;;  %2593 = vmatmul.mubr.f32.gmra.mrb[92].mxu1 %v6569_v3  ;;  %v6576_v7 = vpop.f32.mrb[69].mxu0  ;;  %v7036_v8 = vld [vmem:[#allocation23_spill] sm:$0xff] }
 0x402   : > { %2597 = vmatprep.mubr.f32.mxu1 %v6574_v22 }
 0x405   : > { %2598 = vmatmul.mubr.f32.gmra.mrb[94].mxu1 %v6579_v47 }
 0x406   : > { %2667 = vmatprep.mubr.f32.mxu1 %v6481_v35  ;;  %v4133_v35 = vpack.c.bf16 %v2103_v37, %v2102_v27  ;;  %v7039_v37 = vld [vmem:[#allocation26_spill] sm:$0xff] }
 0x408   : > { %v6583_v19 = vpop.f32.mrb[70].mxu0 }
 0x409   : > { %7034 = vst [vmem:[#allocation51_spill] sm:$0xff] %v6583_v19  ;;  %2668 = vmatmul.mubr.f32.vlgmr.msra.gmra.mrb[32].mxu1 %v7035_v48  ;;  %v6586_v38 = vpop.f32.mrb[71].mxu0  ;;  %v7037_v19 = vld [vmem:[#allocation24_spill] sm:$0xff] }
 0x40a   : > { %2672 = vmatprep.mubr.f32.mxu1 %v6486_v15  ;;  %4128 = vmatpush1.bf16.msra.mxu1 %v4127_v12  ;;  %v4136_v12 = vpack.c.bf16 %v2105_v32, %v2104_v58  ;;  %v2110_v58 = vld [vmem:[#allocation9 + $0x360] sm:$0xff]  ;;  %v7040_v32 = vld [vmem:[#allocation27_spill] sm:$0xff] }
 0x40b   : > { %4129 = vmatprep.subr.bf16.mxu1 %v7030_v23 }
 0x40d   : > { %2673 = vmatmul.mubr.f32.gmra.mrb[34].mxu1 %v7036_v8  ;;  %v2106_v8 = vld [vmem:[#allocation9 + $0x340] sm:$0xff] }
 0x40e   : > { %2677 = vmatprep.mubr.f32.mxu1 %v6167_v30  ;;  %4131 = vmatpush1.bf16.msra.mxu1 %v4130_v26  ;;  %v2107_v30 = vld [vmem:[#allocation9 + $0x348] sm:$0xff]  ;;  %v2108_v26 = vld [vmem:[#allocation9 + $0x350] sm:$0xff] }
 0x40f   : > { %4132 = vmatprep.subr.bf16.mxu1 %v7030_v23  ;;  %v4139_v42 = vpack.c.bf16 %v2107_v30, %v2106_v8  ;;  %v2112_v8 = vld [vmem:[#allocation9 + $0x370] sm:$0xff]  ;;  %v2113_v30 = vld [vmem:[#allocation9 + $0x378] sm:$0xff] }
 0x410   : > { %v6593_v48 = vpop.f32.mrb[72].mxu0 }
 0x411   : > { %2678 = vmatmul.mubr.f32.gmra.mrb[36].mxu1 %v7037_v19  ;;  %v6596_v15 = vpop.f32.mrb[73].mxu0  ;;  %v2109_v19 = vld [vmem:[#allocation9 + $0x358] sm:$0xff] }
 0x412   : > { %2682 = vmatprep.mubr.f32.mxu1 %v6171_v36  ;;  %4134 = vmatpush1.bf16.msra.mxu1 %v4133_v35  ;;  %v4142_v35 = vpack.c.bf16 %v2109_v19, %v2108_v26  ;;  %v2114_v26 = vld [vmem:[#allocation9 + $0x380] sm:$0xff]  ;;  %v7042_v19 = vld [vmem:[#allocation29_spill] sm:$0xff] }
 0x413   : > { %4135 = vmatprep.subr.bf16.mxu1 %v7030_v23 }
 0x415   : > { %2683 = vmatmul.mubr.f32.gmra.mrb[38].mxu1 %v7038_v54 }
 0x416   : > { %2687 = vmatprep.mubr.f32.mxu1 %v6191_v55  ;;  %4137 = vmatpush1.bf16.msra.mxu1 %v4136_v12  ;;  %v2111_v55 = vld [vmem:[#allocation9 + $0x368] sm:$0xff] }
 0x417   : > { %4138 = vmatprep.subr.bf16.mxu1 %v7030_v23  ;;  %v4145_v12 = vpack.c.bf16 %v2111_v55, %v2110_v58  ;;  %v2116_v58 = vld [vmem:[#allocation9 + $0x390] sm:$0xff]  ;;  %v2117_v55 = vld [vmem:[#allocation9 + $0x398] sm:$0xff] }
 0x418   : > { %v6603_v27 = vpop.f32.mrb[74].mxu0 }
 0x419   : > { %2688 = vmatmul.mubr.f32.gmra.mrb[40].mxu1 %v7039_v37  ;;  %v6606_v36 = vpop.f32.mrb[75].mxu0  ;;  %v7041_v37 = vld [vmem:[#allocation28_spill] sm:$0xff] }
 0x41a   : > { %2692 = vmatprep.mubr.f32.mxu1 %v6195_v1  ;;  %4140 = vmatpush1.bf16.msra.mxu1 %v4139_v42  ;;  %v4148_v42 = vpack.c.bf16 %v2113_v30, %v2112_v8  ;;  %v2118_v8 = vld [vmem:[#allocation9 + $0x3a0] sm:$0xff]  ;;  %v7044_v30 = vld [vmem:[#allocation31_spill] sm:$0xff] }
 0x41b   : > { %4141 = vmatprep.subr.bf16.mxu1 %v7030_v23 }
 0x41d   : > { %2693 = vmatmul.mubr.f32.gmra.mrb[42].mxu1 %v7040_v32 }
 0x41e   : > { %2697 = vmatprep.mubr.f32.mxu1 %v6215_v46  ;;  %4143 = vmatpush1.bf16.msra.mxu1 %v4142_v35  ;;  %v2115_v46 = vld [vmem:[#allocation9 + $0x388] sm:$0xff] }
 0x41f   : > { %4144 = vmatprep.subr.bf16.mxu1 %v7030_v23  ;;  %v4151_v35 = vpack.c.bf16 %v2115_v46, %v2114_v26  ;;  %v2120_v26 = vld [vmem:[#allocation9 + $0x3b0] sm:$0xff]  ;;  %v2121_v46 = vld [vmem:[#allocation9 + $0x3b8] sm:$0xff] }
 0x420   : > { %v6613_v54 = vpop.f32.mrb[76].mxu0 }
 0x421   : > { %2698 = vmatmul.mubr.f32.gmra.mrb[44].mxu1 %v7041_v37  ;;  %v6616_v1 = vpop.f32.mrb[77].mxu0  ;;  %v7043_v37 = vld [vmem:[#allocation30_spill] sm:$0xff] }
 0x422   : > { %2702 = vmatprep.mubr.f32.mxu1 %v6219_v49  ;;  %4146 = vmatpush1.bf16.msra.mxu1 %v4145_v12  ;;  %v4154_v12 = vpack.c.bf16 %v2117_v55, %v2116_v58  ;;  %v2122_v58 = vld [vmem:[#allocation9 + $0x3c0] sm:$0xff]  ;;  %v7046_v55 = vld [vmem:[#allocation33_spill] sm:$0xff] }
 0x423   : > { %4147 = vmatprep.subr.bf16.mxu1 %v7030_v23 }
 0x425   : > { %2703 = vmatmul.mubr.f32.gmra.mrb[46].mxu1 %v7042_v19 }
 0x426   : > { %2707 = vmatprep.mubr.f32.mxu1 %v6239_v57  ;;  %4149 = vmatpush1.bf16.msra.mxu1 %v4148_v42  ;;  %v2119_v57 = vld [vmem:[#allocation9 + $0x3a8] sm:$0xff] }
 0x427   : > { %4150 = vmatprep.subr.bf16.mxu1 %v7030_v23  ;;  %v4157_v42 = vpack.c.bf16 %v2119_v57, %v2118_v8  ;;  %v2124_v8 = vld [vmem:[#allocation9 + $0x3d0] sm:$0xff]  ;;  %v2125_v57 = vld [vmem:[#allocation9 + $0x3d8] sm:$0xff] }
 0x428   : > { %v6623_v32 = vpop.f32.mrb[78].mxu0 }
 0x429   : > { %2708 = vmatmul.mubr.f32.gmra.mrb[48].mxu1 %v7043_v37  ;;  %v6626_v49 = vpop.f32.mrb[79].mxu0  ;;  %v7045_v37 = vld [vmem:[#allocation32_spill] sm:$0xff] }
 0x42a   : > { %2712 = vmatprep.mubr.f32.mxu1 %v6243_v13  ;;  %4152 = vmatpush1.bf16.msra.mxu1 %v4151_v35  ;;  %v4160_v35 = vpack.c.bf16 %v2121_v46, %v2120_v26  ;;  %v2126_v26 = vld [vmem:[#allocation9 + $0x3e0] sm:$0xff]  ;;  %v7049_v46 = vld [vmem:[#allocation35_spill] sm:$0xff] }
 0x42b   : > { %4153 = vmatprep.subr.bf16.mxu1 %v7030_v23 }
 0x42d   : > { %2713 = vmatmul.mubr.f32.gmra.mrb[50].mxu1 %v7044_v30 }
 0x42e   : > { %2717 = vmatprep.mubr.f32.mxu1 %v6263_v5  ;;  %4155 = vmatpush1.bf16.msra.mxu1 %v4154_v12  ;;  %v2123_v5 = vld [vmem:[#allocation9 + $0x3c8] sm:$0xff] }
 0x42f   : > { %4156 = vmatprep.subr.bf16.mxu1 %v7030_v23  ;;  %v4163_v12 = vpack.c.bf16 %v2123_v5, %v2122_v58  ;;  %v2128_v58 = vld [vmem:[#allocation9 + $0x3f0] sm:$0xff]  ;;  %v2129_v5 = vld [vmem:[#allocation9 + $0x3f8] sm:$0xff] }
 0x430   : > { %v6633_v19 = vpop.f32.mrb[80].mxu0 }
 0x431   : > { %2718 = vmatmul.mubr.f32.gmra.mrb[52].mxu1 %v7045_v37  ;;  %v6636_v13 = vpop.f32.mrb[81].mxu0  ;;  %v7048_v37 = vld [vmem:[#allocation34_spill] sm:$0xff] }
 0x432   : > { %2722 = vmatprep.mubr.f32.mxu1 %v6267_v53  ;;  %4158 = vmatpush1.bf16.msra.mxu1 %v4157_v42  ;;  %v4166_v42 = vpack.c.bf16 %v2125_v57, %v2124_v8  ;;  %v7053_v8 = vld [vmem:[#allocation37_spill] sm:$0xff] }
 0x433   : > { %4159 = vmatprep.subr.bf16.mxu1 %v7030_v23 }
 0x435   : > { %2723 = vmatmul.mubr.f32.gmra.mrb[54].mxu1 %v7046_v55 }
 0x436   : > { %2727 = vmatprep.mubr.f32.mxu1 %v6287_v43  ;;  %4161 = vmatpush1.bf16.msra.mxu1 %v4160_v35  ;;  %v2127_v43 = vld [vmem:[#allocation9 + $0x3e8] sm:$0xff] }
 0x437   : > { %4162 = vmatprep.subr.bf16.mxu1 %v7030_v23  ;;  %v4169_v35 = vpack.c.bf16 %v2127_v43, %v2126_v26  ;;  %v7061_v43 = vld [vmem:[#allocation42_spill] sm:$0xff] }
 0x438   : > { %v6643_v30 = vpop.f32.mrb[82].mxu0 }
 0x439   : > { %7047 = vst [vmem:[#allocation22_spill] sm:$0xff] %v6643_v30  ;;  %2728 = vmatmul.mubr.f32.gmra.mrb[56].mxu1 %v7048_v37  ;;  %v6646_v53 = vpop.f32.mrb[83].mxu0  ;;  %v7051_v37 = vld [vmem:[#allocation36_spill] sm:$0xff] }
 0x43a   : > { %2732 = vmatprep.mubr.f32.mxu1 %v6291_v39  ;;  %4164 = vmatpush1.bf16.msra.mxu1 %v4163_v12  ;;  %v4172_v12 = vpack.c.bf16 %v2129_v5, %v2128_v58  ;;  %v6698_v58 = vld [vmem:[#allocation3 + $0x18a] sm:$0xff]  ;;  %v7072_v5 = vld [vmem:[#allocation55_spill] sm:$0xff]  ;;  %v4828_v30 = vld [vmem:[#allocation3 + $0xc1] sm:$0xff] }
 0x43b   : > { %4165 = vmatprep.subr.bf16.mxu1 %v7030_v23 }
 0x43d   : > { %2733 = vmatmul.mubr.f32.gmra.mrb[58].mxu1 %v7049_v46  ;;  %v7062_v46 = vld [vmem:[#allocation43_spill] sm:$0xff] }
 0x43e   : > { %2737 = vmatprep.mubr.f32.mxu1 %v6311_v44  ;;  %4167 = vmatpush1.bf16.msra.mxu1 %v4166_v42  ;;  %v7054_v44 = vld [vmem:[#allocation14_spill] sm:$0xff] }
 0x43f   : > { %4168 = vmatprep.subr.bf16.mxu1 %v7030_v23  ;;  %v7056_v42 = vld [vmem:[#allocation38_spill] sm:$0xff] }
 0x440   : > { %v6653_v55 = vpop.f32.mrb[84].mxu0 }
 0x441   : > { %7050 = vst [vmem:[#allocation23_spill] sm:$0xff] %v6653_v55  ;;  %2738 = vmatmul.mubr.f32.gmra.mrb[60].mxu1 %v7051_v37  ;;  %v6656_v39 = vpop.f32.mrb[85].mxu0  ;;  %v4804_v37 = vld [vmem:[#allocation3 + $0x31] sm:$0xff]  ;;  %v4809_v55 = vld [vmem:[#allocation3 + $0x48] sm:$0xff] }
 0x442   : > { %7052 = vst [vmem:[#allocation24_spill] sm:$0xff] %v6656_v39  ;;  %2742 = vmatprep.mubr.f32.mxu1 %v6315_v10  ;;  %4170 = vmatpush1.bf16.msra.mxu1 %v4169_v35  ;;  %v7058_v10 = vld [vmem:[#allocation39_spill] sm:$0xff]  ;;  %v6694_v35 = vld [vmem:[#allocation3 + $0x182] sm:$0xff] }
 0x443   : > { %4171 = vmatprep.subr.bf16.mxu1 %v7030_v23  ;;  %v7059_v23 = vld [vmem:[#allocation40_spill] sm:$0xff]  ;;  %v4810_v39 = vld [vmem:[#allocation3 + $0x51] sm:$0xff] }
 0x445   : > { %2743 = vmatmul.mubr.f32.gmra.mrb[62].mxu1 %v7053_v8  ;;  %v4806_v8 = vld [vmem:[#allocation3 + $0x39] sm:$0xff] }
 0x446   : > { %2747 = vmatprep.mubr.f32.mxu1 %v6335_v51  ;;  %4173 = vmatpush1.bf16.msra.mxu1 %v4172_v12  ;;  %v7060_v51 = vld [vmem:[#allocation41_spill] sm:$0xff]  ;;  %v4805_v12 = vld [vmem:[#allocation3 + $0x30] sm:$0xff] }
 0x447   : > { %4206 = vmatprep.subr.bf16.mxu1 %v7054_v44 }
 0x448   : > { %v6663_v57 = vpop.f32.mrb[86].mxu0 }
 0x449   : > { %7055 = vst [vmem:[#allocation25_spill] sm:$0xff] %v6663_v57  ;;  %2748 = vmatmul.mubr.f32.gmra.mrb[64].mxu1 %v7056_v42  ;;  %v6666_v26 = vpop.f32.mrb[87].mxu0  ;;  %v7073_v42 = vld [vmem:[#allocation15_spill] sm:$0xff]  ;;  %v4808_v57 = vld [vmem:[#allocation3 + $0x49] sm:$0xff] }
 0x44a   : > { %7057 = vst [vmem:[#allocation26_spill] sm:$0xff] %v6666_v26  ;;  %2752 = vmatprep.mubr.f32.mxu1 %v6339_v34  ;;  %v7063_v34 = vld [vmem:[#allocation44_spill] sm:$0xff] }
 0x44b   : > { %v7074_v26 = vld [vmem:[#allocation16_spill] sm:$0xff] }
 0x44d   : > { %2753 = vmatmul.mubr.f32.gmra.mrb[66].mxu1 %v7058_v10  ;;  %v4807_v10 = vld [vmem:[#allocation3 + $0x38] sm:$0xff] }
 0x44e   : > { %2757 = vmatprep.mubr.f32.mxu1 %v6359_v11  ;;  %v7064_v11 = vld [vmem:[#allocation45_spill] sm:$0xff] }
 0x451   : > { %2758 = vmatmul.mubr.f32.gmra.mrb[68].mxu1 %v7059_v23 }
 0x452   : > { %2762 = vmatprep.mubr.f32.mxu1 %v6363_v16  ;;  %v7065_v16 = vld [vmem:[#allocation46_spill] sm:$0xff] }
 0x455   : > { %2763 = vmatmul.mubr.f32.gmra.mrb[70].mxu1 %v7060_v51 }
 0x456   : > { %2767 = vmatprep.mubr.f32.mxu1 %v6383_v24  ;;  %v7066_v24 = vld [vmem:[#allocation47_spill] sm:$0xff] }
 0x459   : > { %2768 = vmatmul.mubr.f32.gmra.mrb[72].mxu1 %v7061_v43 }
 0x45a   : > { %2772 = vmatprep.mubr.f32.mxu1 %v6387_v60  ;;  %v7067_v60 = vld [vmem:[#allocation48_spill] sm:$0xff] }
 0x45d   : > { %2773 = vmatmul.mubr.f32.gmra.mrb[74].mxu1 %v7062_v46 }
 0x45e   : > { %2777 = vmatprep.mubr.f32.mxu1 %v6407_v28  ;;  %v7068_v28 = vld [vmem:[#allocation49_spill] sm:$0xff] }
 0x461   : > { %2778 = vmatmul.mubr.f32.gmra.mrb[76].mxu1 %v7063_v34 }
 0x462   : > { %2782 = vmatprep.mubr.f32.mxu1 %v6411_v2  ;;  %v7069_v2 = vld [vmem:[#allocation52_spill] sm:$0xff] }
 0x465   : > { %2783 = vmatmul.mubr.f32.gmra.mrb[78].mxu1 %v7064_v11 }
 0x466   : > { %2787 = vmatprep.mubr.f32.mxu1 %v7031_v29  ;;  %v7070_v29 = vld [vmem:[#allocation53_spill] sm:$0xff] }
 0x469   : > { %2788 = vmatmul.mubr.f32.gmra.mrb[80].mxu1 %v7065_v16 }
 0x46a   : > { %2792 = vmatprep.mubr.f32.mxu1 %v7032_v9  ;;  %v7071_v9 = vld [vmem:[#allocation54_spill] sm:$0xff] }
 0x46d   : > { %2793 = vmatmul.mubr.f32.gmra.mrb[82].mxu1 %v7066_v24 }
 0x46e   : > { %2797 = vmatprep.mubr.f32.mxu1 %v6555_v61 }
 0x471   : > { %2798 = vmatmul.mubr.f32.gmra.mrb[84].mxu1 %v7067_v60 }
 0x472   : > { %2802 = vmatprep.mubr.f32.mxu1 %v6563_v17 }
 0x475   : > { %2803 = vmatmul.mubr.f32.gmra.mrb[86].mxu1 %v7068_v28 }
 0x476   : > { %2807 = vmatprep.mubr.f32.mxu1 %v6569_v3 }
 0x479   : > { %2808 = vmatmul.mubr.f32.gmra.mrb[88].mxu1 %v7069_v2 }
 0x47a   : > { %2812 = vmatprep.mubr.f32.mxu1 %v6579_v47 }
 0x47d   : > { %2813 = vmatmul.mubr.f32.gmra.mrb[90].mxu1 %v7070_v29 }
 0x47e   : > { %2817 = vmatprep.mubr.f32.mxu1 %v6694_v35 }
 0x481   : > { %2818 = vmatmul.mubr.f32.gmra.mrb[92].mxu1 %v7071_v9 }
 0x482   : > { %2822 = vmatprep.mubr.f32.mxu1 %v6698_v58 }
 0x485   : > { %2823 = vmatmul.mubr.f32.gmra.mrb[94].mxu1 %v7072_v5 }
 0x486   : > { %2892 = vmatprep.mubr.f32.mxu1 %v4804_v37  ;;  %v7075_v37 = vld [vmem:[#allocation17_spill] sm:$0xff] }
 0x489   : > { %2893 = vmatmul.mubr.f32.vlgmr.msra.gmra.mrb[32].mxu1 %v4805_v12  ;;  %v4811_v12 = vld [vmem:[#allocation3 + $0x50] sm:$0xff] }
 0x48a   : > { %2897 = vmatprep.mubr.f32.mxu1 %v4806_v8  ;;  %4214 = vmatpush3.bf16.msra.mxu1 %v7054_v44  ;;  %v4812_v44 = vld [vmem:[#allocation3 + $0x61] sm:$0xff]  ;;  %v7076_v8 = vld [vmem:[#allocation18_spill] sm:$0xff] }
 0x48b   : > { %4207 = vmatprep.subr.bf16.mxu1 %v7073_v42 }
 0x48d   : > { %2898 = vmatmul.mubr.f32.gmra.mrb[34].mxu1 %v4807_v10  ;;  %v7078_v10 = vld [vmem:[#allocation20_spill] sm:$0xff] }
 0x48e   : > { %2902 = vmatprep.mubr.f32.mxu1 %v4808_v57  ;;  %4215 = vmatpush3.bf16.msra.mxu1 %v7073_v42  ;;  %v4813_v57 = vld [vmem:[#allocation3 + $0x60] sm:$0xff]  ;;  %v4814_v42 = vld [vmem:[#allocation3 + $0x69] sm:$0xff] }
 0x48f   : > { %4208 = vmatprep.subr.bf16.mxu1 %v7074_v26 }
 0x491   : > { %2903 = vmatmul.mubr.f32.gmra.mrb[36].mxu1 %v4809_v55  ;;  %v7077_v55 = vld [vmem:[#allocation19_spill] sm:$0xff] }
 0x492   : > { %2907 = vmatprep.mubr.f32.mxu1 %v4810_v39  ;;  %4216 = vmatpush3.bf16.msra.mxu1 %v7074_v26  ;;  %v4815_v39 = vld [vmem:[#allocation3 + $0x68] sm:$0xff]  ;;  %v4816_v26 = vld [vmem:[#allocation3 + $0x79] sm:$0xff] }
 0x493   : > { %4209 = vmatprep.subr.bf16.mxu1 %v7075_v37 }
 0x495   : > { %2908 = vmatmul.mubr.f32.gmra.mrb[38].mxu1 %v4811_v12  ;;  %v4817_v12 = vld [vmem:[#allocation3 + $0x78] sm:$0xff] }
 0x496   : > { %2912 = vmatprep.mubr.f32.mxu1 %v4812_v44  ;;  %4217 = vmatpush3.bf16.msra.mxu1 %v7075_v37  ;;  %v4818_v37 = vld [vmem:[#allocation3 + $0x81] sm:$0xff] }
 0x497   : > { %4210 = vmatprep.subr.bf16.mxu1 %v7076_v8  ;;  %v7079_v44 = vld [vmem:[#allocation21_spill] sm:$0xff] }
 0x499   : > { %2913 = vmatmul.mubr.f32.gmra.mrb[40].mxu1 %v4813_v57  ;;  %v4819_v57 = vld [vmem:[#allocation3 + $0x80] sm:$0xff] }
 0x49a   : > { %2917 = vmatprep.mubr.f32.mxu1 %v4814_v42  ;;  %4218 = vmatpush3.bf16.msra.mxu1 %v7076_v8  ;;  %v4820_v8 = vld [vmem:[#allocation3 + $0x91] sm:$0xff] }
 0x49b   : > { %4211 = vmatprep.subr.bf16.mxu1 %v7077_v55  ;;  %v4821_v42 = vld [vmem:[#allocation3 + $0x90] sm:$0xff] }
 0x49d   : > { %2918 = vmatmul.mubr.f32.gmra.mrb[42].mxu1 %v4815_v39  ;;  %v4822_v39 = vld [vmem:[#allocation3 + $0x99] sm:$0xff] }
 0x49e   : > { %2922 = vmatprep.mubr.f32.mxu1 %v4816_v26  ;;  %4219 = vmatpush3.bf16.msra.mxu1 %v7077_v55  ;;  %v4823_v55 = vld [vmem:[#allocation3 + $0x98] sm:$0xff]  ;;  %v4824_v26 = vld [vmem:[#allocation3 + $0xa9] sm:$0xff] }
 0x49f   : > { %4212 = vmatprep.subr.bf16.mxu1 %v7078_v10 }
 0x4a1   : > { %2923 = vmatmul.mubr.f32.gmra.mrb[44].mxu1 %v4817_v12  ;;  %v4825_v12 = vld [vmem:[#allocation3 + $0xa8] sm:$0xff] }
 0x4a2   : > { %2927 = vmatprep.mubr.f32.mxu1 %v4818_v37  ;;  %4220 = vmatpush3.bf16.msra.mxu1 %v7078_v10  ;;  %v4826_v37 = vld [vmem:[#allocation3 + $0xb1] sm:$0xff] }
 0x4a3   : > { %4213 = vmatprep.subr.bf16.mxu1 %v7079_v44  ;;  %v4827_v10 = vld [vmem:[#allocation3 + $0xb0] sm:$0xff] }
 0x4a5   : > { %2928 = vmatmul.mubr.f32.gmra.mrb[46].mxu1 %v4819_v57  ;;  %v4829_v57 = vld [vmem:[#allocation3 + $0xc0] sm:$0xff] }
 0x4a6   : > { %2932 = vmatprep.mubr.f32.mxu1 %v4820_v8  ;;  %4221 = vmatpush3.bf16.msra.mxu1 %v7079_v44  ;;  %v4830_v8 = vld [vmem:[#allocation3 + $0xc9] sm:$0xff] }
 0x4a7   : > { %v4831_v44 = vld [vmem:[#allocation3 + $0xc8] sm:$0xff] }
 0x4a9   : > { %2933 = vmatmul.mubr.f32.gmra.mrb[48].mxu1 %v4821_v42  ;;  %v4832_v42 = vld [vmem:[#allocation3 + $0xd9] sm:$0xff] }
 0x4aa   : > { %2937 = vmatprep.mubr.f32.mxu1 %v4822_v39  ;;  %v4833_v39 = vld [vmem:[#allocation3 + $0xe1] sm:$0xff] }
 0x4ad   : > { %2938 = vmatmul.mubr.f32.gmra.mrb[50].mxu1 %v4823_v55 }
 0x4ae   : > { %2942 = vmatprep.mubr.f32.mxu1 %v4824_v26 }
 0x4b1   : > { %2943 = vmatmul.mubr.f32.gmra.mrb[52].mxu1 %v4825_v12 }
 0x4b2   : > { %2947 = vmatprep.mubr.f32.mxu1 %v4826_v37  ;;  %v7080_v37 = vld [vmem:[#allocation50_spill] sm:$0xff] }
 0x4b5   : > { %2948 = vmatmul.mubr.f32.gmra.mrb[54].mxu1 %v4827_v10 }
 0x4b6   : > { %2952 = vmatprep.mubr.f32.mxu1 %v4828_v30 }
 0x4b9   : > { %2953 = vmatmul.mubr.f32.gmra.mrb[56].mxu1 %v4829_v57 }
 0x4ba   : > { %2957 = vmatprep.mubr.f32.mxu1 %v4830_v8  ;;  %v4840_v8 = vld [vmem:[#allocation2 + $0x51] sm:$0xff] }
 0x4bd   : > { %2958 = vmatmul.mubr.f32.gmra.mrb[58].mxu1 %v4831_v44 }
 0x4be   : > { %2962 = vmatprep.mubr.f32.mxu1 %v4832_v42 }
 0x4c1   : > { %2963 = vmatmul.mubr.f32.gmra.mrb[60].mxu1 %v6326_v4  ;;  %v1964_v4 = vld [vmem:[#allocation3 + $0x199] sm:$0xff] }
 0x4c2   : > { %2967 = vmatprep.mubr.f32.mxu1 %v4833_v39 }
 0x4c5   : > { %2968 = vmatmul.mubr.f32.gmra.mrb[62].mxu1 %v6337_v62 }
 0x4c6   : > { %2972 = vmatprep.mubr.f32.mxu1 %v7059_v23 }
 0x4c9   : > { %2973 = vmatmul.mubr.f32.gmra.mrb[64].mxu1 %v6350_v33 }
 0x4ca   : > { %2977 = vmatprep.mubr.f32.mxu1 %v7060_v51 }
 0x4cd   : > { %2978 = vmatmul.mubr.f32.gmra.mrb[66].mxu1 %v6361_v6 }
 0x4ce   : > { %2982 = vmatprep.mubr.f32.mxu1 %v7061_v43 }
 0x4d1   : > { %2983 = vmatmul.mubr.f32.gmra.mrb[68].mxu1 %v6374_v25  ;;  %v6756_v25 = vld [vmem:[%s6905_s4] ss:$0 sm:$0xff] }
 0x4d2   : > { %2987 = vmatprep.mubr.f32.mxu1 %v7062_v46 }
 0x4d5   : > { %2988 = vmatmul.mubr.f32.gmra.mrb[70].mxu1 %v6385_v0 }
 0x4d6   : > { %2992 = vmatprep.mubr.f32.mxu1 %v7063_v34 }
 0x4d9   : > { %2993 = vmatmul.mubr.f32.gmra.mrb[72].mxu1 %v6398_v45  ;;  %v2001_v45 = vld [vmem:[#allocation3 + $0x1a2] sm:$0xff] }
 0x4da   : > { %2997 = vmatprep.mubr.f32.mxu1 %v7064_v11 }
 0x4dd   : > { %2998 = vmatmul.mubr.f32.gmra.mrb[74].mxu1 %v6409_v41 }
 0x4de   : > { %3002 = vmatprep.mubr.f32.mxu1 %v7065_v16 }
 0x4e1   : > { %3003 = vmatmul.mubr.f32.gmra.mrb[76].mxu1 %v6422_v31  ;;  %v4834_v31 = vld [vmem:[#allocation2] sm:$0xff] }
 0x4e2   : > { %3007 = vmatprep.mubr.f32.mxu1 %v7066_v24 }
 0x4e5   : > { %3008 = vmatmul.mubr.f32.gmra.mrb[78].mxu1 %v6433_v21  ;;  %v4835_v21 = vld [vmem:[#allocation2 + $0x19] sm:$0xff] }
 0x4e6   : > { %3012 = vmatprep.mubr.f32.mxu1 %v7067_v60 }
 0x4e9   : > { %3013 = vmatmul.mubr.f32.gmra.mrb[80].mxu1 %v6446_v56  ;;  %v1965_v56 = vld [vmem:[#allocation3 + $0x1a1] sm:$0xff] }
 0x4ea   : > { %3017 = vmatprep.mubr.f32.mxu1 %v7068_v28  ;;  %v4838_v28 = vld [vmem:[#allocation2 + $0x39] sm:$0xff] }
 0x4ed   : > { %3018 = vmatmul.mubr.f32.gmra.mrb[82].mxu1 %v6455_v59 }
 0x4ee   : > { %3022 = vmatprep.mubr.f32.mxu1 %v7069_v2 }
 0x4f1   : > { %3023 = vmatmul.mubr.f32.gmra.mrb[84].mxu1 %v6464_v14  ;;  %v2000_v14 = vld [vmem:[#allocation3 + $0x19a] sm:$0xff] }
 0x4f2   : > { %3027 = vmatprep.mubr.f32.mxu1 %v7070_v29 }
 0x4f5   : > { %3028 = vmatmul.mubr.f32.gmra.mrb[86].mxu1 %v6472_v18 }
 0x4f6   : > { %3032 = vmatprep.mubr.f32.mxu1 %v7071_v9 }
 0x4f9   : > { %3033 = vmatmul.mubr.f32.gmra.mrb[88].mxu1 %v6566_v20 }
 0x4fa   : > { %3037 = vmatprep.mubr.f32.mxu1 %v7072_v5  ;;  %v4839_v5 = vld [vmem:[#allocation2 + $0x49] sm:$0xff] }
 0x4fd   : > { %3038 = vmatmul.mubr.f32.gmra.mrb[90].mxu1 %v6574_v22  ;;  %v4836_v22 = vld [vmem:[#allocation2 + $0x21] sm:$0xff] }
 0x4fe   : > { %3042 = vmatprep.mubr.f32.mxu1 %v1964_v4 }
 0x501   : > { %3043 = vmatmul.mubr.f32.gmra.mrb[92].mxu1 %v4834_v31 }
 0x502   : > { %3047 = vmatprep.mubr.f32.mxu1 %v1965_v56 }
 0x505   : > { %3048 = vmatmul.mubr.f32.gmra.mrb[94].mxu1 %v4834_v31  ;;  %v4841_v31 = vld [vmem:[#allocation2 + $0x61] sm:$0xff] }
 0x506   : > { %3746 = vmatprep.mubr.f32.mxu1 %v6555_v61 }
 0x509   : > { %3747 = vmatmul.mubr.f32.vlgmr.msra.gmra.mrb[96].mxu1 %v6563_v17 }
 0x50a   : > { %3749 = vmatprep.mubr.f32.mxu1 %v6569_v3 }
 0x50d   : > { %3750 = vmatmul.mubr.f32.gmra.mrb[98].mxu1 %v6579_v47 }
 0x50e   : > { %3752 = vmatprep.mubr.f32.mxu1 %v6694_v35 }
 0x511   : > { %3753 = vmatmul.mubr.f32.gmra.mrb[100].mxu1 %v6698_v58 }
 0x512   : > { %3755 = vmatprep.mubr.f32.mxu1 %v2000_v14 }
 0x515   : > { %3756 = vmatmul.mubr.f32.gmra.mrb[102].mxu1 %v2001_v45 }
 0x55c   : > { %v2894_v33 = vpop.f32.mrb[32].mxu1 }
 0x55d   : > { %v4254_v62 = vadd.f32 %v6756_v25, %v2894_v33  ;;  %v2896_v6 = vpop.f32.mrb[33].mxu1 }
 0x55e   : > { %v7081_v6 = vld [vmem:[#allocation51_spill] sm:$0xff] }
 0x55f   : > { %v3120_v0 = vadd.f32 %v4254_v62, %v6550_v40 }
 0x560   : > { %v2899_v41 = vpop.f32.mrb[34].mxu1 }
 0x561   : > { %v3278_v59 = vadd.f32 %v4835_v21, %v3120_v0  ;;  %v4255_v18 = vadd.f32 %v6756_v25, %v2899_v41  ;;  %v2901_v61 = vpop.f32.mrb[35].mxu1  ;;  %v4842_v21 = vld [vmem:[#allocation2 + $0x69] sm:$0xff] }
 0x563   : > { %v3310_v17 = vmax.f32 %v3278_v59, 0.0  ;;  %v3125_v20 = vadd.f32 %v4255_v18, %v6547_v63  ;;  %v4837_v63 = vld [vmem:[#allocation2 + $0x31] sm:$0xff] }
 0x564   : > { %v2904_v3 = vpop.f32.mrb[36].mxu1 }
 0x565   : > { %3342 = vst [vmem:[%s6764_s10] sm:$0xff] %v3310_v17  ;;  %v3279_v47 = vadd.f32 %v4836_v22, %v3125_v20  ;;  %v4256_v40 = vadd.f32 %v6756_v25, %v2904_v3  ;;  %v2906_v30 = vpop.f32.mrb[37].mxu1  ;;  %v4843_v3 = vld [vmem:[#allocation2 + $0x79] sm:$0xff] }
 0x567   : > { %v3311_v23 = vmax.f32 %v3279_v47, 0.0  ;;  %v3130_v51 = vadd.f32 %v4256_v40, %v6560_v50 }
 0x568   : > { %v2909_v43 = vpop.f32.mrb[38].mxu1 }
 0x569   : > { %3343 = vst [vmem:[%s6764_s10 + $0x8] sm:$0xff] %v3311_v23  ;;  %v3280_v46 = vadd.f32 %v4837_v63, %v3130_v51  ;;  %v4257_v34 = vadd.f32 %v6756_v25, %v2909_v43  ;;  %v2911_v11 = vpop.f32.mrb[39].mxu1  ;;  %v4844_v43 = vld [vmem:[#allocation2 + $0x81] sm:$0xff] }
 0x56b   : > { %v3312_v16 = vmax.f32 %v3280_v46, 0.0  ;;  %v3135_v24 = vadd.f32 %v4257_v34, %v6557_v52 }
 0x56c   : > { %v2914_v60 = vpop.f32.mrb[40].mxu1 }
 0x56d   : > { %3344 = vst [vmem:[%s6764_s10 + $0x10] sm:$0xff] %v3312_v16  ;;  %v3281_v2 = vadd.f32 %v4838_v28, %v3135_v24  ;;  %v4258_v29 = vadd.f32 %v6756_v25, %v2914_v60  ;;  %v2916_v35 = vpop.f32.mrb[41].mxu1  ;;  %v4845_v24 = vld [vmem:[#allocation2 + $0x91] sm:$0xff] }
 0x56f   : > { %v3313_v50 = vmax.f32 %v3281_v2, 0.0  ;;  %v3140_v9 = vadd.f32 %v4258_v29, %v6576_v7 }
 0x570   : > { %v2919_v58 = vpop.f32.mrb[42].mxu1 }
 0x571   : > { %3345 = vst [vmem:[%s6764_s10 + $0x18] sm:$0xff] %v3313_v50  ;;  %v3282_v55 = vadd.f32 %v4839_v5, %v3140_v9  ;;  %v4259_v26 = vadd.f32 %v6756_v25, %v2919_v58  ;;  %v2921_v12 = vpop.f32.mrb[43].mxu1  ;;  %v4846_v50 = vld [vmem:[#allocation2 + $0x99] sm:$0xff] }
 0x572   : > { %v4847_v12 = vld [vmem:[#allocation2 + $0xa9] sm:$0xff] }
 0x573   : > { %v3314_v52 = vmax.f32 %v3282_v55, 0.0  ;;  %v3145_v10 = vadd.f32 %v4259_v26, %v7080_v37 }
 0x574   : > { %v2924_v57 = vpop.f32.mrb[44].mxu1 }
 0x575   : > { %3346 = vst [vmem:[%s6764_s10 + $0x20] sm:$0xff] %v3314_v52  ;;  %v3283_v44 = vadd.f32 %v4840_v8, %v3145_v10  ;;  %v4260_v42 = vadd.f32 %v6756_v25, %v2924_v57  ;;  %v2926_v39 = vpop.f32.mrb[45].mxu1 }
 0x577   : > { %v3315_v7 = vmax.f32 %v3283_v44, 0.0  ;;  %v3150_v4 = vadd.f32 %v4260_v42, %v6586_v38  ;;  %v4848_v44 = vld [vmem:[#allocation2 + $0xb1] sm:$0xff] }
 0x578   : > { %v2929_v56 = vpop.f32.mrb[46].mxu1 }
 0x579   : > { %3347 = vst [vmem:[%s6764_s10 + $0x28] sm:$0xff] %v3315_v7  ;;  %v3284_v14 = vadd.f32 %v4841_v31, %v3150_v4  ;;  %v4261_v45 = vadd.f32 %v6756_v25, %v2929_v56  ;;  %v2931_v33 = vpop.f32.mrb[47].mxu1  ;;  %v4849_v31 = vld [vmem:[#allocation2 + $0xc1] sm:$0xff] }
 0x57b   : > { %v3316_v62 = vmax.f32 %v3284_v14, 0.0  ;;  %v3155_v0 = vadd.f32 %v4261_v45, %v7081_v6 }
 0x57c   : > { %v2934_v41 = vpop.f32.mrb[48].mxu1 }
 0x57d   : > { %3348 = vst [vmem:[%s6764_s10 + $0x30] sm:$0xff] %v3316_v62  ;;  %v3285_v59 = vadd.f32 %v4842_v21, %v3155_v0  ;;  %v4262_v18 = vadd.f32 %v6756_v25, %v2934_v41  ;;  %v2936_v61 = vpop.f32.mrb[49].mxu1  ;;  %v4850_v0 = vld [vmem:[#allocation2 + $0xc9] sm:$0xff] }
 0x57f   : > { %v3317_v38 = vmax.f32 %v3285_v59, 0.0  ;;  %v3160_v17 = vadd.f32 %v4262_v18, %v6596_v15 }
 0x580   : > { %v2939_v20 = vpop.f32.mrb[50].mxu1 }
 0x581   : > { %3349 = vst [vmem:[%s6764_s10 + $0x38] sm:$0xff] %v3317_v38  ;;  %v3286_v22 = vadd.f32 %v4843_v3, %v3160_v17  ;;  %v4263_v47 = vadd.f32 %v6756_v25, %v2939_v20  ;;  %v2941_v40 = vpop.f32.mrb[51].mxu1  ;;  %v4851_v38 = vld [vmem:[#allocation2 + $0xd9] sm:$0xff] }
 0x582   : > { %v4852_v40 = vld [vmem:[#allocation2 + $0xe1] sm:$0xff] }
 0x583   : > { %v3318_v30 = vmax.f32 %v3286_v22, 0.0  ;;  %v3165_v23 = vadd.f32 %v4263_v47, %v6593_v48 }
 0x584   : > { %v2944_v51 = vpop.f32.mrb[52].mxu1 }
 0x585   : > { %3350 = vst [vmem:[%s6764_s10 + $0x40] sm:$0xff] %v3318_v30  ;;  %v3287_v63 = vadd.f32 %v4844_v43, %v3165_v23  ;;  %v4264_v46 = vadd.f32 %v6756_v25, %v2944_v51  ;;  %v2946_v34 = vpop.f32.mrb[53].mxu1 }
 0x587   : > { %v3319_v15 = vmax.f32 %v3287_v63, 0.0  ;;  %v3170_v11 = vadd.f32 %v4264_v46, %v6606_v36  ;;  %v4853_v46 = vld [vmem:[#allocation2 + $0xf1] sm:$0xff] }
 0x588   : > { %v2949_v16 = vpop.f32.mrb[54].mxu1 }
 0x589   : > { %3351 = vst [vmem:[%s6764_s10 + $0x48] sm:$0xff] %v3319_v15  ;;  %v3288_v60 = vadd.f32 %v4845_v24, %v3170_v11  ;;  %v4265_v28 = vadd.f32 %v6756_v25, %v2949_v16  ;;  %v2951_v2 = vpop.f32.mrb[55].mxu1  ;;  %v7082_v16 = vld [vmem:[#allocation22_spill] sm:$0xff] }
 0x58b   : > { %v3320_v48 = vmax.f32 %v3288_v60, 0.0  ;;  %v3175_v29 = vadd.f32 %v4265_v28, %v6603_v27  ;;  %v4854_v28 = vld [vmem:[#allocation2 + $0xf9] sm:$0xff] }
 0x58c   : > { %v2954_v35 = vpop.f32.mrb[56].mxu1 }
 0x58d   : > { %3352 = vst [vmem:[%s6764_s10 + $0x50] sm:$0xff] %v3320_v48  ;;  %v3289_v9 = vadd.f32 %v4846_v50, %v3175_v29  ;;  %v4266_v58 = vadd.f32 %v6756_v25, %v2954_v35  ;;  %v2956_v5 = vpop.f32.mrb[57].mxu1  ;;  %v7083_v35 = vld [vmem:[#allocation24_spill] sm:$0xff] }
 0x58f   : > { %v3321_v36 = vmax.f32 %v3289_v9, 0.0  ;;  %v3180_v55 = vadd.f32 %v4266_v58, %v6616_v1  ;;  %v4855_v58 = vld [vmem:[#allocation2 + $0x109] sm:$0xff] }
 0x590   : > { %v2959_v26 = vpop.f32.mrb[58].mxu1 }
 0x591   : > { %3353 = vst [vmem:[%s6764_s10 + $0x58] sm:$0xff] %v3321_v36  ;;  %v3290_v52 = vadd.f32 %v4847_v12, %v3180_v55  ;;  %v4267_v37 = vadd.f32 %v6756_v25, %v2959_v26  ;;  %v2961_v10 = vpop.f32.mrb[59].mxu1  ;;  %v7084_v12 = vld [vmem:[#allocation23_spill] sm:$0xff] }
 0x592   : > { %v4856_v10 = vld [vmem:[#allocation2 + $0x111] sm:$0xff] }
 0x593   : > { %v3322_v27 = vmax.f32 %v3290_v52, 0.0  ;;  %v3185_v57 = vadd.f32 %v4267_v37, %v6613_v54 }
 0x594   : > { %v2964_v8 = vpop.f32.mrb[60].mxu1 }
 0x595   : > { %3354 = vst [vmem:[%s6764_s10 + $0x60] sm:$0xff] %v3322_v27  ;;  %v3291_v42 = vadd.f32 %v4848_v44, %v3185_v57  ;;  %v4268_v39 = vadd.f32 %v6756_v25, %v2964_v8  ;;  %v2966_v7 = vpop.f32.mrb[61].mxu1 }
 0x597   : > { %v3323_v1 = vmax.f32 %v3291_v42, 0.0  ;;  %v3190_v4 = vadd.f32 %v4268_v39, %v6626_v49  ;;  %v7085_v42 = vld [vmem:[#allocation26_spill] sm:$0xff] }
 0x598   : > { %v2969_v56 = vpop.f32.mrb[62].mxu1 }
 0x599   : > { %3355 = vst [vmem:[%s6764_s10 + $0x68] sm:$0xff] %v3323_v1  ;;  %v3292_v14 = vadd.f32 %v4849_v31, %v3190_v4  ;;  %v4269_v45 = vadd.f32 %v6756_v25, %v2969_v56  ;;  %v2971_v33 = vpop.f32.mrb[63].mxu1  ;;  %v4857_v1 = vld [vmem:[#allocation2 + $0x121] sm:$0xff] }
 0x59b   : > { %v3324_v54 = vmax.f32 %v3292_v14, 0.0  ;;  %v3195_v62 = vadd.f32 %v4269_v45, %v6623_v32  ;;  %v7086_v45 = vld [vmem:[#allocation25_spill] sm:$0xff] }
 0x59c   : > { %v2974_v6 = vpop.f32.mrb[64].mxu1 }
 0x59d   : > { %3356 = vst [vmem:[%s6764_s10 + $0x70] sm:$0xff] %v3324_v54  ;;  %v3293_v41 = vadd.f32 %v4850_v0, %v3195_v62  ;;  %v4270_v21 = vadd.f32 %v6756_v25, %v2974_v6  ;;  %v2976_v59 = vpop.f32.mrb[65].mxu1  ;;  %v4858_v62 = vld [vmem:[#allocation2 + $0x129] sm:$0xff] }
 0x59f   : > { %v3325_v49 = vmax.f32 %v3293_v41, 0.0  ;;  %v3200_v18 = vadd.f32 %v4270_v21, %v6636_v13 }
 0x5a0   : > { %v2979_v61 = vpop.f32.mrb[66].mxu1 }
 0x5a1   : > { %3357 = vst [vmem:[%s6764_s10 + $0x78] sm:$0xff] %v3325_v49  ;;  %v3294_v17 = vadd.f32 %v4851_v38, %v3200_v18  ;;  %v4271_v20 = vadd.f32 %v6756_v25, %v2979_v61  ;;  %v2981_v3 = vpop.f32.mrb[67].mxu1 }
 0x5a3   : > { %v3326_v32 = vmax.f32 %v3294_v17, 0.0  ;;  %v3205_v22 = vadd.f32 %v4271_v20, %v6633_v19 }
 0x5a4   : > { %v2984_v47 = vpop.f32.mrb[68].mxu1 }
 0x5a5   : > { %3358 = vst [vmem:[%s6764_s10 + $0x80] sm:$0xff] %v3326_v32  ;;  %v3295_v30 = vadd.f32 %v4852_v40, %v3205_v22  ;;  %v4272_v23 = vadd.f32 %v6756_v25, %v2984_v47  ;;  %v2986_v51 = vpop.f32.mrb[69].mxu1 }
 0x5a7   : > { %v3327_v13 = vmax.f32 %v3295_v30, 0.0  ;;  %v3210_v43 = vadd.f32 %v4272_v23, %v6646_v53 }
 0x5a8   : > { %v2989_v63 = vpop.f32.mrb[70].mxu1 }
 0x5a9   : > { %3359 = vst [vmem:[%s6764_s10 + $0x88] sm:$0xff] %v3327_v13  ;;  %v3296_v34 = vadd.f32 %v4853_v46, %v3210_v43  ;;  %v4273_v15 = vadd.f32 %v6756_v25, %v2989_v63  ;;  %v2991_v11 = vpop.f32.mrb[71].mxu1 }
 0x5ab   : > { %v3328_v19 = vmax.f32 %v3296_v34, 0.0  ;;  %v3215_v24 = vadd.f32 %v4273_v15, %v7082_v16  ;;  %v4859_v15 = vld [vmem:[#allocation2 + $0x141] sm:$0xff]  ;;  %v4860_v16 = vld [vmem:[#allocation2 + $0x139] sm:$0xff] }
 0x5ac   : > { %v2994_v60 = vpop.f32.mrb[72].mxu1 }
 0x5ad   : > { %3360 = vst [vmem:[%s6764_s10 + $0x90] sm:$0xff] %v3328_v19  ;;  %v3297_v2 = vadd.f32 %v4854_v28, %v3215_v24  ;;  %v4274_v48 = vadd.f32 %v6756_v25, %v2994_v60  ;;  %v2996_v29 = vpop.f32.mrb[73].mxu1 }
 0x5af   : > { %v3329_v53 = vmax.f32 %v3297_v2, 0.0  ;;  %v3220_v50 = vadd.f32 %v4274_v48, %v7083_v35 }
 0x5b0   : > { %v2999_v9 = vpop.f32.mrb[74].mxu1 }
 0x5b1   : > { %3361 = vst [vmem:[%s6764_s10 + $0x98] sm:$0xff] %v3329_v53  ;;  %v3298_v5 = vadd.f32 %v4855_v58, %v3220_v50  ;;  %v4275_v36 = vadd.f32 %v6756_v25, %v2999_v9  ;;  %v3001_v55 = vpop.f32.mrb[75].mxu1  ;;  %v4861_v50 = vld [vmem:[#allocation2 + $0x159] sm:$0xff] }
 0x5b3   : > { %v3330_v26 = vmax.f32 %v3298_v5, 0.0  ;;  %v3225_v52 = vadd.f32 %v4275_v36, %v7084_v12  ;;  %v4862_v5 = vld [vmem:[#allocation2 + $0x151] sm:$0xff] }
 0x5b4   : > { %v3004_v37 = vpop.f32.mrb[76].mxu1 }
 0x5b5   : > { %3362 = vst [vmem:[%s6764_s10 + $0xa0] sm:$0xff] %v3330_v26  ;;  %v3299_v27 = vadd.f32 %v4856_v10, %v3225_v52  ;;  %v4276_v57 = vadd.f32 %v6756_v25, %v3004_v37  ;;  %v3006_v8 = vpop.f32.mrb[77].mxu1 }
 0x5b7   : > { %v3331_v44 = vmax.f32 %v3299_v27, 0.0  ;;  %v3230_v39 = vadd.f32 %v4276_v57, %v7085_v42  ;;  %v4863_v57 = vld [vmem:[#allocation2 + $0x171] sm:$0xff]  ;;  %v4864_v42 = vld [vmem:[#allocation2 + $0x169] sm:$0xff] }
 0x5b8   : > { %v3009_v7 = vpop.f32.mrb[78].mxu1 }
 0x5b9   : > { %3363 = vst [vmem:[%s6764_s10 + $0xa8] sm:$0xff] %v3331_v44  ;;  %v3300_v4 = vadd.f32 %v4857_v1, %v3230_v39  ;;  %v4277_v56 = vadd.f32 %v6756_v25, %v3009_v7  ;;  %v3011_v31 = vpop.f32.mrb[79].mxu1 }
 0x5bb   : > { %v3332_v14 = vmax.f32 %v3300_v4, 0.0  ;;  %v3235_v33 = vadd.f32 %v4277_v56, %v7086_v45  ;;  %v4865_v45 = vld [vmem:[#allocation2 + $0x189] sm:$0xff] }
 0x5bc   : > { %v3014_v54 = vpop.f32.mrb[80].mxu1 }
 0x5bd   : > { %3364 = vst [vmem:[%s6764_s10 + $0xb0] sm:$0xff] %v3332_v14  ;;  %v3301_v6 = vadd.f32 %v4858_v62, %v3235_v33  ;;  %v3016_v0 = vpop.f32.mrb[81].mxu1  ;;  %v4278_v51 = vadd.f32 %v6756_v25, %v3014_v54 }
 0x5bf   : > { %v3333_v41 = vmax.f32 %v3301_v6, 0.0 }
 0x5c0   : > { %v3019_v21 = vpop.f32.mrb[82].mxu1 }
 0x5c1   : > { %3365 = vst [vmem:[%s6764_s10 + $0xb8] sm:$0xff] %v3333_v41  ;;  %v3021_v59 = vpop.f32.mrb[83].mxu1  ;;  %v4279_v23 = vadd.f32 %v6756_v25, %v3019_v21 }
 0x5c4   : > { %v3024_v49 = vpop.f32.mrb[84].mxu1 }
 0x5c5   : > { %v3026_v18 = vpop.f32.mrb[85].mxu1  ;;  %v4280_v19 = vadd.f32 %v6756_v25, %v3024_v49 }
 0x5c8   : > { %v3029_v61 = vpop.f32.mrb[86].mxu1 }
 0x5c9   : > { %v3031_v38 = vpop.f32.mrb[87].mxu1  ;;  %v4281_v34 = vadd.f32 %v6756_v25, %v3029_v61 }
 0x5cc   : > { %v3034_v17 = vpop.f32.mrb[88].mxu1 }
 0x5cd   : > { %v3036_v20 = vpop.f32.mrb[89].mxu1  ;;  %v4282_v58 = vadd.f32 %v6756_v25, %v3034_v17 }
 0x5d0   : > { %v3039_v3 = vpop.f32.mrb[90].mxu1 }
 0x5d1   : > { %v3041_v32 = vpop.f32.mrb[91].mxu1  ;;  %v4283_v35 = vadd.f32 %v6756_v25, %v3039_v3 }
 0x5d4   : > { %v3044_v22 = vpop.f32.mrb[92].mxu1 }
 0x5d5   : > { %v3046_v47 = vpop.f32.mrb[93].mxu1  ;;  %v4284_v44 = vadd.f32 %v6756_v25, %v3044_v22 }
 0x5d8   : > { %v3049_v40 = vpop.f32.mrb[94].mxu1 }
 0x5d9   : > { %v3051_v30 = vpop.f32.mrb[95].mxu1  ;;  %v4285_v27 = vadd.f32 %v6756_v25, %v3049_v40  ;;  %v4866_v25 = vld [vmem:[#allocation2 + $0x181] sm:$0xff] }
 0x5dc   : > { %v3748_v13 = vpop.f32.mrb[96].mxu1 }
 0x5dd   : > { %v3245_v43 = vadd.f32 %v4279_v23, %v3748_v13  ;;  %v3239_v63 = vpop.f32.mrb[97].mxu1 }
 0x5de   : > { %v3240_v46 = vadd.f32 %v4278_v51, %v3239_v63 }
 0x5df   : > { %v3303_v11 = vadd.f32 %v4859_v15, %v3245_v43 }
 0x5e0   : > { %v3302_v24 = vadd.f32 %v4860_v16, %v3240_v46  ;;  %v3751_v60 = vpop.f32.mrb[98].mxu1 }
 0x5e1   : > { %v3335_v28 = vmax.f32 %v3303_v11, 0.0  ;;  %v3255_v2 = vadd.f32 %v4281_v34, %v3751_v60  ;;  %v3249_v48 = vpop.f32.mrb[99].mxu1 }
 0x5e2   : > { %v3334_v29 = vmax.f32 %v3302_v24, 0.0  ;;  %v3250_v53 = vadd.f32 %v4280_v19, %v3249_v48 }
 0x5e3   : > { %3367 = vst [vmem:[%s6764_s10 + $0xc8] sm:$0xff] %v3335_v28  ;;  %v3305_v9 = vadd.f32 %v4861_v50, %v3255_v2 }
 0x5e4   : > { %3366 = vst [vmem:[%s6764_s10 + $0xc0] sm:$0xff] %v3334_v29  ;;  %v3304_v36 = vadd.f32 %v4862_v5, %v3250_v53  ;;  %v3754_v55 = vpop.f32.mrb[100].mxu1 }
 0x5e5   : > { %v3337_v26 = vmax.f32 %v3305_v9, 0.0  ;;  %v3265_v12 = vadd.f32 %v4283_v35, %v3754_v55  ;;  %v3259_v52 = vpop.f32.mrb[101].mxu1 }
 0x5e6   : > { %v3336_v37 = vmax.f32 %v3304_v36, 0.0  ;;  %v3260_v10 = vadd.f32 %v4282_v58, %v3259_v52 }
 0x5e7   : > { %3369 = vst [vmem:[%s6764_s10 + $0xd8] sm:$0xff] %v3337_v26  ;;  %v3307_v8 = vadd.f32 %v4863_v57, %v3265_v12 }
 0x5e8   : > { %3368 = vst [vmem:[%s6764_s10 + $0xd0] sm:$0xff] %v3336_v37  ;;  %v3306_v39 = vadd.f32 %v4864_v42, %v3260_v10  ;;  %v3757_v7 = vpop.f32.mrb[102].mxu1 }
 0x5e9   : > { %v3339_v1 = vmax.f32 %v3307_v8, 0.0  ;;  %v3275_v4 = vadd.f32 %v4285_v27, %v3757_v7  ;;  %v3269_v56 = vpop.f32.mrb[103].mxu1 }
 0x5ea   : > { %v3338_v31 = vmax.f32 %v3306_v39, 0.0  ;;  %v3270_v14 = vadd.f32 %v4284_v44, %v3269_v56 }
 0x5eb   : > { %3371 = vst [vmem:[%s6764_s10 + $0xe8] sm:$0xff] %v3339_v1  ;;  %v3309_v33 = vadd.f32 %v4865_v45, %v3275_v4 }
 0x5ec   : > { %3370 = vst [vmem:[%s6764_s10 + $0xe0] sm:$0xff] %v3338_v31  ;;  %v3308_v54 = vadd.f32 %v4866_v25, %v3270_v14 }
 0x5ed   : > { %v3341_v62 = vmax.f32 %v3309_v33, 0.0 }
 0x5ee   : > { %v3340_v6 = vmax.f32 %v3308_v54, 0.0 }
 0x5ef   : > { %3373 = vst [vmem:[%s6764_s10 + $0xf8] sm:$0xff] %v3341_v62 }
 0x5f0   : > { %3372 = vst [vmem:[%s6764_s10 + $0xf0] sm:$0xff] %v3340_v6 }
 0x5f1   : > { %4966 = shalt.err (!%p4963_p1)
}
 0x5f2   : > { %s4967_s12 = scalar_lea.hbm %s6853_s11, 4096  ;;  %s4971_s15 = scalar_lea.hbm %s6906_s5, 8192 }
 0x5f3   : > { %p4968_p13 = scmp.ne.s32.totalorder %s6853_s11, %s4967_s12  ;;  %p4972_p4 = scmp.lt.u32.totalorder %s6853_s11, %s6906_s5 }
 0x5f4   : > { %p4973_p5 = scmp.lt.u32.totalorder %s4971_s15, %s4967_s12  ;;  %p4975_p11 = scmp.lt.u32.totalorder %s4967_s12, %s6853_s11 }
 0x5f5   : > { %p4969_p6 = pnand %p4968_p13, %p7087_p0 }
 0x5f6   : > { %p4974_p8 = por %p4973_p5, %p4972_p4 }
 0x5f7   : > { %p4970_p10 = pneg %p4969_p6 }
 0x5f8   : > { %p4976_p2 = por %p4975_p11, %p4974_p8 }
 0x5fa   : > { %p4977_p3 = pnand %p4976_p2, %p4970_p10 }
 0x5fc   : > { %4980 = shalt.err (!%p4977_p3)
}
 0x5fd   : > { %s5033_s28 = smov 128   ;;  %s5034_s9 = smov 8  }
 0x5fe   : > { %4680 = dma.vmem_to_hbm [thread:$0]  (%p7087_p0), %s6855_s13, 4096, %s6853_s11, %s3375_s22, %s5033_s28, %s5033_s28, %s5034_s9  }
 0x5ff PF: > { %s3403_s30 = sand.u32 1, %s5011_s18   ;;  %p7088_p7 = scmp.ne.s32.totalorder %s6979_s25, 0 }
 0x600   : > { %p7089_p9 = scmp.ge.s32.totalorder %s5023_s21, 2  ;;  %s3404_s17 = scalar_lea.sflag [#allocation6], %s3403_s30 }
 0x602   : > { %p4694_p12 = pnand %p7089_p9, %p7088_p7 }
 0x604   : > { %5006 = dma.done.wait (!%p4694_p12), %s3404_s17, 4096  }
 0x605   : > { %5008 = vsyncadd (!%p4694_p12), %s3404_s17, 4294963200  ;;  %p19_p1 = scmp.ge.s32.totalorder %s5181_s29, 4   ;;  %s7090_s18 = smov %s5015_s19 }
 0x606   : > { %s7091_s19 = smov %s5019_s20  ;;  %s7092_s20 = smov %s5197_s27 }
 0x607   : > { %s7093_s21 = smov %s5181_s29  ;;  %21 = sbr.rel (!%p19_p1) target bundleno = 6 (0x6), region = 95 }
 0x60e   :  { %3409 = vsyncpa [#allocation5], 1 }
 0x60f   :  { %3411 = vsyncpa [#allocation5 + $0x1], 1 }
 0x610   :  { %3412 = vsyncpa [#allocation8], 1 }
 0x611   :  { %3413 = vsyncpa [#allocation6], 1 }
 0x612   :  { %3415 = vsyncpa [#allocation6 + $0x1], 1 }

</bundles_post_ra>
